<compile_context>
chip_gen: v7x
topology: tpu7x:2x2x1
jax: 0.10.0
libtpu: 0.0.40
codegen_flags: <defaults>
</compile_context>

<pallas_src>
import functools

import jax
import jax.numpy as jnp
from jax.experimental import pallas as pl
from jax.experimental.pallas import tpu as pltpu

F32 = jnp.float32
VMEM = pl.BlockSpec(memory_space=pltpu.MemorySpace.VMEM)
SMEM = pl.BlockSpec(memory_space=pltpu.MemorySpace.SMEM)


def _gru_gates(xp, hp, h_prev, H):
    """One GRU update on pre-activations xp/hp: (rows, 3H), PyTorch gate order
    [r, z, n].  r and z share a single sigmoid over the first 2H lanes."""
    rz = jax.nn.sigmoid(xp[:, :2 * H] + hp[:, :2 * H])
    r = rz[:, :H]
    z = rz[:, H:]
    n = jnp.tanh(xp[:, 2 * H:] + r * hp[:, 2 * H:])
    return (1.0 - z) * n + z * h_prev


def make_fused_kernel(B, W, D, K, hidden_sizes, Hrec, n_rec_layers, O):
    n_bigru = len(hidden_sizes)

    def kernel(*refs):
        it = iter(refs)
        # ----- inputs -----
        xpad = next(it)[...]                  # (W+K-1, B, D) time-major, zero padded
        conv_m = next(it)[...]                # (K, D, D) per-tap matrices
        conv_b = next(it)[...]                # (1, D)
        bigru_w = [tuple(next(it)[...] for _ in range(7)) for _ in range(n_bigru)]
        attn_w_hid = next(it)[...]            # (H_last, E)   query [h, h] pre-folded
        attn_w_enc = next(it)[...]            # (E, E)
        attn_b = next(it)[...]                # (1, E)
        attn_v = next(it)[...]                # (1, E)
        fc_w = next(it)[...]                  # (E, O)
        fc_b = next(it)[...]                  # (1, O)
        rec_M = next(it)[...]                 # (E, W*3*Hrec) repeat_interleave folded in
        rec_bih = next(it)[...]               # (1, W*3*Hrec) b_ih tiled over W
        rec0_whh = next(it)[...]              # (Hrec, 3*Hrec)
        rec0_bhh = next(it)[...]              # (1, 3*Hrec)
        rec_rest = [tuple(next(it)[...] for _ in range(4))
                    for _ in range(n_rec_layers - 1)]
        rec_fc_w = next(it)[...]              # (Hrec, O)
        rec_fc_b = next(it)[...]              # (1, O)
        resw_ref = next(it)                   # (1, 1) SMEM
        # ----- outputs -----
        pred_ref = next(it)                   # (B, O)
        recon_ref = next(it)                  # (W, B, O) time-major
        # ----- scratch -----
        seq_fb = [(next(it), next(it)) for _ in range(n_bigru)]  # (W,B,H_li) each
        dec_ref = next(it)                    # (W, B, Hrec)

        # ---- ConvLayer: same-padded Conv1d(D->D,K) + ReLU as K accumulated matmuls
        #      over time-shifted views (no in-kernel lane concat) ----
        acc = jnp.dot(xpad[0:W].reshape(W * B, D), conv_m[0],
                      preferred_element_type=F32)
        for j in range(1, K):
            acc = acc + jnp.dot(xpad[j:j + W].reshape(W * B, D), conv_m[j],
                                preferred_element_type=F32)
        seq0 = jnp.maximum(acc + conv_b, 0.0)                     # (W*B, D) time-major

        # TODO(synk): TemporalConvNetSENet + AdaptiveAvgPool1d branch is dead code in
        # the reference forward (its features never reach the returned outputs) and
        # its source was not provided, so it is intentionally not implemented.

        # ---- stacked bidirectional GRUs: fwd/bwd recurrences fused on (2B, H) ----
        h_query = None
        for li in range(n_bigru):
            H = hidden_sizes[li]
            wih_f, bih_f, wih_b, bih_b, whh_fb, bhh_f, bhh_b = bigru_w[li]
            # Hoisted input projections (all timesteps, per direction).
            if li == 0:
                xp_f = jnp.dot(seq0, wih_f, preferred_element_type=F32) + bih_f
                xp_b = jnp.dot(seq0, wih_b, preferred_element_type=F32) + bih_b
            else:
                Hp = hidden_sizes[li - 1]
                pf = seq_fb[li - 1][0][...].reshape(W * B, Hp)
                pb = seq_fb[li - 1][1][...].reshape(W * B, Hp)
                xp_f = (jnp.dot(pf, wih_f[:Hp], preferred_element_type=F32)
                        + jnp.dot(pb, wih_f[Hp:], preferred_element_type=F32) + bih_f)
                xp_b = (jnp.dot(pf, wih_b[:Hp], preferred_element_type=F32)
                        + jnp.dot(pb, wih_b[Hp:], preferred_element_type=F32) + bih_b)
            xp_f = xp_f.reshape(W, B, 3 * H)
            xp_b = xp_b.reshape(W, B, 3 * H)
            bhh = jnp.concatenate([jnp.broadcast_to(bhh_f, (B, 3 * H)),
                                   jnp.broadcast_to(bhh_b, (B, 3 * H))], axis=0)
            fwd_rows = jax.lax.broadcasted_iota(jnp.int32, (2 * B, 3 * H), 0) < B
            sf_ref, sb_ref = seq_fb[li]

            h_st = jnp.zeros((2 * B, H), F32)      # rows [:B] fwd, rows [B:] bwd
            for s in range(W):                     # fully unrolled, static indices
                proj = jnp.dot(h_st, whh_fb, preferred_element_type=F32)  # (2B, 6H)
                hp = jnp.where(fwd_rows, proj[:, :3 * H], proj[:, 3 * H:]) + bhh
                xp_s = jnp.concatenate([xp_f[s], xp_b[W - 1 - s]], axis=0)  # (2B, 3H)
                h_st = _gru_gates(xp_s, hp, h_st, H)
                sf_ref[s] = h_st[:B]               # fwd state at time s
                sb_ref[W - 1 - s] = h_st[B:]       # bwd state at time W-1-s
            h_query = h_st[B:]                     # hidden[-1]: final backward hidden

        # ---- GlobalAttention (query = hidden[-1] duplicated, pre-folded) + predict ----
        Hl = hidden_sizes[-1]
        E = 2 * Hl
        f_enc = seq_fb[-1][0][...]                 # (W, B, Hl)
        b_enc = seq_fb[-1][1][...]
        e_hid = jnp.dot(h_query, attn_w_hid, preferred_element_type=F32) + attn_b
        e_enc = (jnp.dot(f_enc.reshape(W * B, Hl), attn_w_enc[:Hl],
                         preferred_element_type=F32)
                 + jnp.dot(b_enc.reshape(W * B, Hl), attn_w_enc[Hl:],
                           preferred_element_type=F32)).reshape(W, B, E)
        energy = jnp.tanh(e_hid[None, :, :] + e_enc)
        scores = jnp.sum(energy * attn_v, axis=-1, keepdims=True)   # VPU mul + lane reduce
        scores = scores - jnp.max(scores, axis=0, keepdims=True)    # stable softmax (time)
        ex = jnp.exp(scores)
        attw = ex * pl.reciprocal(jnp.sum(ex, axis=0, keepdims=True), approx=True)
        ctx_f = jnp.sum(f_enc * attw, axis=0)                       # (B, Hl)
        ctx_b = jnp.sum(b_enc * attw, axis=0)
        ctx = jnp.concatenate([ctx_f, ctx_b], axis=-1)              # (B, E)
        pred_ref[...] = jnp.dot(ctx, fc_w, preferred_element_type=F32) + fc_b

        # ---- ReconstructionModel: hoisted layer-0 input projection (one matmul),
        #      GRU decoder with per-step stores to scratch, resweight + Linear epilogue ----
        G = 3 * Hrec
        xp_all = jnp.dot(ctx, rec_M, preferred_element_type=F32) + rec_bih  # (B, W*G)
        h = jnp.zeros((B, Hrec), F32)
        for t in range(W):
            hp = jnp.dot(h, rec0_whh, preferred_element_type=F32) + rec0_bhh
            h = _gru_gates(xp_all[:, t * G:(t + 1) * G], hp, h, Hrec)
            dec_ref[t] = h
        for (wih, bih, whh, bhh) in rec_rest:
            dec_prev = dec_ref[...].reshape(W * B, Hrec)
            xp_l = (jnp.dot(dec_prev, wih, preferred_element_type=F32)
                    + bih).reshape(W, B, G)
            h = jnp.zeros((B, Hrec), F32)
            for t in range(W):
                hp = jnp.dot(h, whh, preferred_element_type=F32) + bhh
                h = _gru_gates(xp_l[t], hp, h, Hrec)
                dec_ref[t] = h
        dec = dec_ref[...] * (1.0 + resw_ref[0, 0])   # decoder_out + resweight*decoder_out
        recon_ref[...] = (jnp.dot(dec.reshape(W * B, Hrec), rec_fc_w,
                                  preferred_element_type=F32)
                          + rec_fc_b).reshape(W, B, O)

    return kernel


# ------------------------------ parameter packing ------------------------------

def _uniform(key, shape, bound):
    return jax.random.uniform(key, shape, F32, minval=-bound, maxval=bound)


def _gru_dir_params(key, in_dim, hid):
    # PyTorch nn.GRU per-direction params, gate order [r, z, n].
    k1, k2, k3, k4 = jax.random.split(key, 4)
    b = 1.0 / (hid ** 0.5)
    return dict(w_ih=_uniform(k1, (3 * hid, in_dim), b),
                w_hh=_uniform(k2, (3 * hid, hid), b),
                b_ih=_uniform(k3, (3 * hid,), b),
                b_hh=_uniform(k4, (3 * hid,), b))


def build_weights(key, *, window_size, input_dim, output_dim, num_channels,
                  kernel_size, hidden_layer_sizes, recon_n_layers):
    """Random PyTorch-style init, pre-packed into fused-kernel layouts."""
    keys = iter(jax.random.split(key, 64))
    W = window_size
    args = []
    # ConvLayer: Conv1d(D -> D, K), same padding, ReLU; K per-tap (Cin, Cout) matrices.
    bc = 1.0 / ((input_dim * kernel_size) ** 0.5)
    conv_w = _uniform(next(keys), (input_dim, input_dim, kernel_size), bc)  # (Cout,Cin,K)
    args.append(jnp.transpose(conv_w, (2, 1, 0)))                           # (K, Cin, Cout)
    args.append(_uniform(next(keys), (1, input_dim), bc))
    # Stacked bidirectional GRUs.
    in_dim = input_dim
    for h in hidden_layer_sizes:
        f = _gru_dir_params(next(keys), in_dim, h)
        r = _gru_dir_params(next(keys), in_dim, h)
        args.append(f["w_ih"].T)                                            # (In, 3H) fwd
        args.append(f["b_ih"].reshape(1, 3 * h))
        args.append(r["w_ih"].T)                                            # (In, 3H) bwd
        args.append(r["b_ih"].reshape(1, 3 * h))
        args.append(jnp.concatenate([f["w_hh"].T, r["w_hh"].T], axis=1))    # (H, 6H)
        args.append(f["b_hh"].reshape(1, 3 * h))
        args.append(r["b_hh"].reshape(1, 3 * h))
        in_dim = 2 * h
    # GlobalAttention(attention_dim*2), attention_dim == hidden_layer_sizes[-1]:
    #   attn: Linear(2E -> E), v: Linear(E -> 1, bias=False), E = 2*H_last.
    H = hidden_layer_sizes[-1]
    E = 2 * H
    ba = 1.0 / ((2 * E) ** 0.5)
    attn_wT = _uniform(next(keys), (E, 2 * E), ba).T                        # (2E, E)
    args.append(attn_wT[:H] + attn_wT[H:2 * H])   # fold duplicated hidden query [h, h]
    args.append(attn_wT[2 * H:])                  # encoder-outputs part (E, E)
    args.append(_uniform(next(keys), (1, E), ba))
    args.append(_uniform(next(keys), (1, E), 1.0 / (E ** 0.5)))             # v (1, E)
    # predict head: Linear(num_channels[-1]*2 -> output_dim)
    C2 = num_channels[-1] * 2
    bf = 1.0 / (C2 ** 0.5)
    args.append(_uniform(next(keys), (output_dim, C2), bf).T)               # (E, O)
    args.append(_uniform(next(keys), (1, output_dim), bf))
    # ReconstructionModel: GRU(in=C2, hid=C2, recon_n_layers) + Linear(C2 -> output_dim).
    # h_end.repeat_interleave(W, dim=1).view(B, W, -1) folded into layer-0 W_ih:
    #   rec_M_flat[:, t*3H:(t+1)*3H] = R_t @ W_ih^T  with  rep_t = ctx @ R_t.
    Hrec = C2
    G = 3 * Hrec
    rec0 = _gru_dir_params(next(keys), C2, Hrec)
    tt = jnp.arange(W)[:, None]
    ff = jnp.arange(C2)[None, :]
    idx = (tt * C2 + ff) // W                                               # (W, C2)
    R = (idx[:, None, :] == jnp.arange(C2)[None, :, None]).astype(F32)      # (W, C2, C2)
    rec_M = jnp.einsum("tif,fg->tig", R, rec0["w_ih"].T)                    # (W, C2, G)
    args.append(jnp.transpose(rec_M, (1, 0, 2)).reshape(C2, W * G))         # (C2, W*G)
    args.append(jnp.tile(rec0["b_ih"].reshape(1, G), (1, W)))               # (1, W*G)
    args.append(rec0["w_hh"].T)
    args.append(rec0["b_hh"].reshape(1, G))
    for _ in range(recon_n_layers - 1):
        g = _gru_dir_params(next(keys), Hrec, Hrec)
        args.append(g["w_ih"].T)
        args.append(g["b_ih"].reshape(1, G))
        args.append(g["w_hh"].T)
        args.append(g["b_hh"].reshape(1, G))
    br = 1.0 / (Hrec ** 0.5)
    args.append(_uniform(next(keys), (output_dim, Hrec), br).T)             # (Hrec, O)
    args.append(_uniform(next(keys), (1, output_dim), br))
    args.append(jnp.zeros((1, 1), F32))           # resweight = nn.Parameter(torch.Tensor([0]))
    return args


# ------------------------------ forward wrapper ------------------------------

def tcn_senet_bigru_forward(weights, x, *, window_size, kernel_size,
                            hidden_layer_sizes, num_channels, output_dim,
                            recon_n_layers):
    B, W, D = x.shape
    assert W == window_size
    assert kernel_size % 2 == 1          # same-padded ConstantPad1d + Conv1d (odd kernel)
    assert num_channels[-1] == hidden_layer_sizes[-1]   # reference module shape consistency
    pad = (kernel_size - 1) // 2
    # Single host-side prep: zero pad along time and go time-major for the whole kernel.
    xpad = jnp.transpose(jnp.pad(x, ((0, 0), (pad, pad), (0, 0))), (1, 0, 2))
    Hrec = num_channels[-1] * 2
    kernel = make_fused_kernel(B, W, D, kernel_size, tuple(hidden_layer_sizes),
                               Hrec, recon_n_layers, output_dim)
    args = [xpad] + list(weights)
    in_specs = [VMEM] * (len(args) - 1) + [SMEM]   # resweight (last arg) as an SMEM scalar
    scratch_shapes = []
    for h in hidden_layer_sizes:                   # per-layer fwd/bwd sequence buffers
        scratch_shapes += [pltpu.VMEM((W, B, h), F32), pltpu.VMEM((W, B, h), F32)]
    scratch_shapes.append(pltpu.VMEM((W, B, Hrec), F32))   # recon decoder buffer
    pred, recon_tm = pl.pallas_call(
        kernel,
        out_shape=(jax.ShapeDtypeStruct((B, output_dim), F32),
                   jax.ShapeDtypeStruct((W, B, output_dim), F32)),
        in_specs=in_specs,
        out_specs=(VMEM, VMEM),
        scratch_shapes=scratch_shapes,
    )(*args)
    return pred, jnp.transpose(recon_tm, (1, 0, 2))


# ------------------------------------ main ------------------------------------

if __name__ == "__main__":
    window_size = 8
    batch = 2
    input_dim = 4
    output_dim = 3
    num_channels = [8, 8]
    kernel_size = 3
    hidden_layer_sizes = [8, 8]
    attention_dim = hidden_layer_sizes[-1]   # required for the module's shapes to be consistent
    recon_n_layers = 1

    key = jax.random.PRNGKey(0)
    kx, kp = jax.random.split(key)
    weights = build_weights(kp, window_size=window_size, input_dim=input_dim,
                            output_dim=output_dim, num_channels=num_channels,
                            kernel_size=kernel_size,
                            hidden_layer_sizes=hidden_layer_sizes,
                            recon_n_layers=recon_n_layers)
    x = jax.random.normal(kx, (batch, window_size, input_dim), F32)

    fwd = jax.jit(functools.partial(
        tcn_senet_bigru_forward, window_size=window_size, kernel_size=kernel_size,
        hidden_layer_sizes=hidden_layer_sizes, num_channels=num_channels,
        output_dim=output_dim, recon_n_layers=recon_n_layers))

    predict, recon = jax.block_until_ready(fwd(weights, x))

    assert predict.shape == (batch, output_dim), predict.shape
    assert recon.shape == (batch, window_size, output_dim), recon.shape
    assert bool(jnp.all(jnp.isfinite(predict))) and bool(jnp.all(jnp.isfinite(recon)))
    print("KERNEL_OK")
</pallas_src>

<mosaic_0001>
module attributes {stable_mosaic.version = 11 : i64} {
  func.func @kernel(%arg0: memref<10x2x4xf32, #tpu.memory_space<vmem>>, %arg1: memref<3x4x4xf32, #tpu.memory_space<vmem>>, %arg2: memref<1x4xf32, #tpu.memory_space<vmem>>, %arg3: memref<4x24xf32, #tpu.memory_space<vmem>>, %arg4: memref<1x24xf32, #tpu.memory_space<vmem>>, %arg5: memref<4x24xf32, #tpu.memory_space<vmem>>, %arg6: memref<1x24xf32, #tpu.memory_space<vmem>>, %arg7: memref<8x48xf32, #tpu.memory_space<vmem>>, %arg8: memref<1x24xf32, #tpu.memory_space<vmem>>, %arg9: memref<1x24xf32, #tpu.memory_space<vmem>>, %arg10: memref<16x24xf32, #tpu.memory_space<vmem>>, %arg11: memref<1x24xf32, #tpu.memory_space<vmem>>, %arg12: memref<16x24xf32, #tpu.memory_space<vmem>>, %arg13: memref<1x24xf32, #tpu.memory_space<vmem>>, %arg14: memref<8x48xf32, #tpu.memory_space<vmem>>, %arg15: memref<1x24xf32, #tpu.memory_space<vmem>>, %arg16: memref<1x24xf32, #tpu.memory_space<vmem>>, %arg17: memref<8x16xf32, #tpu.memory_space<vmem>>, %arg18: memref<16x16xf32, #tpu.memory_space<vmem>>, %arg19: memref<1x16xf32, #tpu.memory_space<vmem>>, %arg20: memref<1x16xf32, #tpu.memory_space<vmem>>, %arg21: memref<16x3xf32, #tpu.memory_space<vmem>>, %arg22: memref<1x3xf32, #tpu.memory_space<vmem>>, %arg23: memref<16x384xf32, #tpu.memory_space<vmem>>, %arg24: memref<1x384xf32, #tpu.memory_space<vmem>>, %arg25: memref<16x48xf32, #tpu.memory_space<vmem>>, %arg26: memref<1x48xf32, #tpu.memory_space<vmem>>, %arg27: memref<16x3xf32, #tpu.memory_space<vmem>>, %arg28: memref<1x3xf32, #tpu.memory_space<vmem>>, %arg29: memref<1x1xf32, #tpu.memory_space<smem>>, %arg30: memref<2x3xf32, #tpu.memory_space<vmem>>, %arg31: memref<8x2x3xf32, #tpu.memory_space<vmem>>, %arg32: memref<8x2x8xf32, #tpu.memory_space<vmem>>, %arg33: memref<8x2x8xf32, #tpu.memory_space<vmem>>, %arg34: memref<8x2x8xf32, #tpu.memory_space<vmem>>, %arg35: memref<8x2x8xf32, #tpu.memory_space<vmem>>, %arg36: memref<8x2x16xf32, #tpu.memory_space<vmem>>) attributes {dimension_semantics = [], scalar_prefetch = 0 : i64, scratch_operands = 5 : i64, tpu.core_type = #tpu.core_type<tc>} {
    %c0 = arith.constant 0 : index
    %c0_0 = arith.constant 0 : index
    %c0_1 = arith.constant 0 : index
    %0 = vector.load %arg0[%c0, %c0_0, %c0_1] : memref<10x2x4xf32, #tpu.memory_space<vmem>>, vector<10x2x4xf32>
    %c0_2 = arith.constant 0 : index
    %c0_3 = arith.constant 0 : index
    %c0_4 = arith.constant 0 : index
    %1 = vector.load %arg1[%c0_2, %c0_3, %c0_4] : memref<3x4x4xf32, #tpu.memory_space<vmem>>, vector<3x4x4xf32>
    %c0_5 = arith.constant 0 : index
    %c0_6 = arith.constant 0 : index
    %2 = vector.load %arg2[%c0_5, %c0_6] : memref<1x4xf32, #tpu.memory_space<vmem>>, vector<1x4xf32>
    %c0_7 = arith.constant 0 : index
    %c0_8 = arith.constant 0 : index
    %3 = vector.load %arg3[%c0_7, %c0_8] : memref<4x24xf32, #tpu.memory_space<vmem>>, vector<4x24xf32>
    %c0_9 = arith.constant 0 : index
    %c0_10 = arith.constant 0 : index
    %4 = vector.load %arg4[%c0_9, %c0_10] : memref<1x24xf32, #tpu.memory_space<vmem>>, vector<1x24xf32>
    %c0_11 = arith.constant 0 : index
    %c0_12 = arith.constant 0 : index
    %5 = vector.load %arg5[%c0_11, %c0_12] : memref<4x24xf32, #tpu.memory_space<vmem>>, vector<4x24xf32>
    %c0_13 = arith.constant 0 : index
    %c0_14 = arith.constant 0 : index
    %6 = vector.load %arg6[%c0_13, %c0_14] : memref<1x24xf32, #tpu.memory_space<vmem>>, vector<1x24xf32>
    %c0_15 = arith.constant 0 : index
    %c0_16 = arith.constant 0 : index
    %7 = vector.load %arg7[%c0_15, %c0_16] : memref<8x48xf32, #tpu.memory_space<vmem>>, vector<8x48xf32>
    %c0_17 = arith.constant 0 : index
    %c0_18 = arith.constant 0 : index
    %8 = vector.load %arg8[%c0_17, %c0_18] : memref<1x24xf32, #tpu.memory_space<vmem>>, vector<1x24xf32>
    %c0_19 = arith.constant 0 : index
    %c0_20 = arith.constant 0 : index
    %9 = vector.load %arg9[%c0_19, %c0_20] : memref<1x24xf32, #tpu.memory_space<vmem>>, vector<1x24xf32>
    %c0_21 = arith.constant 0 : index
    %c0_22 = arith.constant 0 : index
    %10 = vector.load %arg10[%c0_21, %c0_22] : memref<16x24xf32, #tpu.memory_space<vmem>>, vector<16x24xf32>
    %c0_23 = arith.constant 0 : index
    %c0_24 = arith.constant 0 : index
    %11 = vector.load %arg11[%c0_23, %c0_24] : memref<1x24xf32, #tpu.memory_space<vmem>>, vector<1x24xf32>
    %c0_25 = arith.constant 0 : index
    %c0_26 = arith.constant 0 : index
    %12 = vector.load %arg12[%c0_25, %c0_26] : memref<16x24xf32, #tpu.memory_space<vmem>>, vector<16x24xf32>
    %c0_27 = arith.constant 0 : index
    %c0_28 = arith.constant 0 : index
    %13 = vector.load %arg13[%c0_27, %c0_28] : memref<1x24xf32, #tpu.memory_space<vmem>>, vector<1x24xf32>
    %c0_29 = arith.constant 0 : index
    %c0_30 = arith.constant 0 : index
    %14 = vector.load %arg14[%c0_29, %c0_30] : memref<8x48xf32, #tpu.memory_space<vmem>>, vector<8x48xf32>
    %c0_31 = arith.constant 0 : index
    %c0_32 = arith.constant 0 : index
    %15 = vector.load %arg15[%c0_31, %c0_32] : memref<1x24xf32, #tpu.memory_space<vmem>>, vector<1x24xf32>
    %c0_33 = arith.constant 0 : index
    %c0_34 = arith.constant 0 : index
    %16 = vector.load %arg16[%c0_33, %c0_34] : memref<1x24xf32, #tpu.memory_space<vmem>>, vector<1x24xf32>
    %c0_35 = arith.constant 0 : index
    %c0_36 = arith.constant 0 : index
    %17 = vector.load %arg17[%c0_35, %c0_36] : memref<8x16xf32, #tpu.memory_space<vmem>>, vector<8x16xf32>
    %c0_37 = arith.constant 0 : index
    %c0_38 = arith.constant 0 : index
    %18 = vector.load %arg18[%c0_37, %c0_38] : memref<16x16xf32, #tpu.memory_space<vmem>>, vector<16x16xf32>
    %c0_39 = arith.constant 0 : index
    %c0_40 = arith.constant 0 : index
    %19 = vector.load %arg19[%c0_39, %c0_40] : memref<1x16xf32, #tpu.memory_space<vmem>>, vector<1x16xf32>
    %c0_41 = arith.constant 0 : index
    %c0_42 = arith.constant 0 : index
    %20 = vector.load %arg20[%c0_41, %c0_42] : memref<1x16xf32, #tpu.memory_space<vmem>>, vector<1x16xf32>
    %c0_43 = arith.constant 0 : index
    %c0_44 = arith.constant 0 : index
    %21 = vector.load %arg21[%c0_43, %c0_44] : memref<16x3xf32, #tpu.memory_space<vmem>>, vector<16x3xf32>
    %c0_45 = arith.constant 0 : index
    %c0_46 = arith.constant 0 : index
    %22 = vector.load %arg22[%c0_45, %c0_46] : memref<1x3xf32, #tpu.memory_space<vmem>>, vector<1x3xf32>
    %c0_47 = arith.constant 0 : index
    %c0_48 = arith.constant 0 : index
    %23 = vector.load %arg23[%c0_47, %c0_48] : memref<16x384xf32, #tpu.memory_space<vmem>>, vector<16x384xf32>
    %c0_49 = arith.constant 0 : index
    %c0_50 = arith.constant 0 : index
    %24 = vector.load %arg24[%c0_49, %c0_50] : memref<1x384xf32, #tpu.memory_space<vmem>>, vector<1x384xf32>
    %c0_51 = arith.constant 0 : index
    %c0_52 = arith.constant 0 : index
    %25 = vector.load %arg25[%c0_51, %c0_52] : memref<16x48xf32, #tpu.memory_space<vmem>>, vector<16x48xf32>
    %c0_53 = arith.constant 0 : index
    %c0_54 = arith.constant 0 : index
    %26 = vector.load %arg26[%c0_53, %c0_54] : memref<1x48xf32, #tpu.memory_space<vmem>>, vector<1x48xf32>
    %c0_55 = arith.constant 0 : index
    %c0_56 = arith.constant 0 : index
    %27 = vector.load %arg27[%c0_55, %c0_56] : memref<16x3xf32, #tpu.memory_space<vmem>>, vector<16x3xf32>
    %c0_57 = arith.constant 0 : index
    %c0_58 = arith.constant 0 : index
    %28 = vector.load %arg28[%c0_57, %c0_58] : memref<1x3xf32, #tpu.memory_space<vmem>>, vector<1x3xf32>
    %29 = vector.extract_strided_slice %0 {offsets = [0, 0, 0], sizes = [8, 2, 4], strides = [1, 1, 1]} : vector<10x2x4xf32> to vector<8x2x4xf32>
    %30 = vector.shape_cast %29 : vector<8x2x4xf32> to vector<16x4xf32>
    %31 = vector.extract_strided_slice %1 {offsets = [0, 0, 0], sizes = [1, 4, 4], strides = [1, 1, 1]} : vector<3x4x4xf32> to vector<1x4x4xf32>
    %32 = vector.shape_cast %31 : vector<1x4x4xf32> to vector<4x4xf32>
    %cst = arith.constant dense<0.000000e+00> : vector<16x4xf32>
    %33 = tpu.matmul %30, %32, %cst {dimension_numbers = #tpu.dot_dimension_numbers<[1], [0], [0], [1], [0, 0, 1, 1], [], []>} : vector<16x4xf32>, vector<4x4xf32>, vector<16x4xf32> -> vector<16x4xf32>
    %34 = vector.extract_strided_slice %0 {offsets = [1, 0, 0], sizes = [8, 2, 4], strides = [1, 1, 1]} : vector<10x2x4xf32> to vector<8x2x4xf32>
    %35 = vector.shape_cast %34 : vector<8x2x4xf32> to vector<16x4xf32>
    %36 = vector.extract_strided_slice %1 {offsets = [1, 0, 0], sizes = [1, 4, 4], strides = [1, 1, 1]} : vector<3x4x4xf32> to vector<1x4x4xf32>
    %37 = vector.shape_cast %36 : vector<1x4x4xf32> to vector<4x4xf32>
    %cst_59 = arith.constant dense<0.000000e+00> : vector<16x4xf32>
    %38 = tpu.matmul %35, %37, %cst_59 {dimension_numbers = #tpu.dot_dimension_numbers<[1], [0], [0], [1], [0, 0, 1, 1], [], []>} : vector<16x4xf32>, vector<4x4xf32>, vector<16x4xf32> -> vector<16x4xf32>
    %39 = arith.addf %33, %38 : vector<16x4xf32>
    %40 = vector.extract_strided_slice %0 {offsets = [2, 0, 0], sizes = [8, 2, 4], strides = [1, 1, 1]} : vector<10x2x4xf32> to vector<8x2x4xf32>
    %41 = vector.shape_cast %40 : vector<8x2x4xf32> to vector<16x4xf32>
    %42 = vector.extract_strided_slice %1 {offsets = [2, 0, 0], sizes = [1, 4, 4], strides = [1, 1, 1]} : vector<3x4x4xf32> to vector<1x4x4xf32>
    %43 = vector.shape_cast %42 : vector<1x4x4xf32> to vector<4x4xf32>
    %cst_60 = arith.constant dense<0.000000e+00> : vector<16x4xf32>
    %44 = tpu.matmul %41, %43, %cst_60 {dimension_numbers = #tpu.dot_dimension_numbers<[1], [0], [0], [1], [0, 0, 1, 1], [], []>} : vector<16x4xf32>, vector<4x4xf32>, vector<16x4xf32> -> vector<16x4xf32>
    %45 = arith.addf %39, %44 : vector<16x4xf32>
    %46 = vector.broadcast %2 : vector<1x4xf32> to vector<16x4xf32>
    %47 = arith.addf %45, %46 : vector<16x4xf32>
    %cst_61 = arith.constant 0.000000e+00 : f32
    %48 = vector.broadcast %cst_61 : f32 to vector<16x4xf32>
    %49 = arith.maximumf %47, %48 : vector<16x4xf32>
    %cst_62 = arith.constant dense<0.000000e+00> : vector<16x24xf32>
    %50 = tpu.matmul %49, %3, %cst_62 {dimension_numbers = #tpu.dot_dimension_numbers<[1], [0], [0], [1], [0, 0, 1, 1], [], []>} : vector<16x4xf32>, vector<4x24xf32>, vector<16x24xf32> -> vector<16x24xf32>
    %51 = vector.broadcast %4 : vector<1x24xf32> to vector<16x24xf32>
    %52 = arith.addf %50, %51 : vector<16x24xf32>
    %cst_63 = arith.constant dense<0.000000e+00> : vector<16x24xf32>
    %53 = tpu.matmul %49, %5, %cst_63 {dimension_numbers = #tpu.dot_dimension_numbers<[1], [0], [0], [1], [0, 0, 1, 1], [], []>} : vector<16x4xf32>, vector<4x24xf32>, vector<16x24xf32> -> vector<16x24xf32>
    %54 = vector.broadcast %6 : vector<1x24xf32> to vector<16x24xf32>
    %55 = arith.addf %53, %54 : vector<16x24xf32>
    %56 = vector.shape_cast %52 : vector<16x24xf32> to vector<8x2x24xf32>
    %57 = vector.shape_cast %55 : vector<16x24xf32> to vector<8x2x24xf32>
    %58 = vector.shape_cast %8 : vector<1x24xf32> to vector<1x24xf32>
    %59 = vector.broadcast %58 : vector<1x24xf32> to vector<2x24xf32>
    %60 = vector.shape_cast %9 : vector<1x24xf32> to vector<1x24xf32>
    %61 = vector.broadcast %60 : vector<1x24xf32> to vector<2x24xf32>
    %62 = tpu.concatenate %59, %61 in 0 : vector<2x24xf32>, vector<2x24xf32> -> vector<4x24xf32>
    %63 = tpu.iota {dimensions = array<i32: 0>} : vector<4x24xi32>
    %c2_i32 = arith.constant 2 : i32
    %64 = vector.broadcast %c2_i32 : i32 to vector<4x24xi32>
    %65 = arith.cmpi slt, %63, %64 : vector<4x24xi32>
    %cst_64 = arith.constant 0.000000e+00 : f32
    %66 = vector.broadcast %cst_64 : f32 to vector<4x8xf32>
    %cst_65 = arith.constant dense<0.000000e+00> : vector<4x48xf32>
    %67 = tpu.matmul %66, %7, %cst_65 {dimension_numbers = #tpu.dot_dimension_numbers<[1], [0], [0], [1], [0, 0, 1, 1], [], []>} : vector<4x8xf32>, vector<8x48xf32>, vector<4x48xf32> -> vector<4x48xf32>
    %68 = vector.extract_strided_slice %67 {offsets = [0, 0], sizes = [4, 24], strides = [1, 1]} : vector<4x48xf32> to vector<4x24xf32>
    %69 = vector.extract_strided_slice %67 {offsets = [0, 24], sizes = [4, 24], strides = [1, 1]} : vector<4x48xf32> to vector<4x24xf32>
    %70 = arith.select %65, %68, %69 : vector<4x24xi1>, vector<4x24xf32>
    %71 = arith.addf %70, %62 : vector<4x24xf32>
    %72 = vector.extract_strided_slice %56 {offsets = [0, 0, 0], sizes = [1, 2, 24], strides = [1, 1, 1]} : vector<8x2x24xf32> to vector<1x2x24xf32>
    %73 = vector.shape_cast %72 : vector<1x2x24xf32> to vector<2x24xf32>
    %74 = vector.extract_strided_slice %57 {offsets = [7, 0, 0], sizes = [1, 2, 24], strides = [1, 1, 1]} : vector<8x2x24xf32> to vector<1x2x24xf32>
    %75 = vector.shape_cast %74 : vector<1x2x24xf32> to vector<2x24xf32>
    %76 = tpu.concatenate %73, %75 in 0 : vector<2x24xf32>, vector<2x24xf32> -> vector<4x24xf32>
    %77 = vector.extract_strided_slice %76 {offsets = [0, 0], sizes = [4, 16], strides = [1, 1]} : vector<4x24xf32> to vector<4x16xf32>
    %78 = vector.extract_strided_slice %71 {offsets = [0, 0], sizes = [4, 16], strides = [1, 1]} : vector<4x24xf32> to vector<4x16xf32>
    %79 = arith.addf %77, %78 : vector<4x16xf32>
    %80 = arith.negf %79 : vector<4x16xf32>
    %81 = math.exp %80 : vector<4x16xf32>
    %cst_66 = arith.constant 1.000000e+00 : f32
    %82 = vector.broadcast %cst_66 : f32 to vector<4x16xf32>
    %83 = arith.addf %82, %81 : vector<4x16xf32>
    %84 = arith.divf %82, %83 : vector<4x16xf32>
    %85 = vector.extract_strided_slice %84 {offsets = [0, 0], sizes = [4, 8], strides = [1, 1]} : vector<4x16xf32> to vector<4x8xf32>
    %86 = vector.extract_strided_slice %84 {offsets = [0, 8], sizes = [4, 8], strides = [1, 1]} : vector<4x16xf32> to vector<4x8xf32>
    %87 = vector.extract_strided_slice %76 {offsets = [0, 16], sizes = [4, 8], strides = [1, 1]} : vector<4x24xf32> to vector<4x8xf32>
    %88 = vector.extract_strided_slice %71 {offsets = [0, 16], sizes = [4, 8], strides = [1, 1]} : vector<4x24xf32> to vector<4x8xf32>
    %89 = arith.mulf %85, %88 : vector<4x8xf32>
    %90 = arith.addf %87, %89 : vector<4x8xf32>
    %91 = math.tanh %90 : vector<4x8xf32>
    %cst_67 = arith.constant 1.000000e+00 : f32
    %92 = vector.broadcast %cst_67 : f32 to vector<4x8xf32>
    %93 = arith.subf %92, %86 : vector<4x8xf32>
    %94 = arith.mulf %93, %91 : vector<4x8xf32>
    %95 = arith.mulf %86, %66 : vector<4x8xf32>
    %96 = arith.addf %94, %95 : vector<4x8xf32>
    %97 = vector.extract_strided_slice %96 {offsets = [0, 0], sizes = [2, 8], strides = [1, 1]} : vector<4x8xf32> to vector<2x8xf32>
    %c0_68 = arith.constant 0 : index
    %c0_69 = arith.constant 0 : index
    %c0_70 = arith.constant 0 : index
    %98 = vector.load %arg32[%c0_68, %c0_69, %c0_70] : memref<8x2x8xf32, #tpu.memory_space<vmem>>, vector<1x2x8xf32>
    %99 = vector.shape_cast %98 : vector<1x2x8xf32> to vector<2x8xf32>
    %100 = vector.shape_cast %97 : vector<2x8xf32> to vector<1x2x8xf32>
    tpu.vector_store %arg32[%c0_68, %c0_69, %c0_70], %100 {strides = array<i32>} : memref<8x2x8xf32, #tpu.memory_space<vmem>>, vector<1x2x8xf32>,
    %101 = vector.extract_strided_slice %96 {offsets = [2, 0], sizes = [2, 8], strides = [1, 1]} : vector<4x8xf32> to vector<2x8xf32>
    %c7 = arith.constant 7 : index
    %c0_71 = arith.constant 0 : index
    %c0_72 = arith.constant 0 : index
    %102 = vector.load %arg33[%c7, %c0_71, %c0_72] : memref<8x2x8xf32, #tpu.memory_space<vmem>>, vector<1x2x8xf32>
    %103 = vector.shape_cast %102 : vector<1x2x8xf32> to vector<2x8xf32>
    %104 = vector.shape_cast %101 : vector<2x8xf32> to vector<1x2x8xf32>
    tpu.vector_store %arg33[%c7, %c0_71, %c0_72], %104 {strides = array<i32>} : memref<8x2x8xf32, #tpu.memory_space<vmem>>, vector<1x2x8xf32>,
    %cst_73 = arith.constant dense<0.000000e+00> : vector<4x48xf32>
    %105 = tpu.matmul %96, %7, %cst_73 {dimension_numbers = #tpu.dot_dimension_numbers<[1], [0], [0], [1], [0, 0, 1, 1], [], []>} : vector<4x8xf32>, vector<8x48xf32>, vector<4x48xf32> -> vector<4x48xf32>
    %106 = vector.extract_strided_slice %105 {offsets = [0, 0], sizes = [4, 24], strides = [1, 1]} : vector<4x48xf32> to vector<4x24xf32>
    %107 = vector.extract_strided_slice %105 {offsets = [0, 24], sizes = [4, 24], strides = [1, 1]} : vector<4x48xf32> to vector<4x24xf32>
    %108 = arith.select %65, %106, %107 : vector<4x24xi1>, vector<4x24xf32>
    %109 = arith.addf %108, %62 : vector<4x24xf32>
    %110 = vector.extract_strided_slice %56 {offsets = [1, 0, 0], sizes = [1, 2, 24], strides = [1, 1, 1]} : vector<8x2x24xf32> to vector<1x2x24xf32>
    %111 = vector.shape_cast %110 : vector<1x2x24xf32> to vector<2x24xf32>
    %112 = vector.extract_strided_slice %57 {offsets = [6, 0, 0], sizes = [1, 2, 24], strides = [1, 1, 1]} : vector<8x2x24xf32> to vector<1x2x24xf32>
    %113 = vector.shape_cast %112 : vector<1x2x24xf32> to vector<2x24xf32>
    %114 = tpu.concatenate %111, %113 in 0 : vector<2x24xf32>, vector<2x24xf32> -> vector<4x24xf32>
    %115 = vector.extract_strided_slice %114 {offsets = [0, 0], sizes = [4, 16], strides = [1, 1]} : vector<4x24xf32> to vector<4x16xf32>
    %116 = vector.extract_strided_slice %109 {offsets = [0, 0], sizes = [4, 16], strides = [1, 1]} : vector<4x24xf32> to vector<4x16xf32>
    %117 = arith.addf %115, %116 : vector<4x16xf32>
    %118 = arith.negf %117 : vector<4x16xf32>
    %119 = math.exp %118 : vector<4x16xf32>
    %cst_74 = arith.constant 1.000000e+00 : f32
    %120 = vector.broadcast %cst_74 : f32 to vector<4x16xf32>
    %121 = arith.addf %120, %119 : vector<4x16xf32>
    %122 = arith.divf %120, %121 : vector<4x16xf32>
    %123 = vector.extract_strided_slice %122 {offsets = [0, 0], sizes = [4, 8], strides = [1, 1]} : vector<4x16xf32> to vector<4x8xf32>
    %124 = vector.extract_strided_slice %122 {offsets = [0, 8], sizes = [4, 8], strides = [1, 1]} : vector<4x16xf32> to vector<4x8xf32>
    %125 = vector.extract_strided_slice %114 {offsets = [0, 16], sizes = [4, 8], strides = [1, 1]} : vector<4x24xf32> to vector<4x8xf32>
    %126 = vector.extract_strided_slice %109 {offsets = [0, 16], sizes = [4, 8], strides = [1, 1]} : vector<4x24xf32> to vector<4x8xf32>
    %127 = arith.mulf %123, %126 : vector<4x8xf32>
    %128 = arith.addf %125, %127 : vector<4x8xf32>
    %129 = math.tanh %128 : vector<4x8xf32>
    %cst_75 = arith.constant 1.000000e+00 : f32
    %130 = vector.broadcast %cst_75 : f32 to vector<4x8xf32>
    %131 = arith.subf %130, %124 : vector<4x8xf32>
    %132 = arith.mulf %131, %129 : vector<4x8xf32>
    %133 = arith.mulf %124, %96 : vector<4x8xf32>
    %134 = arith.addf %132, %133 : vector<4x8xf32>
    %135 = vector.extract_strided_slice %134 {offsets = [0, 0], sizes = [2, 8], strides = [1, 1]} : vector<4x8xf32> to vector<2x8xf32>
    %c1 = arith.constant 1 : index
    %c0_76 = arith.constant 0 : index
    %c0_77 = arith.constant 0 : index
    %136 = vector.load %arg32[%c1, %c0_76, %c0_77] : memref<8x2x8xf32, #tpu.memory_space<vmem>>, vector<1x2x8xf32>
    %137 = vector.shape_cast %136 : vector<1x2x8xf32> to vector<2x8xf32>
    %138 = vector.shape_cast %135 : vector<2x8xf32> to vector<1x2x8xf32>
    tpu.vector_store %arg32[%c1, %c0_76, %c0_77], %138 {strides = array<i32>} : memref<8x2x8xf32, #tpu.memory_space<vmem>>, vector<1x2x8xf32>,
    %139 = vector.extract_strided_slice %134 {offsets = [2, 0], sizes = [2, 8], strides = [1, 1]} : vector<4x8xf32> to vector<2x8xf32>
    %c6 = arith.constant 6 : index
    %c0_78 = arith.constant 0 : index
    %c0_79 = arith.constant 0 : index
    %140 = vector.load %arg33[%c6, %c0_78, %c0_79] : memref<8x2x8xf32, #tpu.memory_space<vmem>>, vector<1x2x8xf32>
    %141 = vector.shape_cast %140 : vector<1x2x8xf32> to vector<2x8xf32>
    %142 = vector.shape_cast %139 : vector<2x8xf32> to vector<1x2x8xf32>
    tpu.vector_store %arg33[%c6, %c0_78, %c0_79], %142 {strides = array<i32>} : memref<8x2x8xf32, #tpu.memory_space<vmem>>, vector<1x2x8xf32>,
    %cst_80 = arith.constant dense<0.000000e+00> : vector<4x48xf32>
    %143 = tpu.matmul %134, %7, %cst_80 {dimension_numbers = #tpu.dot_dimension_numbers<[1], [0], [0], [1], [0, 0, 1, 1], [], []>} : vector<4x8xf32>, vector<8x48xf32>, vector<4x48xf32> -> vector<4x48xf32>
    %144 = vector.extract_strided_slice %143 {offsets = [0, 0], sizes = [4, 24], strides = [1, 1]} : vector<4x48xf32> to vector<4x24xf32>
    %145 = vector.extract_strided_slice %143 {offsets = [0, 24], sizes = [4, 24], strides = [1, 1]} : vector<4x48xf32> to vector<4x24xf32>
    %146 = arith.select %65, %144, %145 : vector<4x24xi1>, vector<4x24xf32>
    %147 = arith.addf %146, %62 : vector<4x24xf32>
    %148 = vector.extract_strided_slice %56 {offsets = [2, 0, 0], sizes = [1, 2, 24], strides = [1, 1, 1]} : vector<8x2x24xf32> to vector<1x2x24xf32>
    %149 = vector.shape_cast %148 : vector<1x2x24xf32> to vector<2x24xf32>
    %150 = vector.extract_strided_slice %57 {offsets = [5, 0, 0], sizes = [1, 2, 24], strides = [1, 1, 1]} : vector<8x2x24xf32> to vector<1x2x24xf32>
    %151 = vector.shape_cast %150 : vector<1x2x24xf32> to vector<2x24xf32>
    %152 = tpu.concatenate %149, %151 in 0 : vector<2x24xf32>, vector<2x24xf32> -> vector<4x24xf32>
    %153 = vector.extract_strided_slice %152 {offsets = [0, 0], sizes = [4, 16], strides = [1, 1]} : vector<4x24xf32> to vector<4x16xf32>
    %154 = vector.extract_strided_slice %147 {offsets = [0, 0], sizes = [4, 16], strides = [1, 1]} : vector<4x24xf32> to vector<4x16xf32>
    %155 = arith.addf %153, %154 : vector<4x16xf32>
    %156 = arith.negf %155 : vector<4x16xf32>
    %157 = math.exp %156 : vector<4x16xf32>
    %cst_81 = arith.constant 1.000000e+00 : f32
    %158 = vector.broadcast %cst_81 : f32 to vector<4x16xf32>
    %159 = arith.addf %158, %157 : vector<4x16xf32>
    %160 = arith.divf %158, %159 : vector<4x16xf32>
    %161 = vector.extract_strided_slice %160 {offsets = [0, 0], sizes = [4, 8], strides = [1, 1]} : vector<4x16xf32> to vector<4x8xf32>
    %162 = vector.extract_strided_slice %160 {offsets = [0, 8], sizes = [4, 8], strides = [1, 1]} : vector<4x16xf32> to vector<4x8xf32>
    %163 = vector.extract_strided_slice %152 {offsets = [0, 16], sizes = [4, 8], strides = [1, 1]} : vector<4x24xf32> to vector<4x8xf32>
    %164 = vector.extract_strided_slice %147 {offsets = [0, 16], sizes = [4, 8], strides = [1, 1]} : vector<4x24xf32> to vector<4x8xf32>
    %165 = arith.mulf %161, %164 : vector<4x8xf32>
    %166 = arith.addf %163, %165 : vector<4x8xf32>
    %167 = math.tanh %166 : vector<4x8xf32>
    %cst_82 = arith.constant 1.000000e+00 : f32
    %168 = vector.broadcast %cst_82 : f32 to vector<4x8xf32>
    %169 = arith.subf %168, %162 : vector<4x8xf32>
    %170 = arith.mulf %169, %167 : vector<4x8xf32>
    %171 = arith.mulf %162, %134 : vector<4x8xf32>
    %172 = arith.addf %170, %171 : vector<4x8xf32>
    %173 = vector.extract_strided_slice %172 {offsets = [0, 0], sizes = [2, 8], strides = [1, 1]} : vector<4x8xf32> to vector<2x8xf32>
    %c2 = arith.constant 2 : index
    %c0_83 = arith.constant 0 : index
    %c0_84 = arith.constant 0 : index
    %174 = vector.load %arg32[%c2, %c0_83, %c0_84] : memref<8x2x8xf32, #tpu.memory_space<vmem>>, vector<1x2x8xf32>
    %175 = vector.shape_cast %174 : vector<1x2x8xf32> to vector<2x8xf32>
    %176 = vector.shape_cast %173 : vector<2x8xf32> to vector<1x2x8xf32>
    tpu.vector_store %arg32[%c2, %c0_83, %c0_84], %176 {strides = array<i32>} : memref<8x2x8xf32, #tpu.memory_space<vmem>>, vector<1x2x8xf32>,
    %177 = vector.extract_strided_slice %172 {offsets = [2, 0], sizes = [2, 8], strides = [1, 1]} : vector<4x8xf32> to vector<2x8xf32>
    %c5 = arith.constant 5 : index
    %c0_85 = arith.constant 0 : index
    %c0_86 = arith.constant 0 : index
    %178 = vector.load %arg33[%c5, %c0_85, %c0_86] : memref<8x2x8xf32, #tpu.memory_space<vmem>>, vector<1x2x8xf32>
    %179 = vector.shape_cast %178 : vector<1x2x8xf32> to vector<2x8xf32>
    %180 = vector.shape_cast %177 : vector<2x8xf32> to vector<1x2x8xf32>
    tpu.vector_store %arg33[%c5, %c0_85, %c0_86], %180 {strides = array<i32>} : memref<8x2x8xf32, #tpu.memory_space<vmem>>, vector<1x2x8xf32>,
    %cst_87 = arith.constant dense<0.000000e+00> : vector<4x48xf32>
    %181 = tpu.matmul %172, %7, %cst_87 {dimension_numbers = #tpu.dot_dimension_numbers<[1], [0], [0], [1], [0, 0, 1, 1], [], []>} : vector<4x8xf32>, vector<8x48xf32>, vector<4x48xf32> -> vector<4x48xf32>
    %182 = vector.extract_strided_slice %181 {offsets = [0, 0], sizes = [4, 24], strides = [1, 1]} : vector<4x48xf32> to vector<4x24xf32>
    %183 = vector.extract_strided_slice %181 {offsets = [0, 24], sizes = [4, 24], strides = [1, 1]} : vector<4x48xf32> to vector<4x24xf32>
    %184 = arith.select %65, %182, %183 : vector<4x24xi1>, vector<4x24xf32>
    %185 = arith.addf %184, %62 : vector<4x24xf32>
    %186 = vector.extract_strided_slice %56 {offsets = [3, 0, 0], sizes = [1, 2, 24], strides = [1, 1, 1]} : vector<8x2x24xf32> to vector<1x2x24xf32>
    %187 = vector.shape_cast %186 : vector<1x2x24xf32> to vector<2x24xf32>
    %188 = vector.extract_strided_slice %57 {offsets = [4, 0, 0], sizes = [1, 2, 24], strides = [1, 1, 1]} : vector<8x2x24xf32> to vector<1x2x24xf32>
    %189 = vector.shape_cast %188 : vector<1x2x24xf32> to vector<2x24xf32>
    %190 = tpu.concatenate %187, %189 in 0 : vector<2x24xf32>, vector<2x24xf32> -> vector<4x24xf32>
    %191 = vector.extract_strided_slice %190 {offsets = [0, 0], sizes = [4, 16], strides = [1, 1]} : vector<4x24xf32> to vector<4x16xf32>
    %192 = vector.extract_strided_slice %185 {offsets = [0, 0], sizes = [4, 16], strides = [1, 1]} : vector<4x24xf32> to vector<4x16xf32>
    %193 = arith.addf %191, %192 : vector<4x16xf32>
    %194 = arith.negf %193 : vector<4x16xf32>
    %195 = math.exp %194 : vector<4x16xf32>
    %cst_88 = arith.constant 1.000000e+00 : f32
    %196 = vector.broadcast %cst_88 : f32 to vector<4x16xf32>
    %197 = arith.addf %196, %195 : vector<4x16xf32>
    %198 = arith.divf %196, %197 : vector<4x16xf32>
    %199 = vector.extract_strided_slice %198 {offsets = [0, 0], sizes = [4, 8], strides = [1, 1]} : vector<4x16xf32> to vector<4x8xf32>
    %200 = vector.extract_strided_slice %198 {offsets = [0, 8], sizes = [4, 8], strides = [1, 1]} : vector<4x16xf32> to vector<4x8xf32>
    %201 = vector.extract_strided_slice %190 {offsets = [0, 16], sizes = [4, 8], strides = [1, 1]} : vector<4x24xf32> to vector<4x8xf32>
    %202 = vector.extract_strided_slice %185 {offsets = [0, 16], sizes = [4, 8], strides = [1, 1]} : vector<4x24xf32> to vector<4x8xf32>
    %203 = arith.mulf %199, %202 : vector<4x8xf32>
    %204 = arith.addf %201, %203 : vector<4x8xf32>
    %205 = math.tanh %204 : vector<4x8xf32>
    %cst_89 = arith.constant 1.000000e+00 : f32
    %206 = vector.broadcast %cst_89 : f32 to vector<4x8xf32>
    %207 = arith.subf %206, %200 : vector<4x8xf32>
    %208 = arith.mulf %207, %205 : vector<4x8xf32>
    %209 = arith.mulf %200, %172 : vector<4x8xf32>
    %210 = arith.addf %208, %209 : vector<4x8xf32>
    %211 = vector.extract_strided_slice %210 {offsets = [0, 0], sizes = [2, 8], strides = [1, 1]} : vector<4x8xf32> to vector<2x8xf32>
    %c3 = arith.constant 3 : index
    %c0_90 = arith.constant 0 : index
    %c0_91 = arith.constant 0 : index
    %212 = vector.load %arg32[%c3, %c0_90, %c0_91] : memref<8x2x8xf32, #tpu.memory_space<vmem>>, vector<1x2x8xf32>
    %213 = vector.shape_cast %212 : vector<1x2x8xf32> to vector<2x8xf32>
    %214 = vector.shape_cast %211 : vector<2x8xf32> to vector<1x2x8xf32>
    tpu.vector_store %arg32[%c3, %c0_90, %c0_91], %214 {strides = array<i32>} : memref<8x2x8xf32, #tpu.memory_space<vmem>>, vector<1x2x8xf32>,
    %215 = vector.extract_strided_slice %210 {offsets = [2, 0], sizes = [2, 8], strides = [1, 1]} : vector<4x8xf32> to vector<2x8xf32>
    %c4 = arith.constant 4 : index
    %c0_92 = arith.constant 0 : index
    %c0_93 = arith.constant 0 : index
    %216 = vector.load %arg33[%c4, %c0_92, %c0_93] : memref<8x2x8xf32, #tpu.memory_space<vmem>>, vector<1x2x8xf32>
    %217 = vector.shape_cast %216 : vector<1x2x8xf32> to vector<2x8xf32>
    %218 = vector.shape_cast %215 : vector<2x8xf32> to vector<1x2x8xf32>
    tpu.vector_store %arg33[%c4, %c0_92, %c0_93], %218 {strides = array<i32>} : memref<8x2x8xf32, #tpu.memory_space<vmem>>, vector<1x2x8xf32>,
    %cst_94 = arith.constant dense<0.000000e+00> : vector<4x48xf32>
    %219 = tpu.matmul %210, %7, %cst_94 {dimension_numbers = #tpu.dot_dimension_numbers<[1], [0], [0], [1], [0, 0, 1, 1], [], []>} : vector<4x8xf32>, vector<8x48xf32>, vector<4x48xf32> -> vector<4x48xf32>
    %220 = vector.extract_strided_slice %219 {offsets = [0, 0], sizes = [4, 24], strides = [1, 1]} : vector<4x48xf32> to vector<4x24xf32>
    %221 = vector.extract_strided_slice %219 {offsets = [0, 24], sizes = [4, 24], strides = [1, 1]} : vector<4x48xf32> to vector<4x24xf32>
    %222 = arith.select %65, %220, %221 : vector<4x24xi1>, vector<4x24xf32>
    %223 = arith.addf %222, %62 : vector<4x24xf32>
    %224 = vector.extract_strided_slice %56 {offsets = [4, 0, 0], sizes = [1, 2, 24], strides = [1, 1, 1]} : vector<8x2x24xf32> to vector<1x2x24xf32>
    %225 = vector.shape_cast %224 : vector<1x2x24xf32> to vector<2x24xf32>
    %226 = vector.extract_strided_slice %57 {offsets = [3, 0, 0], sizes = [1, 2, 24], strides = [1, 1, 1]} : vector<8x2x24xf32> to vector<1x2x24xf32>
    %227 = vector.shape_cast %226 : vector<1x2x24xf32> to vector<2x24xf32>
    %228 = tpu.concatenate %225, %227 in 0 : vector<2x24xf32>, vector<2x24xf32> -> vector<4x24xf32>
    %229 = vector.extract_strided_slice %228 {offsets = [0, 0], sizes = [4, 16], strides = [1, 1]} : vector<4x24xf32> to vector<4x16xf32>
    %230 = vector.extract_strided_slice %223 {offsets = [0, 0], sizes = [4, 16], strides = [1, 1]} : vector<4x24xf32> to vector<4x16xf32>
    %231 = arith.addf %229, %230 : vector<4x16xf32>
    %232 = arith.negf %231 : vector<4x16xf32>
    %233 = math.exp %232 : vector<4x16xf32>
    %cst_95 = arith.constant 1.000000e+00 : f32
    %234 = vector.broadcast %cst_95 : f32 to vector<4x16xf32>
    %235 = arith.addf %234, %233 : vector<4x16xf32>
    %236 = arith.divf %234, %235 : vector<4x16xf32>
    %237 = vector.extract_strided_slice %236 {offsets = [0, 0], sizes = [4, 8], strides = [1, 1]} : vector<4x16xf32> to vector<4x8xf32>
    %238 = vector.extract_strided_slice %236 {offsets = [0, 8], sizes = [4, 8], strides = [1, 1]} : vector<4x16xf32> to vector<4x8xf32>
    %239 = vector.extract_strided_slice %228 {offsets = [0, 16], sizes = [4, 8], strides = [1, 1]} : vector<4x24xf32> to vector<4x8xf32>
    %240 = vector.extract_strided_slice %223 {offsets = [0, 16], sizes = [4, 8], strides = [1, 1]} : vector<4x24xf32> to vector<4x8xf32>
    %241 = arith.mulf %237, %240 : vector<4x8xf32>
    %242 = arith.addf %239, %241 : vector<4x8xf32>
    %243 = math.tanh %242 : vector<4x8xf32>
    %cst_96 = arith.constant 1.000000e+00 : f32
    %244 = vector.broadcast %cst_96 : f32 to vector<4x8xf32>
    %245 = arith.subf %244, %238 : vector<4x8xf32>
    %246 = arith.mulf %245, %243 : vector<4x8xf32>
    %247 = arith.mulf %238, %210 : vector<4x8xf32>
    %248 = arith.addf %246, %247 : vector<4x8xf32>
    %249 = vector.extract_strided_slice %248 {offsets = [0, 0], sizes = [2, 8], strides = [1, 1]} : vector<4x8xf32> to vector<2x8xf32>
    %c4_97 = arith.constant 4 : index
    %c0_98 = arith.constant 0 : index
    %c0_99 = arith.constant 0 : index
    %250 = vector.load %arg32[%c4_97, %c0_98, %c0_99] : memref<8x2x8xf32, #tpu.memory_space<vmem>>, vector<1x2x8xf32>
    %251 = vector.shape_cast %250 : vector<1x2x8xf32> to vector<2x8xf32>
    %252 = vector.shape_cast %249 : vector<2x8xf32> to vector<1x2x8xf32>
    tpu.vector_store %arg32[%c4_97, %c0_98, %c0_99], %252 {strides = array<i32>} : memref<8x2x8xf32, #tpu.memory_space<vmem>>, vector<1x2x8xf32>,
    %253 = vector.extract_strided_slice %248 {offsets = [2, 0], sizes = [2, 8], strides = [1, 1]} : vector<4x8xf32> to vector<2x8xf32>
    %c3_100 = arith.constant 3 : index
    %c0_101 = arith.constant 0 : index
    %c0_102 = arith.constant 0 : index
    %254 = vector.load %arg33[%c3_100, %c0_101, %c0_102] : memref<8x2x8xf32, #tpu.memory_space<vmem>>, vector<1x2x8xf32>
    %255 = vector.shape_cast %254 : vector<1x2x8xf32> to vector<2x8xf32>
    %256 = vector.shape_cast %253 : vector<2x8xf32> to vector<1x2x8xf32>
    tpu.vector_store %arg33[%c3_100, %c0_101, %c0_102], %256 {strides = array<i32>} : memref<8x2x8xf32, #tpu.memory_space<vmem>>, vector<1x2x8xf32>,
    %cst_103 = arith.constant dense<0.000000e+00> : vector<4x48xf32>
    %257 = tpu.matmul %248, %7, %cst_103 {dimension_numbers = #tpu.dot_dimension_numbers<[1], [0], [0], [1], [0, 0, 1, 1], [], []>} : vector<4x8xf32>, vector<8x48xf32>, vector<4x48xf32> -> vector<4x48xf32>
    %258 = vector.extract_strided_slice %257 {offsets = [0, 0], sizes = [4, 24], strides = [1, 1]} : vector<4x48xf32> to vector<4x24xf32>
    %259 = vector.extract_strided_slice %257 {offsets = [0, 24], sizes = [4, 24], strides = [1, 1]} : vector<4x48xf32> to vector<4x24xf32>
    %260 = arith.select %65, %258, %259 : vector<4x24xi1>, vector<4x24xf32>
    %261 = arith.addf %260, %62 : vector<4x24xf32>
    %262 = vector.extract_strided_slice %56 {offsets = [5, 0, 0], sizes = [1, 2, 24], strides = [1, 1, 1]} : vector<8x2x24xf32> to vector<1x2x24xf32>
    %263 = vector.shape_cast %262 : vector<1x2x24xf32> to vector<2x24xf32>
    %264 = vector.extract_strided_slice %57 {offsets = [2, 0, 0], sizes = [1, 2, 24], strides = [1, 1, 1]} : vector<8x2x24xf32> to vector<1x2x24xf32>
    %265 = vector.shape_cast %264 : vector<1x2x24xf32> to vector<2x24xf32>
    %266 = tpu.concatenate %263, %265 in 0 : vector<2x24xf32>, vector<2x24xf32> -> vector<4x24xf32>
    %267 = vector.extract_strided_slice %266 {offsets = [0, 0], sizes = [4, 16], strides = [1, 1]} : vector<4x24xf32> to vector<4x16xf32>
    %268 = vector.extract_strided_slice %261 {offsets = [0, 0], sizes = [4, 16], strides = [1, 1]} : vector<4x24xf32> to vector<4x16xf32>
    %269 = arith.addf %267, %268 : vector<4x16xf32>
    %270 = arith.negf %269 : vector<4x16xf32>
    %271 = math.exp %270 : vector<4x16xf32>
    %cst_104 = arith.constant 1.000000e+00 : f32
    %272 = vector.broadcast %cst_104 : f32 to vector<4x16xf32>
    %273 = arith.addf %272, %271 : vector<4x16xf32>
    %274 = arith.divf %272, %273 : vector<4x16xf32>
    %275 = vector.extract_strided_slice %274 {offsets = [0, 0], sizes = [4, 8], strides = [1, 1]} : vector<4x16xf32> to vector<4x8xf32>
    %276 = vector.extract_strided_slice %274 {offsets = [0, 8], sizes = [4, 8], strides = [1, 1]} : vector<4x16xf32> to vector<4x8xf32>
    %277 = vector.extract_strided_slice %266 {offsets = [0, 16], sizes = [4, 8], strides = [1, 1]} : vector<4x24xf32> to vector<4x8xf32>
    %278 = vector.extract_strided_slice %261 {offsets = [0, 16], sizes = [4, 8], strides = [1, 1]} : vector<4x24xf32> to vector<4x8xf32>
    %279 = arith.mulf %275, %278 : vector<4x8xf32>
    %280 = arith.addf %277, %279 : vector<4x8xf32>
    %281 = math.tanh %280 : vector<4x8xf32>
    %cst_105 = arith.constant 1.000000e+00 : f32
    %282 = vector.broadcast %cst_105 : f32 to vector<4x8xf32>
    %283 = arith.subf %282, %276 : vector<4x8xf32>
    %284 = arith.mulf %283, %281 : vector<4x8xf32>
    %285 = arith.mulf %276, %248 : vector<4x8xf32>
    %286 = arith.addf %284, %285 : vector<4x8xf32>
    %287 = vector.extract_strided_slice %286 {offsets = [0, 0], sizes = [2, 8], strides = [1, 1]} : vector<4x8xf32> to vector<2x8xf32>
    %c5_106 = arith.constant 5 : index
    %c0_107 = arith.constant 0 : index
    %c0_108 = arith.constant 0 : index
    %288 = vector.load %arg32[%c5_106, %c0_107, %c0_108] : memref<8x2x8xf32, #tpu.memory_space<vmem>>, vector<1x2x8xf32>
    %289 = vector.shape_cast %288 : vector<1x2x8xf32> to vector<2x8xf32>
    %290 = vector.shape_cast %287 : vector<2x8xf32> to vector<1x2x8xf32>
    tpu.vector_store %arg32[%c5_106, %c0_107, %c0_108], %290 {strides = array<i32>} : memref<8x2x8xf32, #tpu.memory_space<vmem>>, vector<1x2x8xf32>,
    %291 = vector.extract_strided_slice %286 {offsets = [2, 0], sizes = [2, 8], strides = [1, 1]} : vector<4x8xf32> to vector<2x8xf32>
    %c2_109 = arith.constant 2 : index
    %c0_110 = arith.constant 0 : index
    %c0_111 = arith.constant 0 : index
    %292 = vector.load %arg33[%c2_109, %c0_110, %c0_111] : memref<8x2x8xf32, #tpu.memory_space<vmem>>, vector<1x2x8xf32>
    %293 = vector.shape_cast %292 : vector<1x2x8xf32> to vector<2x8xf32>
    %294 = vector.shape_cast %291 : vector<2x8xf32> to vector<1x2x8xf32>
    tpu.vector_store %arg33[%c2_109, %c0_110, %c0_111], %294 {strides = array<i32>} : memref<8x2x8xf32, #tpu.memory_space<vmem>>, vector<1x2x8xf32>,
    %cst_112 = arith.constant dense<0.000000e+00> : vector<4x48xf32>
    %295 = tpu.matmul %286, %7, %cst_112 {dimension_numbers = #tpu.dot_dimension_numbers<[1], [0], [0], [1], [0, 0, 1, 1], [], []>} : vector<4x8xf32>, vector<8x48xf32>, vector<4x48xf32> -> vector<4x48xf32>
    %296 = vector.extract_strided_slice %295 {offsets = [0, 0], sizes = [4, 24], strides = [1, 1]} : vector<4x48xf32> to vector<4x24xf32>
    %297 = vector.extract_strided_slice %295 {offsets = [0, 24], sizes = [4, 24], strides = [1, 1]} : vector<4x48xf32> to vector<4x24xf32>
    %298 = arith.select %65, %296, %297 : vector<4x24xi1>, vector<4x24xf32>
    %299 = arith.addf %298, %62 : vector<4x24xf32>
    %300 = vector.extract_strided_slice %56 {offsets = [6, 0, 0], sizes = [1, 2, 24], strides = [1, 1, 1]} : vector<8x2x24xf32> to vector<1x2x24xf32>
    %301 = vector.shape_cast %300 : vector<1x2x24xf32> to vector<2x24xf32>
    %302 = vector.extract_strided_slice %57 {offsets = [1, 0, 0], sizes = [1, 2, 24], strides = [1, 1, 1]} : vector<8x2x24xf32> to vector<1x2x24xf32>
    %303 = vector.shape_cast %302 : vector<1x2x24xf32> to vector<2x24xf32>
    %304 = tpu.concatenate %301, %303 in 0 : vector<2x24xf32>, vector<2x24xf32> -> vector<4x24xf32>
    %305 = vector.extract_strided_slice %304 {offsets = [0, 0], sizes = [4, 16], strides = [1, 1]} : vector<4x24xf32> to vector<4x16xf32>
    %306 = vector.extract_strided_slice %299 {offsets = [0, 0], sizes = [4, 16], strides = [1, 1]} : vector<4x24xf32> to vector<4x16xf32>
    %307 = arith.addf %305, %306 : vector<4x16xf32>
    %308 = arith.negf %307 : vector<4x16xf32>
    %309 = math.exp %308 : vector<4x16xf32>
    %cst_113 = arith.constant 1.000000e+00 : f32
    %310 = vector.broadcast %cst_113 : f32 to vector<4x16xf32>
    %311 = arith.addf %310, %309 : vector<4x16xf32>
    %312 = arith.divf %310, %311 : vector<4x16xf32>
    %313 = vector.extract_strided_slice %312 {offsets = [0, 0], sizes = [4, 8], strides = [1, 1]} : vector<4x16xf32> to vector<4x8xf32>
    %314 = vector.extract_strided_slice %312 {offsets = [0, 8], sizes = [4, 8], strides = [1, 1]} : vector<4x16xf32> to vector<4x8xf32>
    %315 = vector.extract_strided_slice %304 {offsets = [0, 16], sizes = [4, 8], strides = [1, 1]} : vector<4x24xf32> to vector<4x8xf32>
    %316 = vector.extract_strided_slice %299 {offsets = [0, 16], sizes = [4, 8], strides = [1, 1]} : vector<4x24xf32> to vector<4x8xf32>
    %317 = arith.mulf %313, %316 : vector<4x8xf32>
    %318 = arith.addf %315, %317 : vector<4x8xf32>
    %319 = math.tanh %318 : vector<4x8xf32>
    %cst_114 = arith.constant 1.000000e+00 : f32
    %320 = vector.broadcast %cst_114 : f32 to vector<4x8xf32>
    %321 = arith.subf %320, %314 : vector<4x8xf32>
    %322 = arith.mulf %321, %319 : vector<4x8xf32>
    %323 = arith.mulf %314, %286 : vector<4x8xf32>
    %324 = arith.addf %322, %323 : vector<4x8xf32>
    %325 = vector.extract_strided_slice %324 {offsets = [0, 0], sizes = [2, 8], strides = [1, 1]} : vector<4x8xf32> to vector<2x8xf32>
    %c6_115 = arith.constant 6 : index
    %c0_116 = arith.constant 0 : index
    %c0_117 = arith.constant 0 : index
    %326 = vector.load %arg32[%c6_115, %c0_116, %c0_117] : memref<8x2x8xf32, #tpu.memory_space<vmem>>, vector<1x2x8xf32>
    %327 = vector.shape_cast %326 : vector<1x2x8xf32> to vector<2x8xf32>
    %328 = vector.shape_cast %325 : vector<2x8xf32> to vector<1x2x8xf32>
    tpu.vector_store %arg32[%c6_115, %c0_116, %c0_117], %328 {strides = array<i32>} : memref<8x2x8xf32, #tpu.memory_space<vmem>>, vector<1x2x8xf32>,
    %329 = vector.extract_strided_slice %324 {offsets = [2, 0], sizes = [2, 8], strides = [1, 1]} : vector<4x8xf32> to vector<2x8xf32>
    %c1_118 = arith.constant 1 : index
    %c0_119 = arith.constant 0 : index
    %c0_120 = arith.constant 0 : index
    %330 = vector.load %arg33[%c1_118, %c0_119, %c0_120] : memref<8x2x8xf32, #tpu.memory_space<vmem>>, vector<1x2x8xf32>
    %331 = vector.shape_cast %330 : vector<1x2x8xf32> to vector<2x8xf32>
    %332 = vector.shape_cast %329 : vector<2x8xf32> to vector<1x2x8xf32>
    tpu.vector_store %arg33[%c1_118, %c0_119, %c0_120], %332 {strides = array<i32>} : memref<8x2x8xf32, #tpu.memory_space<vmem>>, vector<1x2x8xf32>,
    %cst_121 = arith.constant dense<0.000000e+00> : vector<4x48xf32>
    %333 = tpu.matmul %324, %7, %cst_121 {dimension_numbers = #tpu.dot_dimension_numbers<[1], [0], [0], [1], [0, 0, 1, 1], [], []>} : vector<4x8xf32>, vector<8x48xf32>, vector<4x48xf32> -> vector<4x48xf32>
    %334 = vector.extract_strided_slice %333 {offsets = [0, 0], sizes = [4, 24], strides = [1, 1]} : vector<4x48xf32> to vector<4x24xf32>
    %335 = vector.extract_strided_slice %333 {offsets = [0, 24], sizes = [4, 24], strides = [1, 1]} : vector<4x48xf32> to vector<4x24xf32>
    %336 = arith.select %65, %334, %335 : vector<4x24xi1>, vector<4x24xf32>
    %337 = arith.addf %336, %62 : vector<4x24xf32>
    %338 = vector.extract_strided_slice %56 {offsets = [7, 0, 0], sizes = [1, 2, 24], strides = [1, 1, 1]} : vector<8x2x24xf32> to vector<1x2x24xf32>
    %339 = vector.shape_cast %338 : vector<1x2x24xf32> to vector<2x24xf32>
    %340 = vector.extract_strided_slice %57 {offsets = [0, 0, 0], sizes = [1, 2, 24], strides = [1, 1, 1]} : vector<8x2x24xf32> to vector<1x2x24xf32>
    %341 = vector.shape_cast %340 : vector<1x2x24xf32> to vector<2x24xf32>
    %342 = tpu.concatenate %339, %341 in 0 : vector<2x24xf32>, vector<2x24xf32> -> vector<4x24xf32>
    %343 = vector.extract_strided_slice %342 {offsets = [0, 0], sizes = [4, 16], strides = [1, 1]} : vector<4x24xf32> to vector<4x16xf32>
    %344 = vector.extract_strided_slice %337 {offsets = [0, 0], sizes = [4, 16], strides = [1, 1]} : vector<4x24xf32> to vector<4x16xf32>
    %345 = arith.addf %343, %344 : vector<4x16xf32>
    %346 = arith.negf %345 : vector<4x16xf32>
    %347 = math.exp %346 : vector<4x16xf32>
    %cst_122 = arith.constant 1.000000e+00 : f32
    %348 = vector.broadcast %cst_122 : f32 to vector<4x16xf32>
    %349 = arith.addf %348, %347 : vector<4x16xf32>
    %350 = arith.divf %348, %349 : vector<4x16xf32>
    %351 = vector.extract_strided_slice %350 {offsets = [0, 0], sizes = [4, 8], strides = [1, 1]} : vector<4x16xf32> to vector<4x8xf32>
    %352 = vector.extract_strided_slice %350 {offsets = [0, 8], sizes = [4, 8], strides = [1, 1]} : vector<4x16xf32> to vector<4x8xf32>
    %353 = vector.extract_strided_slice %342 {offsets = [0, 16], sizes = [4, 8], strides = [1, 1]} : vector<4x24xf32> to vector<4x8xf32>
    %354 = vector.extract_strided_slice %337 {offsets = [0, 16], sizes = [4, 8], strides = [1, 1]} : vector<4x24xf32> to vector<4x8xf32>
    %355 = arith.mulf %351, %354 : vector<4x8xf32>
    %356 = arith.addf %353, %355 : vector<4x8xf32>
    %357 = math.tanh %356 : vector<4x8xf32>
    %cst_123 = arith.constant 1.000000e+00 : f32
    %358 = vector.broadcast %cst_123 : f32 to vector<4x8xf32>
    %359 = arith.subf %358, %352 : vector<4x8xf32>
    %360 = arith.mulf %359, %357 : vector<4x8xf32>
    %361 = arith.mulf %352, %324 : vector<4x8xf32>
    %362 = arith.addf %360, %361 : vector<4x8xf32>
    %363 = vector.extract_strided_slice %362 {offsets = [0, 0], sizes = [2, 8], strides = [1, 1]} : vector<4x8xf32> to vector<2x8xf32>
    %c7_124 = arith.constant 7 : index
    %c0_125 = arith.constant 0 : index
    %c0_126 = arith.constant 0 : index
    %364 = vector.load %arg32[%c7_124, %c0_125, %c0_126] : memref<8x2x8xf32, #tpu.memory_space<vmem>>, vector<1x2x8xf32>
    %365 = vector.shape_cast %364 : vector<1x2x8xf32> to vector<2x8xf32>
    %366 = vector.shape_cast %363 : vector<2x8xf32> to vector<1x2x8xf32>
    tpu.vector_store %arg32[%c7_124, %c0_125, %c0_126], %366 {strides = array<i32>} : memref<8x2x8xf32, #tpu.memory_space<vmem>>, vector<1x2x8xf32>,
    %367 = vector.extract_strided_slice %362 {offsets = [2, 0], sizes = [2, 8], strides = [1, 1]} : vector<4x8xf32> to vector<2x8xf32>
    %c0_127 = arith.constant 0 : index
    %c0_128 = arith.constant 0 : index
    %c0_129 = arith.constant 0 : index
    %368 = vector.load %arg33[%c0_127, %c0_128, %c0_129] : memref<8x2x8xf32, #tpu.memory_space<vmem>>, vector<1x2x8xf32>
    %369 = vector.shape_cast %368 : vector<1x2x8xf32> to vector<2x8xf32>
    %370 = vector.shape_cast %367 : vector<2x8xf32> to vector<1x2x8xf32>
    tpu.vector_store %arg33[%c0_127, %c0_128, %c0_129], %370 {strides = array<i32>} : memref<8x2x8xf32, #tpu.memory_space<vmem>>, vector<1x2x8xf32>,
    %c0_130 = arith.constant 0 : index
    %c0_131 = arith.constant 0 : index
    %c0_132 = arith.constant 0 : index
    %371 = vector.load %arg32[%c0_130, %c0_131, %c0_132] : memref<8x2x8xf32, #tpu.memory_space<vmem>>, vector<8x2x8xf32>
    %372 = vector.shape_cast %371 : vector<8x2x8xf32> to vector<16x8xf32>
    %c0_133 = arith.constant 0 : index
    %c0_134 = arith.constant 0 : index
    %c0_135 = arith.constant 0 : index
    %373 = vector.load %arg33[%c0_133, %c0_134, %c0_135] : memref<8x2x8xf32, #tpu.memory_space<vmem>>, vector<8x2x8xf32>
    %374 = vector.shape_cast %373 : vector<8x2x8xf32> to vector<16x8xf32>
    %375 = vector.extract_strided_slice %10 {offsets = [0, 0], sizes = [8, 24], strides = [1, 1]} : vector<16x24xf32> to vector<8x24xf32>
    %cst_136 = arith.constant dense<0.000000e+00> : vector<16x24xf32>
    %376 = tpu.matmul %372, %375, %cst_136 {dimension_numbers = #tpu.dot_dimension_numbers<[1], [0], [0], [1], [0, 0, 1, 1], [], []>} : vector<16x8xf32>, vector<8x24xf32>, vector<16x24xf32> -> vector<16x24xf32>
    %377 = vector.extract_strided_slice %10 {offsets = [8, 0], sizes = [8, 24], strides = [1, 1]} : vector<16x24xf32> to vector<8x24xf32>
    %cst_137 = arith.constant dense<0.000000e+00> : vector<16x24xf32>
    %378 = tpu.matmul %374, %377, %cst_137 {dimension_numbers = #tpu.dot_dimension_numbers<[1], [0], [0], [1], [0, 0, 1, 1], [], []>} : vector<16x8xf32>, vector<8x24xf32>, vector<16x24xf32> -> vector<16x24xf32>
    %379 = arith.addf %376, %378 : vector<16x24xf32>
    %380 = vector.broadcast %11 : vector<1x24xf32> to vector<16x24xf32>
    %381 = arith.addf %379, %380 : vector<16x24xf32>
    %382 = vector.extract_strided_slice %12 {offsets = [0, 0], sizes = [8, 24], strides = [1, 1]} : vector<16x24xf32> to vector<8x24xf32>
    %cst_138 = arith.constant dense<0.000000e+00> : vector<16x24xf32>
    %383 = tpu.matmul %372, %382, %cst_138 {dimension_numbers = #tpu.dot_dimension_numbers<[1], [0], [0], [1], [0, 0, 1, 1], [], []>} : vector<16x8xf32>, vector<8x24xf32>, vector<16x24xf32> -> vector<16x24xf32>
    %384 = vector.extract_strided_slice %12 {offsets = [8, 0], sizes = [8, 24], strides = [1, 1]} : vector<16x24xf32> to vector<8x24xf32>
    %cst_139 = arith.constant dense<0.000000e+00> : vector<16x24xf32>
    %385 = tpu.matmul %374, %384, %cst_139 {dimension_numbers = #tpu.dot_dimension_numbers<[1], [0], [0], [1], [0, 0, 1, 1], [], []>} : vector<16x8xf32>, vector<8x24xf32>, vector<16x24xf32> -> vector<16x24xf32>
    %386 = arith.addf %383, %385 : vector<16x24xf32>
    %387 = vector.broadcast %13 : vector<1x24xf32> to vector<16x24xf32>
    %388 = arith.addf %386, %387 : vector<16x24xf32>
    %389 = vector.shape_cast %381 : vector<16x24xf32> to vector<8x2x24xf32>
    %390 = vector.shape_cast %388 : vector<16x24xf32> to vector<8x2x24xf32>
    %391 = vector.shape_cast %15 : vector<1x24xf32> to vector<1x24xf32>
    %392 = vector.broadcast %391 : vector<1x24xf32> to vector<2x24xf32>
    %393 = vector.shape_cast %16 : vector<1x24xf32> to vector<1x24xf32>
    %394 = vector.broadcast %393 : vector<1x24xf32> to vector<2x24xf32>
    %395 = tpu.concatenate %392, %394 in 0 : vector<2x24xf32>, vector<2x24xf32> -> vector<4x24xf32>
    %396 = tpu.iota {dimensions = array<i32: 0>} : vector<4x24xi32>
    %c2_i32_140 = arith.constant 2 : i32
    %397 = vector.broadcast %c2_i32_140 : i32 to vector<4x24xi32>
    %398 = arith.cmpi slt, %396, %397 : vector<4x24xi32>
    %cst_141 = arith.constant 0.000000e+00 : f32
    %399 = vector.broadcast %cst_141 : f32 to vector<4x8xf32>
    %cst_142 = arith.constant dense<0.000000e+00> : vector<4x48xf32>
    %400 = tpu.matmul %399, %14, %cst_142 {dimension_numbers = #tpu.dot_dimension_numbers<[1], [0], [0], [1], [0, 0, 1, 1], [], []>} : vector<4x8xf32>, vector<8x48xf32>, vector<4x48xf32> -> vector<4x48xf32>
    %401 = vector.extract_strided_slice %400 {offsets = [0, 0], sizes = [4, 24], strides = [1, 1]} : vector<4x48xf32> to vector<4x24xf32>
    %402 = vector.extract_strided_slice %400 {offsets = [0, 24], sizes = [4, 24], strides = [1, 1]} : vector<4x48xf32> to vector<4x24xf32>
    %403 = arith.select %398, %401, %402 : vector<4x24xi1>, vector<4x24xf32>
    %404 = arith.addf %403, %395 : vector<4x24xf32>
    %405 = vector.extract_strided_slice %389 {offsets = [0, 0, 0], sizes = [1, 2, 24], strides = [1, 1, 1]} : vector<8x2x24xf32> to vector<1x2x24xf32>
    %406 = vector.shape_cast %405 : vector<1x2x24xf32> to vector<2x24xf32>
    %407 = vector.extract_strided_slice %390 {offsets = [7, 0, 0], sizes = [1, 2, 24], strides = [1, 1, 1]} : vector<8x2x24xf32> to vector<1x2x24xf32>
    %408 = vector.shape_cast %407 : vector<1x2x24xf32> to vector<2x24xf32>
    %409 = tpu.concatenate %406, %408 in 0 : vector<2x24xf32>, vector<2x24xf32> -> vector<4x24xf32>
    %410 = vector.extract_strided_slice %409 {offsets = [0, 0], sizes = [4, 16], strides = [1, 1]} : vector<4x24xf32> to vector<4x16xf32>
    %411 = vector.extract_strided_slice %404 {offsets = [0, 0], sizes = [4, 16], strides = [1, 1]} : vector<4x24xf32> to vector<4x16xf32>
    %412 = arith.addf %410, %411 : vector<4x16xf32>
    %413 = arith.negf %412 : vector<4x16xf32>
    %414 = math.exp %413 : vector<4x16xf32>
    %cst_143 = arith.constant 1.000000e+00 : f32
    %415 = vector.broadcast %cst_143 : f32 to vector<4x16xf32>
    %416 = arith.addf %415, %414 : vector<4x16xf32>
    %417 = arith.divf %415, %416 : vector<4x16xf32>
    %418 = vector.extract_strided_slice %417 {offsets = [0, 0], sizes = [4, 8], strides = [1, 1]} : vector<4x16xf32> to vector<4x8xf32>
    %419 = vector.extract_strided_slice %417 {offsets = [0, 8], sizes = [4, 8], strides = [1, 1]} : vector<4x16xf32> to vector<4x8xf32>
    %420 = vector.extract_strided_slice %409 {offsets = [0, 16], sizes = [4, 8], strides = [1, 1]} : vector<4x24xf32> to vector<4x8xf32>
    %421 = vector.extract_strided_slice %404 {offsets = [0, 16], sizes = [4, 8], strides = [1, 1]} : vector<4x24xf32> to vector<4x8xf32>
    %422 = arith.mulf %418, %421 : vector<4x8xf32>
    %423 = arith.addf %420, %422 : vector<4x8xf32>
    %424 = math.tanh %423 : vector<4x8xf32>
    %cst_144 = arith.constant 1.000000e+00 : f32
    %425 = vector.broadcast %cst_144 : f32 to vector<4x8xf32>
    %426 = arith.subf %425, %419 : vector<4x8xf32>
    %427 = arith.mulf %426, %424 : vector<4x8xf32>
    %428 = arith.mulf %419, %399 : vector<4x8xf32>
    %429 = arith.addf %427, %428 : vector<4x8xf32>
    %430 = vector.extract_strided_slice %429 {offsets = [0, 0], sizes = [2, 8], strides = [1, 1]} : vector<4x8xf32> to vector<2x8xf32>
    %c0_145 = arith.constant 0 : index
    %c0_146 = arith.constant 0 : index
    %c0_147 = arith.constant 0 : index
    %431 = vector.load %arg34[%c0_145, %c0_146, %c0_147] : memref<8x2x8xf32, #tpu.memory_space<vmem>>, vector<1x2x8xf32>
    %432 = vector.shape_cast %431 : vector<1x2x8xf32> to vector<2x8xf32>
    %433 = vector.shape_cast %430 : vector<2x8xf32> to vector<1x2x8xf32>
    tpu.vector_store %arg34[%c0_145, %c0_146, %c0_147], %433 {strides = array<i32>} : memref<8x2x8xf32, #tpu.memory_space<vmem>>, vector<1x2x8xf32>,
    %434 = vector.extract_strided_slice %429 {offsets = [2, 0], sizes = [2, 8], strides = [1, 1]} : vector<4x8xf32> to vector<2x8xf32>
    %c7_148 = arith.constant 7 : index
    %c0_149 = arith.constant 0 : index
    %c0_150 = arith.constant 0 : index
    %435 = vector.load %arg35[%c7_148, %c0_149, %c0_150] : memref<8x2x8xf32, #tpu.memory_space<vmem>>, vector<1x2x8xf32>
    %436 = vector.shape_cast %435 : vector<1x2x8xf32> to vector<2x8xf32>
    %437 = vector.shape_cast %434 : vector<2x8xf32> to vector<1x2x8xf32>
    tpu.vector_store %arg35[%c7_148, %c0_149, %c0_150], %437 {strides = array<i32>} : memref<8x2x8xf32, #tpu.memory_space<vmem>>, vector<1x2x8xf32>,
    %cst_151 = arith.constant dense<0.000000e+00> : vector<4x48xf32>
    %438 = tpu.matmul %429, %14, %cst_151 {dimension_numbers = #tpu.dot_dimension_numbers<[1], [0], [0], [1], [0, 0, 1, 1], [], []>} : vector<4x8xf32>, vector<8x48xf32>, vector<4x48xf32> -> vector<4x48xf32>
    %439 = vector.extract_strided_slice %438 {offsets = [0, 0], sizes = [4, 24], strides = [1, 1]} : vector<4x48xf32> to vector<4x24xf32>
    %440 = vector.extract_strided_slice %438 {offsets = [0, 24], sizes = [4, 24], strides = [1, 1]} : vector<4x48xf32> to vector<4x24xf32>
    %441 = arith.select %398, %439, %440 : vector<4x24xi1>, vector<4x24xf32>
    %442 = arith.addf %441, %395 : vector<4x24xf32>
    %443 = vector.extract_strided_slice %389 {offsets = [1, 0, 0], sizes = [1, 2, 24], strides = [1, 1, 1]} : vector<8x2x24xf32> to vector<1x2x24xf32>
    %444 = vector.shape_cast %443 : vector<1x2x24xf32> to vector<2x24xf32>
    %445 = vector.extract_strided_slice %390 {offsets = [6, 0, 0], sizes = [1, 2, 24], strides = [1, 1, 1]} : vector<8x2x24xf32> to vector<1x2x24xf32>
    %446 = vector.shape_cast %445 : vector<1x2x24xf32> to vector<2x24xf32>
    %447 = tpu.concatenate %444, %446 in 0 : vector<2x24xf32>, vector<2x24xf32> -> vector<4x24xf32>
    %448 = vector.extract_strided_slice %447 {offsets = [0, 0], sizes = [4, 16], strides = [1, 1]} : vector<4x24xf32> to vector<4x16xf32>
    %449 = vector.extract_strided_slice %442 {offsets = [0, 0], sizes = [4, 16], strides = [1, 1]} : vector<4x24xf32> to vector<4x16xf32>
    %450 = arith.addf %448, %449 : vector<4x16xf32>
    %451 = arith.negf %450 : vector<4x16xf32>
    %452 = math.exp %451 : vector<4x16xf32>
    %cst_152 = arith.constant 1.000000e+00 : f32
    %453 = vector.broadcast %cst_152 : f32 to vector<4x16xf32>
    %454 = arith.addf %453, %452 : vector<4x16xf32>
    %455 = arith.divf %453, %454 : vector<4x16xf32>
    %456 = vector.extract_strided_slice %455 {offsets = [0, 0], sizes = [4, 8], strides = [1, 1]} : vector<4x16xf32> to vector<4x8xf32>
    %457 = vector.extract_strided_slice %455 {offsets = [0, 8], sizes = [4, 8], strides = [1, 1]} : vector<4x16xf32> to vector<4x8xf32>
    %458 = vector.extract_strided_slice %447 {offsets = [0, 16], sizes = [4, 8], strides = [1, 1]} : vector<4x24xf32> to vector<4x8xf32>
    %459 = vector.extract_strided_slice %442 {offsets = [0, 16], sizes = [4, 8], strides = [1, 1]} : vector<4x24xf32> to vector<4x8xf32>
    %460 = arith.mulf %456, %459 : vector<4x8xf32>
    %461 = arith.addf %458, %460 : vector<4x8xf32>
    %462 = math.tanh %461 : vector<4x8xf32>
    %cst_153 = arith.constant 1.000000e+00 : f32
    %463 = vector.broadcast %cst_153 : f32 to vector<4x8xf32>
    %464 = arith.subf %463, %457 : vector<4x8xf32>
    %465 = arith.mulf %464, %462 : vector<4x8xf32>
    %466 = arith.mulf %457, %429 : vector<4x8xf32>
    %467 = arith.addf %465, %466 : vector<4x8xf32>
    %468 = vector.extract_strided_slice %467 {offsets = [0, 0], sizes = [2, 8], strides = [1, 1]} : vector<4x8xf32> to vector<2x8xf32>
    %c1_154 = arith.constant 1 : index
    %c0_155 = arith.constant 0 : index
    %c0_156 = arith.constant 0 : index
    %469 = vector.load %arg34[%c1_154, %c0_155, %c0_156] : memref<8x2x8xf32, #tpu.memory_space<vmem>>, vector<1x2x8xf32>
    %470 = vector.shape_cast %469 : vector<1x2x8xf32> to vector<2x8xf32>
    %471 = vector.shape_cast %468 : vector<2x8xf32> to vector<1x2x8xf32>
    tpu.vector_store %arg34[%c1_154, %c0_155, %c0_156], %471 {strides = array<i32>} : memref<8x2x8xf32, #tpu.memory_space<vmem>>, vector<1x2x8xf32>,
    %472 = vector.extract_strided_slice %467 {offsets = [2, 0], sizes = [2, 8], strides = [1, 1]} : vector<4x8xf32> to vector<2x8xf32>
    %c6_157 = arith.constant 6 : index
    %c0_158 = arith.constant 0 : index
    %c0_159 = arith.constant 0 : index
    %473 = vector.load %arg35[%c6_157, %c0_158, %c0_159] : memref<8x2x8xf32, #tpu.memory_space<vmem>>, vector<1x2x8xf32>
    %474 = vector.shape_cast %473 : vector<1x2x8xf32> to vector<2x8xf32>
    %475 = vector.shape_cast %472 : vector<2x8xf32> to vector<1x2x8xf32>
    tpu.vector_store %arg35[%c6_157, %c0_158, %c0_159], %475 {strides = array<i32>} : memref<8x2x8xf32, #tpu.memory_space<vmem>>, vector<1x2x8xf32>,
    %cst_160 = arith.constant dense<0.000000e+00> : vector<4x48xf32>
    %476 = tpu.matmul %467, %14, %cst_160 {dimension_numbers = #tpu.dot_dimension_numbers<[1], [0], [0], [1], [0, 0, 1, 1], [], []>} : vector<4x8xf32>, vector<8x48xf32>, vector<4x48xf32> -> vector<4x48xf32>
    %477 = vector.extract_strided_slice %476 {offsets = [0, 0], sizes = [4, 24], strides = [1, 1]} : vector<4x48xf32> to vector<4x24xf32>
    %478 = vector.extract_strided_slice %476 {offsets = [0, 24], sizes = [4, 24], strides = [1, 1]} : vector<4x48xf32> to vector<4x24xf32>
    %479 = arith.select %398, %477, %478 : vector<4x24xi1>, vector<4x24xf32>
    %480 = arith.addf %479, %395 : vector<4x24xf32>
    %481 = vector.extract_strided_slice %389 {offsets = [2, 0, 0], sizes = [1, 2, 24], strides = [1, 1, 1]} : vector<8x2x24xf32> to vector<1x2x24xf32>
    %482 = vector.shape_cast %481 : vector<1x2x24xf32> to vector<2x24xf32>
    %483 = vector.extract_strided_slice %390 {offsets = [5, 0, 0], sizes = [1, 2, 24], strides = [1, 1, 1]} : vector<8x2x24xf32> to vector<1x2x24xf32>
    %484 = vector.shape_cast %483 : vector<1x2x24xf32> to vector<2x24xf32>
    %485 = tpu.concatenate %482, %484 in 0 : vector<2x24xf32>, vector<2x24xf32> -> vector<4x24xf32>
    %486 = vector.extract_strided_slice %485 {offsets = [0, 0], sizes = [4, 16], strides = [1, 1]} : vector<4x24xf32> to vector<4x16xf32>
    %487 = vector.extract_strided_slice %480 {offsets = [0, 0], sizes = [4, 16], strides = [1, 1]} : vector<4x24xf32> to vector<4x16xf32>
    %488 = arith.addf %486, %487 : vector<4x16xf32>
    %489 = arith.negf %488 : vector<4x16xf32>
    %490 = math.exp %489 : vector<4x16xf32>
    %cst_161 = arith.constant 1.000000e+00 : f32
    %491 = vector.broadcast %cst_161 : f32 to vector<4x16xf32>
    %492 = arith.addf %491, %490 : vector<4x16xf32>
    %493 = arith.divf %491, %492 : vector<4x16xf32>
    %494 = vector.extract_strided_slice %493 {offsets = [0, 0], sizes = [4, 8], strides = [1, 1]} : vector<4x16xf32> to vector<4x8xf32>
    %495 = vector.extract_strided_slice %493 {offsets = [0, 8], sizes = [4, 8], strides = [1, 1]} : vector<4x16xf32> to vector<4x8xf32>
    %496 = vector.extract_strided_slice %485 {offsets = [0, 16], sizes = [4, 8], strides = [1, 1]} : vector<4x24xf32> to vector<4x8xf32>
    %497 = vector.extract_strided_slice %480 {offsets = [0, 16], sizes = [4, 8], strides = [1, 1]} : vector<4x24xf32> to vector<4x8xf32>
    %498 = arith.mulf %494, %497 : vector<4x8xf32>
    %499 = arith.addf %496, %498 : vector<4x8xf32>
    %500 = math.tanh %499 : vector<4x8xf32>
    %cst_162 = arith.constant 1.000000e+00 : f32
    %501 = vector.broadcast %cst_162 : f32 to vector<4x8xf32>
    %502 = arith.subf %501, %495 : vector<4x8xf32>
    %503 = arith.mulf %502, %500 : vector<4x8xf32>
    %504 = arith.mulf %495, %467 : vector<4x8xf32>
    %505 = arith.addf %503, %504 : vector<4x8xf32>
    %506 = vector.extract_strided_slice %505 {offsets = [0, 0], sizes = [2, 8], strides = [1, 1]} : vector<4x8xf32> to vector<2x8xf32>
    %c2_163 = arith.constant 2 : index
    %c0_164 = arith.constant 0 : index
    %c0_165 = arith.constant 0 : index
    %507 = vector.load %arg34[%c2_163, %c0_164, %c0_165] : memref<8x2x8xf32, #tpu.memory_space<vmem>>, vector<1x2x8xf32>
    %508 = vector.shape_cast %507 : vector<1x2x8xf32> to vector<2x8xf32>
    %509 = vector.shape_cast %506 : vector<2x8xf32> to vector<1x2x8xf32>
    tpu.vector_store %arg34[%c2_163, %c0_164, %c0_165], %509 {strides = array<i32>} : memref<8x2x8xf32, #tpu.memory_space<vmem>>, vector<1x2x8xf32>,
    %510 = vector.extract_strided_slice %505 {offsets = [2, 0], sizes = [2, 8], strides = [1, 1]} : vector<4x8xf32> to vector<2x8xf32>
    %c5_166 = arith.constant 5 : index
    %c0_167 = arith.constant 0 : index
    %c0_168 = arith.constant 0 : index
    %511 = vector.load %arg35[%c5_166, %c0_167, %c0_168] : memref<8x2x8xf32, #tpu.memory_space<vmem>>, vector<1x2x8xf32>
    %512 = vector.shape_cast %511 : vector<1x2x8xf32> to vector<2x8xf32>
    %513 = vector.shape_cast %510 : vector<2x8xf32> to vector<1x2x8xf32>
    tpu.vector_store %arg35[%c5_166, %c0_167, %c0_168], %513 {strides = array<i32>} : memref<8x2x8xf32, #tpu.memory_space<vmem>>, vector<1x2x8xf32>,
    %cst_169 = arith.constant dense<0.000000e+00> : vector<4x48xf32>
    %514 = tpu.matmul %505, %14, %cst_169 {dimension_numbers = #tpu.dot_dimension_numbers<[1], [0], [0], [1], [0, 0, 1, 1], [], []>} : vector<4x8xf32>, vector<8x48xf32>, vector<4x48xf32> -> vector<4x48xf32>
    %515 = vector.extract_strided_slice %514 {offsets = [0, 0], sizes = [4, 24], strides = [1, 1]} : vector<4x48xf32> to vector<4x24xf32>
    %516 = vector.extract_strided_slice %514 {offsets = [0, 24], sizes = [4, 24], strides = [1, 1]} : vector<4x48xf32> to vector<4x24xf32>
    %517 = arith.select %398, %515, %516 : vector<4x24xi1>, vector<4x24xf32>
    %518 = arith.addf %517, %395 : vector<4x24xf32>
    %519 = vector.extract_strided_slice %389 {offsets = [3, 0, 0], sizes = [1, 2, 24], strides = [1, 1, 1]} : vector<8x2x24xf32> to vector<1x2x24xf32>
    %520 = vector.shape_cast %519 : vector<1x2x24xf32> to vector<2x24xf32>
    %521 = vector.extract_strided_slice %390 {offsets = [4, 0, 0], sizes = [1, 2, 24], strides = [1, 1, 1]} : vector<8x2x24xf32> to vector<1x2x24xf32>
    %522 = vector.shape_cast %521 : vector<1x2x24xf32> to vector<2x24xf32>
    %523 = tpu.concatenate %520, %522 in 0 : vector<2x24xf32>, vector<2x24xf32> -> vector<4x24xf32>
    %524 = vector.extract_strided_slice %523 {offsets = [0, 0], sizes = [4, 16], strides = [1, 1]} : vector<4x24xf32> to vector<4x16xf32>
    %525 = vector.extract_strided_slice %518 {offsets = [0, 0], sizes = [4, 16], strides = [1, 1]} : vector<4x24xf32> to vector<4x16xf32>
    %526 = arith.addf %524, %525 : vector<4x16xf32>
    %527 = arith.negf %526 : vector<4x16xf32>
    %528 = math.exp %527 : vector<4x16xf32>
    %cst_170 = arith.constant 1.000000e+00 : f32
    %529 = vector.broadcast %cst_170 : f32 to vector<4x16xf32>
    %530 = arith.addf %529, %528 : vector<4x16xf32>
    %531 = arith.divf %529, %530 : vector<4x16xf32>
    %532 = vector.extract_strided_slice %531 {offsets = [0, 0], sizes = [4, 8], strides = [1, 1]} : vector<4x16xf32> to vector<4x8xf32>
    %533 = vector.extract_strided_slice %531 {offsets = [0, 8], sizes = [4, 8], strides = [1, 1]} : vector<4x16xf32> to vector<4x8xf32>
    %534 = vector.extract_strided_slice %523 {offsets = [0, 16], sizes = [4, 8], strides = [1, 1]} : vector<4x24xf32> to vector<4x8xf32>
    %535 = vector.extract_strided_slice %518 {offsets = [0, 16], sizes = [4, 8], strides = [1, 1]} : vector<4x24xf32> to vector<4x8xf32>
    %536 = arith.mulf %532, %535 : vector<4x8xf32>
    %537 = arith.addf %534, %536 : vector<4x8xf32>
    %538 = math.tanh %537 : vector<4x8xf32>
    %cst_171 = arith.constant 1.000000e+00 : f32
    %539 = vector.broadcast %cst_171 : f32 to vector<4x8xf32>
    %540 = arith.subf %539, %533 : vector<4x8xf32>
    %541 = arith.mulf %540, %538 : vector<4x8xf32>
    %542 = arith.mulf %533, %505 : vector<4x8xf32>
    %543 = arith.addf %541, %542 : vector<4x8xf32>
    %544 = vector.extract_strided_slice %543 {offsets = [0, 0], sizes = [2, 8], strides = [1, 1]} : vector<4x8xf32> to vector<2x8xf32>
    %c3_172 = arith.constant 3 : index
    %c0_173 = arith.constant 0 : index
    %c0_174 = arith.constant 0 : index
    %545 = vector.load %arg34[%c3_172, %c0_173, %c0_174] : memref<8x2x8xf32, #tpu.memory_space<vmem>>, vector<1x2x8xf32>
    %546 = vector.shape_cast %545 : vector<1x2x8xf32> to vector<2x8xf32>
    %547 = vector.shape_cast %544 : vector<2x8xf32> to vector<1x2x8xf32>
    tpu.vector_store %arg34[%c3_172, %c0_173, %c0_174], %547 {strides = array<i32>} : memref<8x2x8xf32, #tpu.memory_space<vmem>>, vector<1x2x8xf32>,
    %548 = vector.extract_strided_slice %543 {offsets = [2, 0], sizes = [2, 8], strides = [1, 1]} : vector<4x8xf32> to vector<2x8xf32>
    %c4_175 = arith.constant 4 : index
    %c0_176 = arith.constant 0 : index
    %c0_177 = arith.constant 0 : index
    %549 = vector.load %arg35[%c4_175, %c0_176, %c0_177] : memref<8x2x8xf32, #tpu.memory_space<vmem>>, vector<1x2x8xf32>
    %550 = vector.shape_cast %549 : vector<1x2x8xf32> to vector<2x8xf32>
    %551 = vector.shape_cast %548 : vector<2x8xf32> to vector<1x2x8xf32>
    tpu.vector_store %arg35[%c4_175, %c0_176, %c0_177], %551 {strides = array<i32>} : memref<8x2x8xf32, #tpu.memory_space<vmem>>, vector<1x2x8xf32>,
    %cst_178 = arith.constant dense<0.000000e+00> : vector<4x48xf32>
    %552 = tpu.matmul %543, %14, %cst_178 {dimension_numbers = #tpu.dot_dimension_numbers<[1], [0], [0], [1], [0, 0, 1, 1], [], []>} : vector<4x8xf32>, vector<8x48xf32>, vector<4x48xf32> -> vector<4x48xf32>
    %553 = vector.extract_strided_slice %552 {offsets = [0, 0], sizes = [4, 24], strides = [1, 1]} : vector<4x48xf32> to vector<4x24xf32>
    %554 = vector.extract_strided_slice %552 {offsets = [0, 24], sizes = [4, 24], strides = [1, 1]} : vector<4x48xf32> to vector<4x24xf32>
    %555 = arith.select %398, %553, %554 : vector<4x24xi1>, vector<4x24xf32>
    %556 = arith.addf %555, %395 : vector<4x24xf32>
    %557 = vector.extract_strided_slice %389 {offsets = [4, 0, 0], sizes = [1, 2, 24], strides = [1, 1, 1]} : vector<8x2x24xf32> to vector<1x2x24xf32>
    %558 = vector.shape_cast %557 : vector<1x2x24xf32> to vector<2x24xf32>
    %559 = vector.extract_strided_slice %390 {offsets = [3, 0, 0], sizes = [1, 2, 24], strides = [1, 1, 1]} : vector<8x2x24xf32> to vector<1x2x24xf32>
    %560 = vector.shape_cast %559 : vector<1x2x24xf32> to vector<2x24xf32>
    %561 = tpu.concatenate %558, %560 in 0 : vector<2x24xf32>, vector<2x24xf32> -> vector<4x24xf32>
    %562 = vector.extract_strided_slice %561 {offsets = [0, 0], sizes = [4, 16], strides = [1, 1]} : vector<4x24xf32> to vector<4x16xf32>
    %563 = vector.extract_strided_slice %556 {offsets = [0, 0], sizes = [4, 16], strides = [1, 1]} : vector<4x24xf32> to vector<4x16xf32>
    %564 = arith.addf %562, %563 : vector<4x16xf32>
    %565 = arith.negf %564 : vector<4x16xf32>
    %566 = math.exp %565 : vector<4x16xf32>
    %cst_179 = arith.constant 1.000000e+00 : f32
    %567 = vector.broadcast %cst_179 : f32 to vector<4x16xf32>
    %568 = arith.addf %567, %566 : vector<4x16xf32>
    %569 = arith.divf %567, %568 : vector<4x16xf32>
    %570 = vector.extract_strided_slice %569 {offsets = [0, 0], sizes = [4, 8], strides = [1, 1]} : vector<4x16xf32> to vector<4x8xf32>
    %571 = vector.extract_strided_slice %569 {offsets = [0, 8], sizes = [4, 8], strides = [1, 1]} : vector<4x16xf32> to vector<4x8xf32>
    %572 = vector.extract_strided_slice %561 {offsets = [0, 16], sizes = [4, 8], strides = [1, 1]} : vector<4x24xf32> to vector<4x8xf32>
    %573 = vector.extract_strided_slice %556 {offsets = [0, 16], sizes = [4, 8], strides = [1, 1]} : vector<4x24xf32> to vector<4x8xf32>
    %574 = arith.mulf %570, %573 : vector<4x8xf32>
    %575 = arith.addf %572, %574 : vector<4x8xf32>
    %576 = math.tanh %575 : vector<4x8xf32>
    %cst_180 = arith.constant 1.000000e+00 : f32
    %577 = vector.broadcast %cst_180 : f32 to vector<4x8xf32>
    %578 = arith.subf %577, %571 : vector<4x8xf32>
    %579 = arith.mulf %578, %576 : vector<4x8xf32>
    %580 = arith.mulf %571, %543 : vector<4x8xf32>
    %581 = arith.addf %579, %580 : vector<4x8xf32>
    %582 = vector.extract_strided_slice %581 {offsets = [0, 0], sizes = [2, 8], strides = [1, 1]} : vector<4x8xf32> to vector<2x8xf32>
    %c4_181 = arith.constant 4 : index
    %c0_182 = arith.constant 0 : index
    %c0_183 = arith.constant 0 : index
    %583 = vector.load %arg34[%c4_181, %c0_182, %c0_183] : memref<8x2x8xf32, #tpu.memory_space<vmem>>, vector<1x2x8xf32>
    %584 = vector.shape_cast %583 : vector<1x2x8xf32> to vector<2x8xf32>
    %585 = vector.shape_cast %582 : vector<2x8xf32> to vector<1x2x8xf32>
    tpu.vector_store %arg34[%c4_181, %c0_182, %c0_183], %585 {strides = array<i32>} : memref<8x2x8xf32, #tpu.memory_space<vmem>>, vector<1x2x8xf32>,
    %586 = vector.extract_strided_slice %581 {offsets = [2, 0], sizes = [2, 8], strides = [1, 1]} : vector<4x8xf32> to vector<2x8xf32>
    %c3_184 = arith.constant 3 : index
    %c0_185 = arith.constant 0 : index
    %c0_186 = arith.constant 0 : index
    %587 = vector.load %arg35[%c3_184, %c0_185, %c0_186] : memref<8x2x8xf32, #tpu.memory_space<vmem>>, vector<1x2x8xf32>
    %588 = vector.shape_cast %587 : vector<1x2x8xf32> to vector<2x8xf32>
    %589 = vector.shape_cast %586 : vector<2x8xf32> to vector<1x2x8xf32>
    tpu.vector_store %arg35[%c3_184, %c0_185, %c0_186], %589 {strides = array<i32>} : memref<8x2x8xf32, #tpu.memory_space<vmem>>, vector<1x2x8xf32>,
    %cst_187 = arith.constant dense<0.000000e+00> : vector<4x48xf32>
    %590 = tpu.matmul %581, %14, %cst_187 {dimension_numbers = #tpu.dot_dimension_numbers<[1], [0], [0], [1], [0, 0, 1, 1], [], []>} : vector<4x8xf32>, vector<8x48xf32>, vector<4x48xf32> -> vector<4x48xf32>
    %591 = vector.extract_strided_slice %590 {offsets = [0, 0], sizes = [4, 24], strides = [1, 1]} : vector<4x48xf32> to vector<4x24xf32>
    %592 = vector.extract_strided_slice %590 {offsets = [0, 24], sizes = [4, 24], strides = [1, 1]} : vector<4x48xf32> to vector<4x24xf32>
    %593 = arith.select %398, %591, %592 : vector<4x24xi1>, vector<4x24xf32>
    %594 = arith.addf %593, %395 : vector<4x24xf32>
    %595 = vector.extract_strided_slice %389 {offsets = [5, 0, 0], sizes = [1, 2, 24], strides = [1, 1, 1]} : vector<8x2x24xf32> to vector<1x2x24xf32>
    %596 = vector.shape_cast %595 : vector<1x2x24xf32> to vector<2x24xf32>
    %597 = vector.extract_strided_slice %390 {offsets = [2, 0, 0], sizes = [1, 2, 24], strides = [1, 1, 1]} : vector<8x2x24xf32> to vector<1x2x24xf32>
    %598 = vector.shape_cast %597 : vector<1x2x24xf32> to vector<2x24xf32>
    %599 = tpu.concatenate %596, %598 in 0 : vector<2x24xf32>, vector<2x24xf32> -> vector<4x24xf32>
    %600 = vector.extract_strided_slice %599 {offsets = [0, 0], sizes = [4, 16], strides = [1, 1]} : vector<4x24xf32> to vector<4x16xf32>
    %601 = vector.extract_strided_slice %594 {offsets = [0, 0], sizes = [4, 16], strides = [1, 1]} : vector<4x24xf32> to vector<4x16xf32>
    %602 = arith.addf %600, %601 : vector<4x16xf32>
    %603 = arith.negf %602 : vector<4x16xf32>
    %604 = math.exp %603 : vector<4x16xf32>
    %cst_188 = arith.constant 1.000000e+00 : f32
    %605 = vector.broadcast %cst_188 : f32 to vector<4x16xf32>
    %606 = arith.addf %605, %604 : vector<4x16xf32>
    %607 = arith.divf %605, %606 : vector<4x16xf32>
    %608 = vector.extract_strided_slice %607 {offsets = [0, 0], sizes = [4, 8], strides = [1, 1]} : vector<4x16xf32> to vector<4x8xf32>
    %609 = vector.extract_strided_slice %607 {offsets = [0, 8], sizes = [4, 8], strides = [1, 1]} : vector<4x16xf32> to vector<4x8xf32>
    %610 = vector.extract_strided_slice %599 {offsets = [0, 16], sizes = [4, 8], strides = [1, 1]} : vector<4x24xf32> to vector<4x8xf32>
    %611 = vector.extract_strided_slice %594 {offsets = [0, 16], sizes = [4, 8], strides = [1, 1]} : vector<4x24xf32> to vector<4x8xf32>
    %612 = arith.mulf %608, %611 : vector<4x8xf32>
    %613 = arith.addf %610, %612 : vector<4x8xf32>
    %614 = math.tanh %613 : vector<4x8xf32>
    %cst_189 = arith.constant 1.000000e+00 : f32
    %615 = vector.broadcast %cst_189 : f32 to vector<4x8xf32>
    %616 = arith.subf %615, %609 : vector<4x8xf32>
    %617 = arith.mulf %616, %614 : vector<4x8xf32>
    %618 = arith.mulf %609, %581 : vector<4x8xf32>
    %619 = arith.addf %617, %618 : vector<4x8xf32>
    %620 = vector.extract_strided_slice %619 {offsets = [0, 0], sizes = [2, 8], strides = [1, 1]} : vector<4x8xf32> to vector<2x8xf32>
    %c5_190 = arith.constant 5 : index
    %c0_191 = arith.constant 0 : index
    %c0_192 = arith.constant 0 : index
    %621 = vector.load %arg34[%c5_190, %c0_191, %c0_192] : memref<8x2x8xf32, #tpu.memory_space<vmem>>, vector<1x2x8xf32>
    %622 = vector.shape_cast %621 : vector<1x2x8xf32> to vector<2x8xf32>
    %623 = vector.shape_cast %620 : vector<2x8xf32> to vector<1x2x8xf32>
    tpu.vector_store %arg34[%c5_190, %c0_191, %c0_192], %623 {strides = array<i32>} : memref<8x2x8xf32, #tpu.memory_space<vmem>>, vector<1x2x8xf32>,
    %624 = vector.extract_strided_slice %619 {offsets = [2, 0], sizes = [2, 8], strides = [1, 1]} : vector<4x8xf32> to vector<2x8xf32>
    %c2_193 = arith.constant 2 : index
    %c0_194 = arith.constant 0 : index
    %c0_195 = arith.constant 0 : index
    %625 = vector.load %arg35[%c2_193, %c0_194, %c0_195] : memref<8x2x8xf32, #tpu.memory_space<vmem>>, vector<1x2x8xf32>
    %626 = vector.shape_cast %625 : vector<1x2x8xf32> to vector<2x8xf32>
    %627 = vector.shape_cast %624 : vector<2x8xf32> to vector<1x2x8xf32>
    tpu.vector_store %arg35[%c2_193, %c0_194, %c0_195], %627 {strides = array<i32>} : memref<8x2x8xf32, #tpu.memory_space<vmem>>, vector<1x2x8xf32>,
    %cst_196 = arith.constant dense<0.000000e+00> : vector<4x48xf32>
    %628 = tpu.matmul %619, %14, %cst_196 {dimension_numbers = #tpu.dot_dimension_numbers<[1], [0], [0], [1], [0, 0, 1, 1], [], []>} : vector<4x8xf32>, vector<8x48xf32>, vector<4x48xf32> -> vector<4x48xf32>
    %629 = vector.extract_strided_slice %628 {offsets = [0, 0], sizes = [4, 24], strides = [1, 1]} : vector<4x48xf32> to vector<4x24xf32>
    %630 = vector.extract_strided_slice %628 {offsets = [0, 24], sizes = [4, 24], strides = [1, 1]} : vector<4x48xf32> to vector<4x24xf32>
    %631 = arith.select %398, %629, %630 : vector<4x24xi1>, vector<4x24xf32>
    %632 = arith.addf %631, %395 : vector<4x24xf32>
    %633 = vector.extract_strided_slice %389 {offsets = [6, 0, 0], sizes = [1, 2, 24], strides = [1, 1, 1]} : vector<8x2x24xf32> to vector<1x2x24xf32>
    %634 = vector.shape_cast %633 : vector<1x2x24xf32> to vector<2x24xf32>
    %635 = vector.extract_strided_slice %390 {offsets = [1, 0, 0], sizes = [1, 2, 24], strides = [1, 1, 1]} : vector<8x2x24xf32> to vector<1x2x24xf32>
    %636 = vector.shape_cast %635 : vector<1x2x24xf32> to vector<2x24xf32>
    %637 = tpu.concatenate %634, %636 in 0 : vector<2x24xf32>, vector<2x24xf32> -> vector<4x24xf32>
    %638 = vector.extract_strided_slice %637 {offsets = [0, 0], sizes = [4, 16], strides = [1, 1]} : vector<4x24xf32> to vector<4x16xf32>
    %639 = vector.extract_strided_slice %632 {offsets = [0, 0], sizes = [4, 16], strides = [1, 1]} : vector<4x24xf32> to vector<4x16xf32>
    %640 = arith.addf %638, %639 : vector<4x16xf32>
    %641 = arith.negf %640 : vector<4x16xf32>
    %642 = math.exp %641 : vector<4x16xf32>
    %cst_197 = arith.constant 1.000000e+00 : f32
    %643 = vector.broadcast %cst_197 : f32 to vector<4x16xf32>
    %644 = arith.addf %643, %642 : vector<4x16xf32>
    %645 = arith.divf %643, %644 : vector<4x16xf32>
    %646 = vector.extract_strided_slice %645 {offsets = [0, 0], sizes = [4, 8], strides = [1, 1]} : vector<4x16xf32> to vector<4x8xf32>
    %647 = vector.extract_strided_slice %645 {offsets = [0, 8], sizes = [4, 8], strides = [1, 1]} : vector<4x16xf32> to vector<4x8xf32>
    %648 = vector.extract_strided_slice %637 {offsets = [0, 16], sizes = [4, 8], strides = [1, 1]} : vector<4x24xf32> to vector<4x8xf32>
    %649 = vector.extract_strided_slice %632 {offsets = [0, 16], sizes = [4, 8], strides = [1, 1]} : vector<4x24xf32> to vector<4x8xf32>
    %650 = arith.mulf %646, %649 : vector<4x8xf32>
    %651 = arith.addf %648, %650 : vector<4x8xf32>
    %652 = math.tanh %651 : vector<4x8xf32>
    %cst_198 = arith.constant 1.000000e+00 : f32
    %653 = vector.broadcast %cst_198 : f32 to vector<4x8xf32>
    %654 = arith.subf %653, %647 : vector<4x8xf32>
    %655 = arith.mulf %654, %652 : vector<4x8xf32>
    %656 = arith.mulf %647, %619 : vector<4x8xf32>
    %657 = arith.addf %655, %656 : vector<4x8xf32>
    %658 = vector.extract_strided_slice %657 {offsets = [0, 0], sizes = [2, 8], strides = [1, 1]} : vector<4x8xf32> to vector<2x8xf32>
    %c6_199 = arith.constant 6 : index
    %c0_200 = arith.constant 0 : index
    %c0_201 = arith.constant 0 : index
    %659 = vector.load %arg34[%c6_199, %c0_200, %c0_201] : memref<8x2x8xf32, #tpu.memory_space<vmem>>, vector<1x2x8xf32>
    %660 = vector.shape_cast %659 : vector<1x2x8xf32> to vector<2x8xf32>
    %661 = vector.shape_cast %658 : vector<2x8xf32> to vector<1x2x8xf32>
    tpu.vector_store %arg34[%c6_199, %c0_200, %c0_201], %661 {strides = array<i32>} : memref<8x2x8xf32, #tpu.memory_space<vmem>>, vector<1x2x8xf32>,
    %662 = vector.extract_strided_slice %657 {offsets = [2, 0], sizes = [2, 8], strides = [1, 1]} : vector<4x8xf32> to vector<2x8xf32>
    %c1_202 = arith.constant 1 : index
    %c0_203 = arith.constant 0 : index
    %c0_204 = arith.constant 0 : index
    %663 = vector.load %arg35[%c1_202, %c0_203, %c0_204] : memref<8x2x8xf32, #tpu.memory_space<vmem>>, vector<1x2x8xf32>
    %664 = vector.shape_cast %663 : vector<1x2x8xf32> to vector<2x8xf32>
    %665 = vector.shape_cast %662 : vector<2x8xf32> to vector<1x2x8xf32>
    tpu.vector_store %arg35[%c1_202, %c0_203, %c0_204], %665 {strides = array<i32>} : memref<8x2x8xf32, #tpu.memory_space<vmem>>, vector<1x2x8xf32>,
    %cst_205 = arith.constant dense<0.000000e+00> : vector<4x48xf32>
    %666 = tpu.matmul %657, %14, %cst_205 {dimension_numbers = #tpu.dot_dimension_numbers<[1], [0], [0], [1], [0, 0, 1, 1], [], []>} : vector<4x8xf32>, vector<8x48xf32>, vector<4x48xf32> -> vector<4x48xf32>
    %667 = vector.extract_strided_slice %666 {offsets = [0, 0], sizes = [4, 24], strides = [1, 1]} : vector<4x48xf32> to vector<4x24xf32>
    %668 = vector.extract_strided_slice %666 {offsets = [0, 24], sizes = [4, 24], strides = [1, 1]} : vector<4x48xf32> to vector<4x24xf32>
    %669 = arith.select %398, %667, %668 : vector<4x24xi1>, vector<4x24xf32>
    %670 = arith.addf %669, %395 : vector<4x24xf32>
    %671 = vector.extract_strided_slice %389 {offsets = [7, 0, 0], sizes = [1, 2, 24], strides = [1, 1, 1]} : vector<8x2x24xf32> to vector<1x2x24xf32>
    %672 = vector.shape_cast %671 : vector<1x2x24xf32> to vector<2x24xf32>
    %673 = vector.extract_strided_slice %390 {offsets = [0, 0, 0], sizes = [1, 2, 24], strides = [1, 1, 1]} : vector<8x2x24xf32> to vector<1x2x24xf32>
    %674 = vector.shape_cast %673 : vector<1x2x24xf32> to vector<2x24xf32>
    %675 = tpu.concatenate %672, %674 in 0 : vector<2x24xf32>, vector<2x24xf32> -> vector<4x24xf32>
    %676 = vector.extract_strided_slice %675 {offsets = [0, 0], sizes = [4, 16], strides = [1, 1]} : vector<4x24xf32> to vector<4x16xf32>
    %677 = vector.extract_strided_slice %670 {offsets = [0, 0], sizes = [4, 16], strides = [1, 1]} : vector<4x24xf32> to vector<4x16xf32>
    %678 = arith.addf %676, %677 : vector<4x16xf32>
    %679 = arith.negf %678 : vector<4x16xf32>
    %680 = math.exp %679 : vector<4x16xf32>
    %cst_206 = arith.constant 1.000000e+00 : f32
    %681 = vector.broadcast %cst_206 : f32 to vector<4x16xf32>
    %682 = arith.addf %681, %680 : vector<4x16xf32>
    %683 = arith.divf %681, %682 : vector<4x16xf32>
    %684 = vector.extract_strided_slice %683 {offsets = [0, 0], sizes = [4, 8], strides = [1, 1]} : vector<4x16xf32> to vector<4x8xf32>
    %685 = vector.extract_strided_slice %683 {offsets = [0, 8], sizes = [4, 8], strides = [1, 1]} : vector<4x16xf32> to vector<4x8xf32>
    %686 = vector.extract_strided_slice %675 {offsets = [0, 16], sizes = [4, 8], strides = [1, 1]} : vector<4x24xf32> to vector<4x8xf32>
    %687 = vector.extract_strided_slice %670 {offsets = [0, 16], sizes = [4, 8], strides = [1, 1]} : vector<4x24xf32> to vector<4x8xf32>
    %688 = arith.mulf %684, %687 : vector<4x8xf32>
    %689 = arith.addf %686, %688 : vector<4x8xf32>
    %690 = math.tanh %689 : vector<4x8xf32>
    %cst_207 = arith.constant 1.000000e+00 : f32
    %691 = vector.broadcast %cst_207 : f32 to vector<4x8xf32>
    %692 = arith.subf %691, %685 : vector<4x8xf32>
    %693 = arith.mulf %692, %690 : vector<4x8xf32>
    %694 = arith.mulf %685, %657 : vector<4x8xf32>
    %695 = arith.addf %693, %694 : vector<4x8xf32>
    %696 = vector.extract_strided_slice %695 {offsets = [0, 0], sizes = [2, 8], strides = [1, 1]} : vector<4x8xf32> to vector<2x8xf32>
    %c7_208 = arith.constant 7 : index
    %c0_209 = arith.constant 0 : index
    %c0_210 = arith.constant 0 : index
    %697 = vector.load %arg34[%c7_208, %c0_209, %c0_210] : memref<8x2x8xf32, #tpu.memory_space<vmem>>, vector<1x2x8xf32>
    %698 = vector.shape_cast %697 : vector<1x2x8xf32> to vector<2x8xf32>
    %699 = vector.shape_cast %696 : vector<2x8xf32> to vector<1x2x8xf32>
    tpu.vector_store %arg34[%c7_208, %c0_209, %c0_210], %699 {strides = array<i32>} : memref<8x2x8xf32, #tpu.memory_space<vmem>>, vector<1x2x8xf32>,
    %700 = vector.extract_strided_slice %695 {offsets = [2, 0], sizes = [2, 8], strides = [1, 1]} : vector<4x8xf32> to vector<2x8xf32>
    %c0_211 = arith.constant 0 : index
    %c0_212 = arith.constant 0 : index
    %c0_213 = arith.constant 0 : index
    %701 = vector.load %arg35[%c0_211, %c0_212, %c0_213] : memref<8x2x8xf32, #tpu.memory_space<vmem>>, vector<1x2x8xf32>
    %702 = vector.shape_cast %701 : vector<1x2x8xf32> to vector<2x8xf32>
    %703 = vector.shape_cast %700 : vector<2x8xf32> to vector<1x2x8xf32>
    tpu.vector_store %arg35[%c0_211, %c0_212, %c0_213], %703 {strides = array<i32>} : memref<8x2x8xf32, #tpu.memory_space<vmem>>, vector<1x2x8xf32>,
    %704 = vector.extract_strided_slice %695 {offsets = [2, 0], sizes = [2, 8], strides = [1, 1]} : vector<4x8xf32> to vector<2x8xf32>
    %c0_214 = arith.constant 0 : index
    %c0_215 = arith.constant 0 : index
    %c0_216 = arith.constant 0 : index
    %705 = vector.load %arg34[%c0_214, %c0_215, %c0_216] : memref<8x2x8xf32, #tpu.memory_space<vmem>>, vector<8x2x8xf32>
    %c0_217 = arith.constant 0 : index
    %c0_218 = arith.constant 0 : index
    %c0_219 = arith.constant 0 : index
    %706 = vector.load %arg35[%c0_217, %c0_218, %c0_219] : memref<8x2x8xf32, #tpu.memory_space<vmem>>, vector<8x2x8xf32>
    %cst_220 = arith.constant dense<0.000000e+00> : vector<2x16xf32>
    %707 = tpu.matmul %704, %17, %cst_220 {dimension_numbers = #tpu.dot_dimension_numbers<[1], [0], [0], [1], [0, 0, 1, 1], [], []>} : vector<2x8xf32>, vector<8x16xf32>, vector<2x16xf32> -> vector<2x16xf32>
    %708 = vector.broadcast %19 : vector<1x16xf32> to vector<2x16xf32>
    %709 = arith.addf %707, %708 : vector<2x16xf32>
    %710 = vector.shape_cast %705 : vector<8x2x8xf32> to vector<16x8xf32>
    %711 = vector.extract_strided_slice %18 {offsets = [0, 0], sizes = [8, 16], strides = [1, 1]} : vector<16x16xf32> to vector<8x16xf32>
    %cst_221 = arith.constant dense<0.000000e+00> : vector<16x16xf32>
    %712 = tpu.matmul %710, %711, %cst_221 {dimension_numbers = #tpu.dot_dimension_numbers<[1], [0], [0], [1], [0, 0, 1, 1], [], []>} : vector<16x8xf32>, vector<8x16xf32>, vector<16x16xf32> -> vector<16x16xf32>
    %713 = vector.shape_cast %706 : vector<8x2x8xf32> to vector<16x8xf32>
    %714 = vector.extract_strided_slice %18 {offsets = [8, 0], sizes = [8, 16], strides = [1, 1]} : vector<16x16xf32> to vector<8x16xf32>
    %cst_222 = arith.constant dense<0.000000e+00> : vector<16x16xf32>
    %715 = tpu.matmul %713, %714, %cst_222 {dimension_numbers = #tpu.dot_dimension_numbers<[1], [0], [0], [1], [0, 0, 1, 1], [], []>} : vector<16x8xf32>, vector<8x16xf32>, vector<16x16xf32> -> vector<16x16xf32>
    %716 = arith.addf %712, %715 : vector<16x16xf32>
    %717 = vector.shape_cast %716 : vector<16x16xf32> to vector<8x2x16xf32>
    %718 = vector.shape_cast %709 : vector<2x16xf32> to vector<1x2x16xf32>
    %719 = vector.broadcast %718 : vector<1x2x16xf32> to vector<8x2x16xf32>
    %720 = arith.addf %719, %717 : vector<8x2x16xf32>
    %721 = math.tanh %720 : vector<8x2x16xf32>
    %722 = vector.shape_cast %20 : vector<1x16xf32> to vector<1x1x16xf32>
    %723 = vector.broadcast %722 : vector<1x1x16xf32> to vector<8x2x16xf32>
    %724 = arith.mulf %721, %723 : vector<8x2x16xf32>
    %cst_223 = arith.constant dense<0.000000e+00> : vector<8x2xf32>
    %725 = vector.multi_reduction <add>, %724, %cst_223 [2] : vector<8x2x16xf32> to vector<8x2xf32>
    %726 = vector.shape_cast %725 : vector<8x2xf32> to vector<8x2x1xf32>
    %cst_224 = arith.constant dense<0xFF800000> : vector<2x1xf32>
    %727 = vector.multi_reduction <maximumf>, %726, %cst_224 [0] : vector<8x2x1xf32> to vector<2x1xf32>
    %728 = vector.shape_cast %727 : vector<2x1xf32> to vector<1x2x1xf32>
    %729 = vector.broadcast %728 : vector<1x2x1xf32> to vector<8x2x1xf32>
    %730 = arith.subf %726, %729 : vector<8x2x1xf32>
    %731 = math.exp %730 : vector<8x2x1xf32>
    %cst_225 = arith.constant dense<0.000000e+00> : vector<2x1xf32>
    %732 = vector.multi_reduction <add>, %731, %cst_225 [0] : vector<8x2x1xf32> to vector<2x1xf32>
    %733 = vector.shape_cast %732 : vector<2x1xf32> to vector<1x2x1xf32>
    %734 = tpu.reciprocal %733 {approx = true} : vector<1x2x1xf32> -> vector<1x2x1xf32>
    %735 = vector.broadcast %734 : vector<1x2x1xf32> to vector<8x2x1xf32>
    %736 = arith.mulf %731, %735 : vector<8x2x1xf32>
    %737 = vector.broadcast %736 : vector<8x2x1xf32> to vector<8x2x8xf32>
    %738 = arith.mulf %705, %737 : vector<8x2x8xf32>
    %cst_226 = arith.constant dense<0.000000e+00> : vector<2x8xf32>
    %739 = vector.multi_reduction <add>, %738, %cst_226 [0] : vector<8x2x8xf32> to vector<2x8xf32>
    %740 = vector.broadcast %736 : vector<8x2x1xf32> to vector<8x2x8xf32>
    %741 = arith.mulf %706, %740 : vector<8x2x8xf32>
    %cst_227 = arith.constant dense<0.000000e+00> : vector<2x8xf32>
    %742 = vector.multi_reduction <add>, %741, %cst_227 [0] : vector<8x2x8xf32> to vector<2x8xf32>
    %743 = tpu.concatenate %739, %742 in 1 : vector<2x8xf32>, vector<2x8xf32> -> vector<2x16xf32>
    %cst_228 = arith.constant dense<0.000000e+00> : vector<2x3xf32>
    %744 = tpu.matmul %743, %21, %cst_228 {dimension_numbers = #tpu.dot_dimension_numbers<[1], [0], [0], [1], [0, 0, 1, 1], [], []>} : vector<2x16xf32>, vector<16x3xf32>, vector<2x3xf32> -> vector<2x3xf32>
    %745 = vector.broadcast %22 : vector<1x3xf32> to vector<2x3xf32>
    %746 = arith.addf %744, %745 : vector<2x3xf32>
    %c0_229 = arith.constant 0 : index
    %c0_230 = arith.constant 0 : index
    %747 = vector.load %arg30[%c0_229, %c0_230] : memref<2x3xf32, #tpu.memory_space<vmem>>, vector<2x3xf32>
    tpu.vector_store %arg30[%c0_229, %c0_230], %746 {strides = array<i32>} : memref<2x3xf32, #tpu.memory_space<vmem>>, vector<2x3xf32>,
    %cst_231 = arith.constant dense<0.000000e+00> : vector<2x384xf32>
    %748 = tpu.matmul %743, %23, %cst_231 {dimension_numbers = #tpu.dot_dimension_numbers<[1], [0], [0], [1], [0, 0, 1, 1], [], []>} : vector<2x16xf32>, vector<16x384xf32>, vector<2x384xf32> -> vector<2x384xf32>
    %749 = vector.broadcast %24 : vector<1x384xf32> to vector<2x384xf32>
    %750 = arith.addf %748, %749 : vector<2x384xf32>
    %cst_232 = arith.constant 0.000000e+00 : f32
    %751 = vector.broadcast %cst_232 : f32 to vector<2x16xf32>
    %cst_233 = arith.constant dense<0.000000e+00> : vector<2x48xf32>
    %752 = tpu.matmul %751, %25, %cst_233 {dimension_numbers = #tpu.dot_dimension_numbers<[1], [0], [0], [1], [0, 0, 1, 1], [], []>} : vector<2x16xf32>, vector<16x48xf32>, vector<2x48xf32> -> vector<2x48xf32>
    %753 = vector.broadcast %26 : vector<1x48xf32> to vector<2x48xf32>
    %754 = arith.addf %752, %753 : vector<2x48xf32>
    %755 = vector.extract_strided_slice %750 {offsets = [0, 0], sizes = [2, 48], strides = [1, 1]} : vector<2x384xf32> to vector<2x48xf32>
    %756 = vector.extract_strided_slice %755 {offsets = [0, 0], sizes = [2, 32], strides = [1, 1]} : vector<2x48xf32> to vector<2x32xf32>
    %757 = vector.extract_strided_slice %754 {offsets = [0, 0], sizes = [2, 32], strides = [1, 1]} : vector<2x48xf32> to vector<2x32xf32>
    %758 = arith.addf %756, %757 : vector<2x32xf32>
    %759 = arith.negf %758 : vector<2x32xf32>
    %760 = math.exp %759 : vector<2x32xf32>
    %cst_234 = arith.constant 1.000000e+00 : f32
    %761 = vector.broadcast %cst_234 : f32 to vector<2x32xf32>
    %762 = arith.addf %761, %760 : vector<2x32xf32>
    %763 = arith.divf %761, %762 : vector<2x32xf32>
    %764 = vector.extract_strided_slice %763 {offsets = [0, 0], sizes = [2, 16], strides = [1, 1]} : vector<2x32xf32> to vector<2x16xf32>
    %765 = vector.extract_strided_slice %763 {offsets = [0, 16], sizes = [2, 16], strides = [1, 1]} : vector<2x32xf32> to vector<2x16xf32>
    %766 = vector.extract_strided_slice %755 {offsets = [0, 32], sizes = [2, 16], strides = [1, 1]} : vector<2x48xf32> to vector<2x16xf32>
    %767 = vector.extract_strided_slice %754 {offsets = [0, 32], sizes = [2, 16], strides = [1, 1]} : vector<2x48xf32> to vector<2x16xf32>
    %768 = arith.mulf %764, %767 : vector<2x16xf32>
    %769 = arith.addf %766, %768 : vector<2x16xf32>
    %770 = math.tanh %769 : vector<2x16xf32>
    %cst_235 = arith.constant 1.000000e+00 : f32
    %771 = vector.broadcast %cst_235 : f32 to vector<2x16xf32>
    %772 = arith.subf %771, %765 : vector<2x16xf32>
    %773 = arith.mulf %772, %770 : vector<2x16xf32>
    %774 = arith.mulf %765, %751 : vector<2x16xf32>
    %775 = arith.addf %773, %774 : vector<2x16xf32>
    %c0_236 = arith.constant 0 : index
    %c0_237 = arith.constant 0 : index
    %c0_238 = arith.constant 0 : index
    %776 = vector.load %arg36[%c0_236, %c0_237, %c0_238] : memref<8x2x16xf32, #tpu.memory_space<vmem>>, vector<1x2x16xf32>
    %777 = vector.shape_cast %776 : vector<1x2x16xf32> to vector<2x16xf32>
    %778 = vector.shape_cast %775 : vector<2x16xf32> to vector<1x2x16xf32>
    tpu.vector_store %arg36[%c0_236, %c0_237, %c0_238], %778 {strides = array<i32>} : memref<8x2x16xf32, #tpu.memory_space<vmem>>, vector<1x2x16xf32>,
    %cst_239 = arith.constant dense<0.000000e+00> : vector<2x48xf32>
    %779 = tpu.matmul %775, %25, %cst_239 {dimension_numbers = #tpu.dot_dimension_numbers<[1], [0], [0], [1], [0, 0, 1, 1], [], []>} : vector<2x16xf32>, vector<16x48xf32>, vector<2x48xf32> -> vector<2x48xf32>
    %780 = vector.broadcast %26 : vector<1x48xf32> to vector<2x48xf32>
    %781 = arith.addf %779, %780 : vector<2x48xf32>
    %782 = vector.extract_strided_slice %750 {offsets = [0, 48], sizes = [2, 48], strides = [1, 1]} : vector<2x384xf32> to vector<2x48xf32>
    %783 = vector.extract_strided_slice %782 {offsets = [0, 0], sizes = [2, 32], strides = [1, 1]} : vector<2x48xf32> to vector<2x32xf32>
    %784 = vector.extract_strided_slice %781 {offsets = [0, 0], sizes = [2, 32], strides = [1, 1]} : vector<2x48xf32> to vector<2x32xf32>
    %785 = arith.addf %783, %784 : vector<2x32xf32>
    %786 = arith.negf %785 : vector<2x32xf32>
    %787 = math.exp %786 : vector<2x32xf32>
    %cst_240 = arith.constant 1.000000e+00 : f32
    %788 = vector.broadcast %cst_240 : f32 to vector<2x32xf32>
    %789 = arith.addf %788, %787 : vector<2x32xf32>
    %790 = arith.divf %788, %789 : vector<2x32xf32>
    %791 = vector.extract_strided_slice %790 {offsets = [0, 0], sizes = [2, 16], strides = [1, 1]} : vector<2x32xf32> to vector<2x16xf32>
    %792 = vector.extract_strided_slice %790 {offsets = [0, 16], sizes = [2, 16], strides = [1, 1]} : vector<2x32xf32> to vector<2x16xf32>
    %793 = vector.extract_strided_slice %782 {offsets = [0, 32], sizes = [2, 16], strides = [1, 1]} : vector<2x48xf32> to vector<2x16xf32>
    %794 = vector.extract_strided_slice %781 {offsets = [0, 32], sizes = [2, 16], strides = [1, 1]} : vector<2x48xf32> to vector<2x16xf32>
    %795 = arith.mulf %791, %794 : vector<2x16xf32>
    %796 = arith.addf %793, %795 : vector<2x16xf32>
    %797 = math.tanh %796 : vector<2x16xf32>
    %cst_241 = arith.constant 1.000000e+00 : f32
    %798 = vector.broadcast %cst_241 : f32 to vector<2x16xf32>
    %799 = arith.subf %798, %792 : vector<2x16xf32>
    %800 = arith.mulf %799, %797 : vector<2x16xf32>
    %801 = arith.mulf %792, %775 : vector<2x16xf32>
    %802 = arith.addf %800, %801 : vector<2x16xf32>
    %c1_242 = arith.constant 1 : index
    %c0_243 = arith.constant 0 : index
    %c0_244 = arith.constant 0 : index
    %803 = vector.load %arg36[%c1_242, %c0_243, %c0_244] : memref<8x2x16xf32, #tpu.memory_space<vmem>>, vector<1x2x16xf32>
    %804 = vector.shape_cast %803 : vector<1x2x16xf32> to vector<2x16xf32>
    %805 = vector.shape_cast %802 : vector<2x16xf32> to vector<1x2x16xf32>
    tpu.vector_store %arg36[%c1_242, %c0_243, %c0_244], %805 {strides = array<i32>} : memref<8x2x16xf32, #tpu.memory_space<vmem>>, vector<1x2x16xf32>,
    %cst_245 = arith.constant dense<0.000000e+00> : vector<2x48xf32>
    %806 = tpu.matmul %802, %25, %cst_245 {dimension_numbers = #tpu.dot_dimension_numbers<[1], [0], [0], [1], [0, 0, 1, 1], [], []>} : vector<2x16xf32>, vector<16x48xf32>, vector<2x48xf32> -> vector<2x48xf32>
    %807 = vector.broadcast %26 : vector<1x48xf32> to vector<2x48xf32>
    %808 = arith.addf %806, %807 : vector<2x48xf32>
    %809 = vector.extract_strided_slice %750 {offsets = [0, 96], sizes = [2, 48], strides = [1, 1]} : vector<2x384xf32> to vector<2x48xf32>
    %810 = vector.extract_strided_slice %809 {offsets = [0, 0], sizes = [2, 32], strides = [1, 1]} : vector<2x48xf32> to vector<2x32xf32>
    %811 = vector.extract_strided_slice %808 {offsets = [0, 0], sizes = [2, 32], strides = [1, 1]} : vector<2x48xf32> to vector<2x32xf32>
    %812 = arith.addf %810, %811 : vector<2x32xf32>
    %813 = arith.negf %812 : vector<2x32xf32>
    %814 = math.exp %813 : vector<2x32xf32>
    %cst_246 = arith.constant 1.000000e+00 : f32
    %815 = vector.broadcast %cst_246 : f32 to vector<2x32xf32>
    %816 = arith.addf %815, %814 : vector<2x32xf32>
    %817 = arith.divf %815, %816 : vector<2x32xf32>
    %818 = vector.extract_strided_slice %817 {offsets = [0, 0], sizes = [2, 16], strides = [1, 1]} : vector<2x32xf32> to vector<2x16xf32>
    %819 = vector.extract_strided_slice %817 {offsets = [0, 16], sizes = [2, 16], strides = [1, 1]} : vector<2x32xf32> to vector<2x16xf32>
    %820 = vector.extract_strided_slice %809 {offsets = [0, 32], sizes = [2, 16], strides = [1, 1]} : vector<2x48xf32> to vector<2x16xf32>
    %821 = vector.extract_strided_slice %808 {offsets = [0, 32], sizes = [2, 16], strides = [1, 1]} : vector<2x48xf32> to vector<2x16xf32>
    %822 = arith.mulf %818, %821 : vector<2x16xf32>
    %823 = arith.addf %820, %822 : vector<2x16xf32>
    %824 = math.tanh %823 : vector<2x16xf32>
    %cst_247 = arith.constant 1.000000e+00 : f32
    %825 = vector.broadcast %cst_247 : f32 to vector<2x16xf32>
    %826 = arith.subf %825, %819 : vector<2x16xf32>
    %827 = arith.mulf %826, %824 : vector<2x16xf32>
    %828 = arith.mulf %819, %802 : vector<2x16xf32>
    %829 = arith.addf %827, %828 : vector<2x16xf32>
    %c2_248 = arith.constant 2 : index
    %c0_249 = arith.constant 0 : index
    %c0_250 = arith.constant 0 : index
    %830 = vector.load %arg36[%c2_248, %c0_249, %c0_250] : memref<8x2x16xf32, #tpu.memory_space<vmem>>, vector<1x2x16xf32>
    %831 = vector.shape_cast %830 : vector<1x2x16xf32> to vector<2x16xf32>
    %832 = vector.shape_cast %829 : vector<2x16xf32> to vector<1x2x16xf32>
    tpu.vector_store %arg36[%c2_248, %c0_249, %c0_250], %832 {strides = array<i32>} : memref<8x2x16xf32, #tpu.memory_space<vmem>>, vector<1x2x16xf32>,
    %cst_251 = arith.constant dense<0.000000e+00> : vector<2x48xf32>
    %833 = tpu.matmul %829, %25, %cst_251 {dimension_numbers = #tpu.dot_dimension_numbers<[1], [0], [0], [1], [0, 0, 1, 1], [], []>} : vector<2x16xf32>, vector<16x48xf32>, vector<2x48xf32> -> vector<2x48xf32>
    %834 = vector.broadcast %26 : vector<1x48xf32> to vector<2x48xf32>
    %835 = arith.addf %833, %834 : vector<2x48xf32>
    %836 = vector.extract_strided_slice %750 {offsets = [0, 144], sizes = [2, 48], strides = [1, 1]} : vector<2x384xf32> to vector<2x48xf32>
    %837 = vector.extract_strided_slice %836 {offsets = [0, 0], sizes = [2, 32], strides = [1, 1]} : vector<2x48xf32> to vector<2x32xf32>
    %838 = vector.extract_strided_slice %835 {offsets = [0, 0], sizes = [2, 32], strides = [1, 1]} : vector<2x48xf32> to vector<2x32xf32>
    %839 = arith.addf %837, %838 : vector<2x32xf32>
    %840 = arith.negf %839 : vector<2x32xf32>
    %841 = math.exp %840 : vector<2x32xf32>
    %cst_252 = arith.constant 1.000000e+00 : f32
    %842 = vector.broadcast %cst_252 : f32 to vector<2x32xf32>
    %843 = arith.addf %842, %841 : vector<2x32xf32>
    %844 = arith.divf %842, %843 : vector<2x32xf32>
    %845 = vector.extract_strided_slice %844 {offsets = [0, 0], sizes = [2, 16], strides = [1, 1]} : vector<2x32xf32> to vector<2x16xf32>
    %846 = vector.extract_strided_slice %844 {offsets = [0, 16], sizes = [2, 16], strides = [1, 1]} : vector<2x32xf32> to vector<2x16xf32>
    %847 = vector.extract_strided_slice %836 {offsets = [0, 32], sizes = [2, 16], strides = [1, 1]} : vector<2x48xf32> to vector<2x16xf32>
    %848 = vector.extract_strided_slice %835 {offsets = [0, 32], sizes = [2, 16], strides = [1, 1]} : vector<2x48xf32> to vector<2x16xf32>
    %849 = arith.mulf %845, %848 : vector<2x16xf32>
    %850 = arith.addf %847, %849 : vector<2x16xf32>
    %851 = math.tanh %850 : vector<2x16xf32>
    %cst_253 = arith.constant 1.000000e+00 : f32
    %852 = vector.broadcast %cst_253 : f32 to vector<2x16xf32>
    %853 = arith.subf %852, %846 : vector<2x16xf32>
    %854 = arith.mulf %853, %851 : vector<2x16xf32>
    %855 = arith.mulf %846, %829 : vector<2x16xf32>
    %856 = arith.addf %854, %855 : vector<2x16xf32>
    %c3_254 = arith.constant 3 : index
    %c0_255 = arith.constant 0 : index
    %c0_256 = arith.constant 0 : index
    %857 = vector.load %arg36[%c3_254, %c0_255, %c0_256] : memref<8x2x16xf32, #tpu.memory_space<vmem>>, vector<1x2x16xf32>
    %858 = vector.shape_cast %857 : vector<1x2x16xf32> to vector<2x16xf32>
    %859 = vector.shape_cast %856 : vector<2x16xf32> to vector<1x2x16xf32>
    tpu.vector_store %arg36[%c3_254, %c0_255, %c0_256], %859 {strides = array<i32>} : memref<8x2x16xf32, #tpu.memory_space<vmem>>, vector<1x2x16xf32>,
    %cst_257 = arith.constant dense<0.000000e+00> : vector<2x48xf32>
    %860 = tpu.matmul %856, %25, %cst_257 {dimension_numbers = #tpu.dot_dimension_numbers<[1], [0], [0], [1], [0, 0, 1, 1], [], []>} : vector<2x16xf32>, vector<16x48xf32>, vector<2x48xf32> -> vector<2x48xf32>
    %861 = vector.broadcast %26 : vector<1x48xf32> to vector<2x48xf32>
    %862 = arith.addf %860, %861 : vector<2x48xf32>
    %863 = vector.extract_strided_slice %750 {offsets = [0, 192], sizes = [2, 48], strides = [1, 1]} : vector<2x384xf32> to vector<2x48xf32>
    %864 = vector.extract_strided_slice %863 {offsets = [0, 0], sizes = [2, 32], strides = [1, 1]} : vector<2x48xf32> to vector<2x32xf32>
    %865 = vector.extract_strided_slice %862 {offsets = [0, 0], sizes = [2, 32], strides = [1, 1]} : vector<2x48xf32> to vector<2x32xf32>
    %866 = arith.addf %864, %865 : vector<2x32xf32>
    %867 = arith.negf %866 : vector<2x32xf32>
    %868 = math.exp %867 : vector<2x32xf32>
    %cst_258 = arith.constant 1.000000e+00 : f32
    %869 = vector.broadcast %cst_258 : f32 to vector<2x32xf32>
    %870 = arith.addf %869, %868 : vector<2x32xf32>
    %871 = arith.divf %869, %870 : vector<2x32xf32>
    %872 = vector.extract_strided_slice %871 {offsets = [0, 0], sizes = [2, 16], strides = [1, 1]} : vector<2x32xf32> to vector<2x16xf32>
    %873 = vector.extract_strided_slice %871 {offsets = [0, 16], sizes = [2, 16], strides = [1, 1]} : vector<2x32xf32> to vector<2x16xf32>
    %874 = vector.extract_strided_slice %863 {offsets = [0, 32], sizes = [2, 16], strides = [1, 1]} : vector<2x48xf32> to vector<2x16xf32>
    %875 = vector.extract_strided_slice %862 {offsets = [0, 32], sizes = [2, 16], strides = [1, 1]} : vector<2x48xf32> to vector<2x16xf32>
    %876 = arith.mulf %872, %875 : vector<2x16xf32>
    %877 = arith.addf %874, %876 : vector<2x16xf32>
    %878 = math.tanh %877 : vector<2x16xf32>
    %cst_259 = arith.constant 1.000000e+00 : f32
    %879 = vector.broadcast %cst_259 : f32 to vector<2x16xf32>
    %880 = arith.subf %879, %873 : vector<2x16xf32>
    %881 = arith.mulf %880, %878 : vector<2x16xf32>
    %882 = arith.mulf %873, %856 : vector<2x16xf32>
    %883 = arith.addf %881, %882 : vector<2x16xf32>
    %c4_260 = arith.constant 4 : index
    %c0_261 = arith.constant 0 : index
    %c0_262 = arith.constant 0 : index
    %884 = vector.load %arg36[%c4_260, %c0_261, %c0_262] : memref<8x2x16xf32, #tpu.memory_space<vmem>>, vector<1x2x16xf32>
    %885 = vector.shape_cast %884 : vector<1x2x16xf32> to vector<2x16xf32>
    %886 = vector.shape_cast %883 : vector<2x16xf32> to vector<1x2x16xf32>
    tpu.vector_store %arg36[%c4_260, %c0_261, %c0_262], %886 {strides = array<i32>} : memref<8x2x16xf32, #tpu.memory_space<vmem>>, vector<1x2x16xf32>,
    %cst_263 = arith.constant dense<0.000000e+00> : vector<2x48xf32>
    %887 = tpu.matmul %883, %25, %cst_263 {dimension_numbers = #tpu.dot_dimension_numbers<[1], [0], [0], [1], [0, 0, 1, 1], [], []>} : vector<2x16xf32>, vector<16x48xf32>, vector<2x48xf32> -> vector<2x48xf32>
    %888 = vector.broadcast %26 : vector<1x48xf32> to vector<2x48xf32>
    %889 = arith.addf %887, %888 : vector<2x48xf32>
    %890 = vector.extract_strided_slice %750 {offsets = [0, 240], sizes = [2, 48], strides = [1, 1]} : vector<2x384xf32> to vector<2x48xf32>
    %891 = vector.extract_strided_slice %890 {offsets = [0, 0], sizes = [2, 32], strides = [1, 1]} : vector<2x48xf32> to vector<2x32xf32>
    %892 = vector.extract_strided_slice %889 {offsets = [0, 0], sizes = [2, 32], strides = [1, 1]} : vector<2x48xf32> to vector<2x32xf32>
    %893 = arith.addf %891, %892 : vector<2x32xf32>
    %894 = arith.negf %893 : vector<2x32xf32>
    %895 = math.exp %894 : vector<2x32xf32>
    %cst_264 = arith.constant 1.000000e+00 : f32
    %896 = vector.broadcast %cst_264 : f32 to vector<2x32xf32>
    %897 = arith.addf %896, %895 : vector<2x32xf32>
    %898 = arith.divf %896, %897 : vector<2x32xf32>
    %899 = vector.extract_strided_slice %898 {offsets = [0, 0], sizes = [2, 16], strides = [1, 1]} : vector<2x32xf32> to vector<2x16xf32>
    %900 = vector.extract_strided_slice %898 {offsets = [0, 16], sizes = [2, 16], strides = [1, 1]} : vector<2x32xf32> to vector<2x16xf32>
    %901 = vector.extract_strided_slice %890 {offsets = [0, 32], sizes = [2, 16], strides = [1, 1]} : vector<2x48xf32> to vector<2x16xf32>
    %902 = vector.extract_strided_slice %889 {offsets = [0, 32], sizes = [2, 16], strides = [1, 1]} : vector<2x48xf32> to vector<2x16xf32>
    %903 = arith.mulf %899, %902 : vector<2x16xf32>
    %904 = arith.addf %901, %903 : vector<2x16xf32>
    %905 = math.tanh %904 : vector<2x16xf32>
    %cst_265 = arith.constant 1.000000e+00 : f32
    %906 = vector.broadcast %cst_265 : f32 to vector<2x16xf32>
    %907 = arith.subf %906, %900 : vector<2x16xf32>
    %908 = arith.mulf %907, %905 : vector<2x16xf32>
    %909 = arith.mulf %900, %883 : vector<2x16xf32>
    %910 = arith.addf %908, %909 : vector<2x16xf32>
    %c5_266 = arith.constant 5 : index
    %c0_267 = arith.constant 0 : index
    %c0_268 = arith.constant 0 : index
    %911 = vector.load %arg36[%c5_266, %c0_267, %c0_268] : memref<8x2x16xf32, #tpu.memory_space<vmem>>, vector<1x2x16xf32>
    %912 = vector.shape_cast %911 : vector<1x2x16xf32> to vector<2x16xf32>
    %913 = vector.shape_cast %910 : vector<2x16xf32> to vector<1x2x16xf32>
    tpu.vector_store %arg36[%c5_266, %c0_267, %c0_268], %913 {strides = array<i32>} : memref<8x2x16xf32, #tpu.memory_space<vmem>>, vector<1x2x16xf32>,
    %cst_269 = arith.constant dense<0.000000e+00> : vector<2x48xf32>
    %914 = tpu.matmul %910, %25, %cst_269 {dimension_numbers = #tpu.dot_dimension_numbers<[1], [0], [0], [1], [0, 0, 1, 1], [], []>} : vector<2x16xf32>, vector<16x48xf32>, vector<2x48xf32> -> vector<2x48xf32>
    %915 = vector.broadcast %26 : vector<1x48xf32> to vector<2x48xf32>
    %916 = arith.addf %914, %915 : vector<2x48xf32>
    %917 = vector.extract_strided_slice %750 {offsets = [0, 288], sizes = [2, 48], strides = [1, 1]} : vector<2x384xf32> to vector<2x48xf32>
    %918 = vector.extract_strided_slice %917 {offsets = [0, 0], sizes = [2, 32], strides = [1, 1]} : vector<2x48xf32> to vector<2x32xf32>
    %919 = vector.extract_strided_slice %916 {offsets = [0, 0], sizes = [2, 32], strides = [1, 1]} : vector<2x48xf32> to vector<2x32xf32>
    %920 = arith.addf %918, %919 : vector<2x32xf32>
    %921 = arith.negf %920 : vector<2x32xf32>
    %922 = math.exp %921 : vector<2x32xf32>
    %cst_270 = arith.constant 1.000000e+00 : f32
    %923 = vector.broadcast %cst_270 : f32 to vector<2x32xf32>
    %924 = arith.addf %923, %922 : vector<2x32xf32>
    %925 = arith.divf %923, %924 : vector<2x32xf32>
    %926 = vector.extract_strided_slice %925 {offsets = [0, 0], sizes = [2, 16], strides = [1, 1]} : vector<2x32xf32> to vector<2x16xf32>
    %927 = vector.extract_strided_slice %925 {offsets = [0, 16], sizes = [2, 16], strides = [1, 1]} : vector<2x32xf32> to vector<2x16xf32>
    %928 = vector.extract_strided_slice %917 {offsets = [0, 32], sizes = [2, 16], strides = [1, 1]} : vector<2x48xf32> to vector<2x16xf32>
    %929 = vector.extract_strided_slice %916 {offsets = [0, 32], sizes = [2, 16], strides = [1, 1]} : vector<2x48xf32> to vector<2x16xf32>
    %930 = arith.mulf %926, %929 : vector<2x16xf32>
    %931 = arith.addf %928, %930 : vector<2x16xf32>
    %932 = math.tanh %931 : vector<2x16xf32>
    %cst_271 = arith.constant 1.000000e+00 : f32
    %933 = vector.broadcast %cst_271 : f32 to vector<2x16xf32>
    %934 = arith.subf %933, %927 : vector<2x16xf32>
    %935 = arith.mulf %934, %932 : vector<2x16xf32>
    %936 = arith.mulf %927, %910 : vector<2x16xf32>
    %937 = arith.addf %935, %936 : vector<2x16xf32>
    %c6_272 = arith.constant 6 : index
    %c0_273 = arith.constant 0 : index
    %c0_274 = arith.constant 0 : index
    %938 = vector.load %arg36[%c6_272, %c0_273, %c0_274] : memref<8x2x16xf32, #tpu.memory_space<vmem>>, vector<1x2x16xf32>
    %939 = vector.shape_cast %938 : vector<1x2x16xf32> to vector<2x16xf32>
    %940 = vector.shape_cast %937 : vector<2x16xf32> to vector<1x2x16xf32>
    tpu.vector_store %arg36[%c6_272, %c0_273, %c0_274], %940 {strides = array<i32>} : memref<8x2x16xf32, #tpu.memory_space<vmem>>, vector<1x2x16xf32>,
    %cst_275 = arith.constant dense<0.000000e+00> : vector<2x48xf32>
    %941 = tpu.matmul %937, %25, %cst_275 {dimension_numbers = #tpu.dot_dimension_numbers<[1], [0], [0], [1], [0, 0, 1, 1], [], []>} : vector<2x16xf32>, vector<16x48xf32>, vector<2x48xf32> -> vector<2x48xf32>
    %942 = vector.broadcast %26 : vector<1x48xf32> to vector<2x48xf32>
    %943 = arith.addf %941, %942 : vector<2x48xf32>
    %944 = vector.extract_strided_slice %750 {offsets = [0, 336], sizes = [2, 48], strides = [1, 1]} : vector<2x384xf32> to vector<2x48xf32>
    %945 = vector.extract_strided_slice %944 {offsets = [0, 0], sizes = [2, 32], strides = [1, 1]} : vector<2x48xf32> to vector<2x32xf32>
    %946 = vector.extract_strided_slice %943 {offsets = [0, 0], sizes = [2, 32], strides = [1, 1]} : vector<2x48xf32> to vector<2x32xf32>
    %947 = arith.addf %945, %946 : vector<2x32xf32>
    %948 = arith.negf %947 : vector<2x32xf32>
    %949 = math.exp %948 : vector<2x32xf32>
    %cst_276 = arith.constant 1.000000e+00 : f32
    %950 = vector.broadcast %cst_276 : f32 to vector<2x32xf32>
    %951 = arith.addf %950, %949 : vector<2x32xf32>
    %952 = arith.divf %950, %951 : vector<2x32xf32>
    %953 = vector.extract_strided_slice %952 {offsets = [0, 0], sizes = [2, 16], strides = [1, 1]} : vector<2x32xf32> to vector<2x16xf32>
    %954 = vector.extract_strided_slice %952 {offsets = [0, 16], sizes = [2, 16], strides = [1, 1]} : vector<2x32xf32> to vector<2x16xf32>
    %955 = vector.extract_strided_slice %944 {offsets = [0, 32], sizes = [2, 16], strides = [1, 1]} : vector<2x48xf32> to vector<2x16xf32>
    %956 = vector.extract_strided_slice %943 {offsets = [0, 32], sizes = [2, 16], strides = [1, 1]} : vector<2x48xf32> to vector<2x16xf32>
    %957 = arith.mulf %953, %956 : vector<2x16xf32>
    %958 = arith.addf %955, %957 : vector<2x16xf32>
    %959 = math.tanh %958 : vector<2x16xf32>
    %cst_277 = arith.constant 1.000000e+00 : f32
    %960 = vector.broadcast %cst_277 : f32 to vector<2x16xf32>
    %961 = arith.subf %960, %954 : vector<2x16xf32>
    %962 = arith.mulf %961, %959 : vector<2x16xf32>
    %963 = arith.mulf %954, %937 : vector<2x16xf32>
    %964 = arith.addf %962, %963 : vector<2x16xf32>
    %c7_278 = arith.constant 7 : index
    %c0_279 = arith.constant 0 : index
    %c0_280 = arith.constant 0 : index
    %965 = vector.load %arg36[%c7_278, %c0_279, %c0_280] : memref<8x2x16xf32, #tpu.memory_space<vmem>>, vector<1x2x16xf32>
    %966 = vector.shape_cast %965 : vector<1x2x16xf32> to vector<2x16xf32>
    %967 = vector.shape_cast %964 : vector<2x16xf32> to vector<1x2x16xf32>
    tpu.vector_store %arg36[%c7_278, %c0_279, %c0_280], %967 {strides = array<i32>} : memref<8x2x16xf32, #tpu.memory_space<vmem>>, vector<1x2x16xf32>,
    %c0_281 = arith.constant 0 : index
    %c0_282 = arith.constant 0 : index
    %c0_283 = arith.constant 0 : index
    %968 = vector.load %arg36[%c0_281, %c0_282, %c0_283] : memref<8x2x16xf32, #tpu.memory_space<vmem>>, vector<8x2x16xf32>
    %c0_284 = arith.constant 0 : index
    %c0_285 = arith.constant 0 : index
    %969 = memref.load %arg29[%c0_284, %c0_285] : memref<1x1xf32, #tpu.memory_space<smem>>
    %cst_286 = arith.constant 1.000000e+00 : f32
    %970 = arith.addf %cst_286, %969 : f32
    %971 = vector.broadcast %970 : f32 to vector<8x2x16xf32>
    %972 = arith.mulf %968, %971 : vector<8x2x16xf32>
    %973 = vector.shape_cast %972 : vector<8x2x16xf32> to vector<16x16xf32>
    %cst_287 = arith.constant dense<0.000000e+00> : vector<16x3xf32>
    %974 = tpu.matmul %973, %27, %cst_287 {dimension_numbers = #tpu.dot_dimension_numbers<[1], [0], [0], [1], [0, 0, 1, 1], [], []>} : vector<16x16xf32>, vector<16x3xf32>, vector<16x3xf32> -> vector<16x3xf32>
    %975 = vector.broadcast %28 : vector<1x3xf32> to vector<16x3xf32>
    %976 = arith.addf %974, %975 : vector<16x3xf32>
    %977 = vector.shape_cast %976 : vector<16x3xf32> to vector<8x2x3xf32>
    %c0_288 = arith.constant 0 : index
    %c0_289 = arith.constant 0 : index
    %c0_290 = arith.constant 0 : index
    %978 = vector.load %arg31[%c0_288, %c0_289, %c0_290] : memref<8x2x3xf32, #tpu.memory_space<vmem>>, vector<8x2x3xf32>
    tpu.vector_store %arg31[%c0_288, %c0_289, %c0_290], %977 {strides = array<i32>} : memref<8x2x3xf32, #tpu.memory_space<vmem>>, vector<8x2x3xf32>,
    return
  }
}

</mosaic_0001>

<bundles_post_ra>
// kernel: tcn_senet_bigru_forward.1
= control target key start
LH: loop header
LB: loop body
LE: loop exit
PB: predicated region body
PF: predicated region fallthrough
CT: control target
= control target key end

     0   :  { %s6231_s6 = smov 1   ;;  %s6232_s10 = smov 2   ;;  %s7238_s0 = inlined_call_operand.smem [shape: u32[32], index: -1, kind: input, shape index: {}] }
   0x1   :  { %s6295_s5 = sld [smem:[%s7238_s0]]   ;;  %s6233_s14 = smov 3  }
   0x2   :  { %s6300_s9 = sld [smem:[%s7238_s0 + %s6231_s6]]   ;;  %s6234_s18 = smov 4  }
   0x3   :  { %s6305_s13 = sld [smem:[%s7238_s0 + %s6232_s10]]   ;;  %s6235_s22 = smov 5  }
   0x4   :  { %s6310_s17 = sld [smem:[%s7238_s0 + %s6233_s14]]   ;;  %s6236_s26 = smov 6  }
   0x5   :  { %s6315_s21 = sld [smem:[%s7238_s0 + %s6234_s18]]   ;;  %s6237_s30 = smov 7  }
   0x6   :  { %s6320_s25 = sld [smem:[%s7238_s0 + %s6235_s22]]   ;;  %s6238_s4 = smov 8  }
   0x7   :  { %s6325_s29 = sld [smem:[%s7238_s0 + %s6236_s26]]   ;;  %s6239_s10 = smov 9  }
   0x8   :  { %s6330_s3 = sld [smem:[%s7238_s0 + %s6237_s30]]   ;;  %s6240_s15 = smov 10  }
   0x9   :  { %s6335_s8 = sld [smem:[%s7238_s0 + %s6238_s4]]   ;;  %s6241_s20 = smov 11  }
   0xa   :  { %s6340_s14 = sld [smem:[%s7238_s0 + %s6239_s10]]   ;;  %s6242_s26 = smov 12  }
   0xb   :  { %s6345_s19 = sld [smem:[%s7238_s0 + %s6240_s15]]   ;;  %s6243_s1 = smov 13  }
   0xc   :  { %s6350_s24 = sld [smem:[%s7238_s0 + %s6241_s20]]   ;;  %s6244_s7 = smov 14  }
   0xd   :  { %s6355_s30 = sld [smem:[%s7238_s0 + %s6242_s26]]   ;;  %s6245_s15 = smov 15  }
   0xe   :  { %s6360_s6 = sld [smem:[%s7238_s0 + %s6243_s1]]   ;;  %s6246_s22 = smov 16  }
   0xf   :  { %s6365_s12 = sld [smem:[%s7238_s0 + %s6244_s7]]   ;;  %s6247_s28 = smov 17  }
  0x10   :  { %s6370_s20 = sld [smem:[%s7238_s0 + %s6245_s15]]   ;;  %s6248_s7 = smov 18  }
  0x11   :  { %s6375_s27 = sld [smem:[%s7238_s0 + %s6246_s22]]   ;;  %s6249_s15 = smov 19  }
  0x12   :  { %s6380_s4 = sld [smem:[%s7238_s0 + %s6247_s28]]   ;;  %s6250_s22 = smov 20  }
  0x13   :  { %s6251_s28 = smov 21  }
  0x14   :  { %7244 = sst [smem:[#allocation30_spill]] %s6360_s6 }
  0x15   :  { %s6385_s6 = sld [smem:[%s7238_s0 + %s6248_s7]]   ;;  %s6252_s7 = smov 22  }
  0x16   :  { %7245 = sst [smem:[#allocation31_spill]] %s6370_s20 }
  0x17   :  { %7246 = sst [smem:[#allocation32_spill]] %s6375_s27 }
  0x18   :  { %7247 = sst [smem:[#allocation33_spill]] %s6380_s4 }
  0x19   :  { %s6390_s20 = sld [smem:[%s7238_s0 + %s6249_s15]]   ;;  %s6253_s15 = smov 23  }
  0x1a   :  { %s6395_s27 = sld [smem:[%s7238_s0 + %s6250_s22]]   ;;  %s6254_s22 = smov 24  }
  0x1b   :  { %7248 = sst [smem:[#allocation34_spill]] %s6385_s6 }
  0x1c   :  { %s6400_s4 = sld [smem:[%s7238_s0 + %s6251_s28]]   ;;  %s6255_s28 = smov 25  }
  0x1d   :  { %s6405_s6 = sld [smem:[%s7238_s0 + %s6252_s7]]   ;;  %s6256_s7 = smov 26  }
  0x1f   :  { %7249 = sst [smem:[#allocation35_spill]] %s6390_s20 }
  0x20   :  { %7250 = sst [smem:[#allocation36_spill]] %s6395_s27 }
  0x21   :  { %s6410_s20 = sld [smem:[%s7238_s0 + %s6253_s15]]   ;;  %s6257_s15 = smov 27  }
  0x22   :  { %7251 = sst [smem:[#allocation37_spill]] %s6400_s4 }
  0x23   :  { %7252 = sst [smem:[#allocation38_spill]] %s6405_s6 }
  0x24   :  { %s6415_s27 = sld [smem:[%s7238_s0 + %s6254_s22]]   ;;  %s6258_s22 = smov 28  }
  0x25   :  { %s6420_s4 = sld [smem:[%s7238_s0 + %s6255_s28]]   ;;  %s6259_s28 = smov 29  }
  0x26   :  { %s6425_s6 = sld [smem:[%s7238_s0 + %s6256_s7]]   ;;  %s6260_s7 = smov 30  }
  0x27   :  { %7253 = sst [smem:[#allocation39_spill]] %s6410_s20 }
  0x28   :  { %s6430_s20 = sld [smem:[%s7238_s0 + %s6257_s15]]   ;;  %s6261_s15 = smov 31  }
  0x2a   :  { %7254 = sst [smem:[#allocation40_spill]] %s6415_s27 }
  0x2b   :  { %7255 = sst [smem:[#allocation41_spill]] %s6420_s4 }
  0x2c   :  { %7256 = sst [smem:[#allocation42_spill]] %s6425_s6 }
  0x2d   :  { %s6435_s27 = sld [smem:[%s7238_s0 + %s6258_s22]]  }
  0x2e   :  { %7257 = sst [smem:[#allocation43_spill]] %s6430_s20 }
  0x2f   :  { %s6440_s4 = sld [smem:[%s7238_s0 + %s6259_s28]]  }
  0x30   :  { %s6445_s6 = sld [smem:[%s7238_s0 + %s6260_s7]]  }
  0x31   :  { %s6450_s20 = sld [smem:[%s7238_s0 + %s6261_s15]]  }
  0x32   :  { %70 = vsyncpa [#allocation9], 0 }
  0x33   :  { %71 = vsyncpa [#allocation12], 0 }
  0x34   :  { %72 = vsyncpa [#allocation15], 0 }
  0x35   :  { %73 = vsyncpa [#allocation18], 0 }
  0x36   :  { %74 = vsyncpa [#allocation21], 0 }
  0x37   :  { %75 = vsyncpa [#allocation10], 0  ;;  %s6262_s22 = smov [#allocation11]   ;;  %s6263_s26 = smov [#allocation14]  }
  0x38   :  { %s98_s23 = sshll.u32 %s6262_s22, 4  ;;  %s118_s28 = sshll.u32 %s6263_s26, 4  ;;  %s99_s23 = int_to_ptr.vmem [resolvable:$true] %s98_s23  ;;  %s119_s28 = int_to_ptr.vmem [resolvable:$true] %s118_s28 }
  0x39   :  { %s5999_s1 = scalar_lea.hbm %s6310_s17, 64 }
  0x3a   :  { %p6000_p0 = scmp.ne.s32.totalorder %s6310_s17, %s5999_s1  ;;  %p6003_p1 = scmp.lt.u32.totalorder %s5999_s1, %s6310_s17 }
  0x3c   :  { %p6005_p2 = pnand %p6003_p1, %p6000_p0 }
  0x3e   :  { %6008 = shalt.err (!%p6005_p2)
}
  0x3f   :  { %s6009_s0 = scalar_lea.vmem %s99_s23, 64  ;;  %p6014_p4 = scmp.lt.s32.totalorder %s99_s23, %s99_s23 }
  0x40   :  { %p6010_p3 = scmp.ne.s32.totalorder %s99_s23, %s6009_s0  ;;  %p6015_p5 = scmp.lt.s32.totalorder %s6009_s0, %s6009_s0 }
  0x42   :  { %p6016_p6 = por %p6015_p5, %p6014_p4 }
  0x44   :  { %p6017_p7 = pnand %p6016_p6, %p6010_p3 }
  0x46   :  { %6020 = shalt.err (!%p6017_p7)
}
  0x47   :  { %101 = dma.hbm_to_vmem [thread:$0]  %s6310_s17, 64, %s99_s23, [#allocation12]  }
  0x48   :  { %s6021_s2 = scalar_lea.hbm %s6320_s25, 64 }
  0x49   :  { %p6022_p8 = scmp.ne.s32.totalorder %s6320_s25, %s6021_s2  ;;  %p6025_p9 = scmp.lt.u32.totalorder %s6021_s2, %s6320_s25 }
  0x4b   :  { %p6027_p10 = pnand %p6025_p9, %p6022_p8 }
  0x4d   :  { %6030 = shalt.err (!%p6027_p10)
}
  0x4e   :  { %s6031_s7 = scalar_lea.vmem %s119_s28, 64  ;;  %p6036_p12 = scmp.lt.s32.totalorder %s119_s28, %s119_s28 }
  0x4f   :  { %p6032_p11 = scmp.ne.s32.totalorder %s119_s28, %s6031_s7  ;;  %p6037_p13 = scmp.lt.s32.totalorder %s6031_s7, %s6031_s7 }
  0x51   :  { %p6038_p0 = por %p6037_p13, %p6036_p12 }
  0x53   :  { %p6039_p1 = pnand %p6038_p0, %p6032_p11 }
  0x55   :  { %6042 = shalt.err (!%p6039_p1)
}
  0x56   :  { %121 = dma.hbm_to_vmem [thread:$0]  %s6320_s25, 64, %s119_s28, [#allocation15]  }
  0x57   :  { %s6264_s10 = smov [#allocation17]   ;;  %s6265_s17 = smov [#allocation20]  }
  0x58   :  { %s138_s11 = sshll.u32 %s6264_s10, 4  ;;  %s158_s15 = sshll.u32 %s6265_s17, 4  ;;  %s139_s11 = int_to_ptr.vmem [resolvable:$true] %s138_s11  ;;  %s159_s15 = int_to_ptr.vmem [resolvable:$true] %s158_s15 }
  0x59   :  { %s6043_s16 = scalar_lea.hbm %s6330_s3, 128 }
  0x5a   :  { %p6044_p2 = scmp.ne.s32.totalorder %s6330_s3, %s6043_s16  ;;  %p6047_p3 = scmp.lt.u32.totalorder %s6043_s16, %s6330_s3 }
  0x5c   :  { %p6049_p4 = pnand %p6047_p3, %p6044_p2 }
  0x5e   :  { %6052 = shalt.err (!%p6049_p4)
}
  0x5f   :  { %s6053_s18 = scalar_lea.vmem %s139_s11, 128  ;;  %p6058_p6 = scmp.lt.s32.totalorder %s139_s11, %s139_s11 }
  0x60   :  { %p6054_p5 = scmp.ne.s32.totalorder %s139_s11, %s6053_s18  ;;  %p6059_p7 = scmp.lt.s32.totalorder %s6053_s18, %s6053_s18 }
  0x62   :  { %p6060_p8 = por %p6059_p7, %p6058_p6 }
  0x64   :  { %p6061_p9 = pnand %p6060_p8, %p6054_p5 }
  0x66   :  { %6064 = shalt.err (!%p6061_p9)
}
  0x67   :  { %141 = dma.hbm_to_vmem [thread:$0]  %s6330_s3, 128, %s139_s11, [#allocation18]  }
  0x68   :  { %s6065_s25 = scalar_lea.hbm %s6340_s14, 16 }
  0x69   :  { %p6066_p10 = scmp.ne.s32.totalorder %s6340_s14, %s6065_s25  ;;  %p6069_p11 = scmp.lt.u32.totalorder %s6065_s25, %s6340_s14 }
  0x6b   :  { %p6071_p12 = pnand %p6069_p11, %p6066_p10 }
  0x6d   :  { %6074 = shalt.err (!%p6071_p12)
}
  0x6e   :  { %s6075_s22 = scalar_lea.vmem %s159_s15, 16  ;;  %s6079_s23 = scalar_lea.vmem %s159_s15, 32 }
  0x6f   :  { %p6076_p13 = scmp.ne.s32.totalorder %s159_s15, %s6075_s22  ;;  %p6080_p0 = scmp.lt.s32.totalorder %s159_s15, %s159_s15 }
  0x70   :  { %p6081_p1 = scmp.lt.s32.totalorder %s6079_s23, %s6075_s22 }
  0x72   :  { %p6082_p2 = por %p6081_p1, %p6080_p0 }
  0x74   :  { %p6083_p3 = pnand %p6082_p2, %p6076_p13 }
  0x76   :  { %6086 = shalt.err (!%p6083_p3)
}
  0x77   :  { %161 = dma.hbm_to_vmem [thread:$0]  %s6340_s14, 16, %s159_s15, [#allocation21]  }
  0x78   :  { %s6266_s26 = smov [#allocation8]   ;;  %s6087_s28 = scalar_lea.hbm %s6300_s9, 192 }
  0x79   :  { %s83_s3 = sshll.u32 %s6266_s26, 4  ;;  %p6088_p4 = scmp.ne.s32.totalorder %s6300_s9, %s6087_s28  ;;  %s84_s3 = int_to_ptr.vmem [resolvable:$true] %s83_s3 }
  0x7a   :  { %p6091_p5 = scmp.lt.u32.totalorder %s6087_s28, %s6300_s9 }
  0x7c   :  { %p6093_p6 = pnand %p6091_p5, %p6088_p4 }
  0x7e   :  { %6096 = shalt.err (!%p6093_p6)
}
  0x7f   :  { %s6097_s1 = scalar_lea.vmem %s84_s3, 192  ;;  %p6102_p8 = scmp.lt.s32.totalorder %s84_s3, %s84_s3 }
  0x80   :  { %p6098_p7 = scmp.ne.s32.totalorder %s84_s3, %s6097_s1  ;;  %p6103_p9 = scmp.lt.s32.totalorder %s6097_s1, %s6097_s1 }
  0x82   :  { %p6104_p10 = por %p6103_p9, %p6102_p8 }
  0x84   :  { %p6105_p11 = pnand %p6104_p10, %p6098_p7 }
  0x86   :  { %6108 = shalt.err (!%p6105_p11)
}
  0x87   :  { %s6267_s0 = smov 64   ;;  %s6268_s14 = smov 4  }
  0x88   :  { %89 = dma.hbm_to_vmem [thread:$0]  %s6300_s9, 192, %s84_s3, [#allocation9], %s6267_s0, %s6267_s0, %s6268_s14  }
  0x89   :  { %s6269_s2 = smov [#allocation13]   ;;  %s6270_s10 = smov [#allocation16]  }
  0x8a   :  { %s108_s7 = sshll.u32 %s6269_s2, 4  ;;  %s128_s11 = sshll.u32 %s6270_s10, 4  ;;  %s109_s7 = int_to_ptr.vmem [resolvable:$true] %s108_s7  ;;  %s129_s11 = int_to_ptr.vmem [resolvable:$true] %s128_s11 }
  0x8b   :  { %s6109_s17 = scalar_lea.hbm %s6315_s21, 16 }
  0x8c   :  { %p6110_p12 = scmp.ne.s32.totalorder %s6315_s21, %s6109_s17  ;;  %p6113_p13 = scmp.lt.u32.totalorder %s6109_s17, %s6315_s21 }
  0x8e   :  { %p6115_p0 = pnand %p6113_p13, %p6110_p12 }
  0x90   :  { %6118 = shalt.err (!%p6115_p0)
}
  0x91   :  { %s6119_s15 = scalar_lea.vmem %s109_s7, 16  ;;  %s6123_s16 = scalar_lea.vmem %s109_s7, 32 }
  0x92   :  { %p6120_p1 = scmp.ne.s32.totalorder %s109_s7, %s6119_s15  ;;  %p6124_p2 = scmp.lt.s32.totalorder %s109_s7, %s109_s7 }
  0x93   :  { %p6125_p3 = scmp.lt.s32.totalorder %s6123_s16, %s6119_s15 }
  0x95   :  { %p6126_p4 = por %p6125_p3, %p6124_p2 }
  0x97   :  { %p6127_p5 = pnand %p6126_p4, %p6120_p1 }
  0x99   :  { %6130 = shalt.err (!%p6127_p5)
}
  0x9a   :  { %111 = dma.hbm_to_vmem [thread:$0]  %s6315_s21, 16, %s109_s7, [#allocation12]  }
  0x9b   :  { %s6131_s9 = scalar_lea.hbm %s6325_s29, 16 }
  0x9c   :  { %p6132_p6 = scmp.ne.s32.totalorder %s6325_s29, %s6131_s9  ;;  %p6135_p7 = scmp.lt.u32.totalorder %s6131_s9, %s6325_s29 }
  0x9e   :  { %p6137_p8 = pnand %p6135_p7, %p6132_p6 }
  0xa0   :  { %6140 = shalt.err (!%p6137_p8)
}
  0xa1   :  { %s6141_s18 = scalar_lea.vmem %s129_s11, 16  ;;  %s6145_s25 = scalar_lea.vmem %s129_s11, 32 }
  0xa2   :  { %p6142_p9 = scmp.ne.s32.totalorder %s129_s11, %s6141_s18  ;;  %p6146_p10 = scmp.lt.s32.totalorder %s129_s11, %s129_s11 }
  0xa3   :  { %p6147_p11 = scmp.lt.s32.totalorder %s6145_s25, %s6141_s18 }
  0xa5   :  { %p6148_p12 = por %p6147_p11, %p6146_p10 }
  0xa7   :  { %p6149_p13 = pnand %p6148_p12, %p6142_p9 }
  0xa9   :  { %6152 = shalt.err (!%p6149_p13)
}
  0xaa   :  { %131 = dma.hbm_to_vmem [thread:$0]  %s6325_s29, 16, %s129_s11, [#allocation15]  }
  0xab   :  { %s6271_s21 = smov [#allocation19]   ;;  %s6272_s23 = smov [#allocation22]  }
  0xac   :  { %s148_s22 = sshll.u32 %s6271_s21, 4  ;;  %s170_s26 = sshll.u32 %s6272_s23, 4  ;;  %s149_s22 = int_to_ptr.vmem [resolvable:$true] %s148_s22  ;;  %s171_s26 = int_to_ptr.vmem [resolvable:$true] %s170_s26 }
  0xad   :  { %s6153_s3 = scalar_lea.hbm %s6335_s8, 16 }
  0xae   :  { %p6154_p0 = scmp.ne.s32.totalorder %s6335_s8, %s6153_s3  ;;  %p6157_p1 = scmp.lt.u32.totalorder %s6153_s3, %s6335_s8 }
  0xb0   :  { %p6159_p2 = pnand %p6157_p1, %p6154_p0 }
  0xb2   :  { %6162 = shalt.err (!%p6159_p2)
}
  0xb3   :  { %s6163_s28 = scalar_lea.vmem %s149_s22, 16  ;;  %s6167_s1 = scalar_lea.vmem %s149_s22, 32 }
  0xb4   :  { %p6164_p3 = scmp.ne.s32.totalorder %s149_s22, %s6163_s28  ;;  %p6168_p4 = scmp.lt.s32.totalorder %s149_s22, %s149_s22 }
  0xb5   :  { %p6169_p5 = scmp.lt.s32.totalorder %s6167_s1, %s6163_s28 }
  0xb7   :  { %p6170_p6 = por %p6169_p5, %p6168_p4 }
  0xb9   :  { %p6171_p7 = pnand %p6170_p6, %p6164_p3 }
  0xbb   :  { %6174 = shalt.err (!%p6171_p7)
}
  0xbc   :  { %151 = dma.hbm_to_vmem [thread:$0]  %s6335_s8, 16, %s149_s22, [#allocation18]  }
  0xbd   :  { %s6175_s29 = scalar_lea.hbm %s6350_s24, 16 }
  0xbe   :  { %p6176_p8 = scmp.ne.s32.totalorder %s6350_s24, %s6175_s29  ;;  %p6179_p9 = scmp.lt.u32.totalorder %s6175_s29, %s6350_s24 }
  0xc0   :  { %p6181_p10 = pnand %p6179_p9, %p6176_p8 }
  0xc2   :  { %6184 = shalt.err (!%p6181_p10)
}
  0xc3   :  { %s6185_s14 = scalar_lea.vmem %s171_s26, 16  ;;  %s6189_s2 = scalar_lea.vmem %s171_s26, 32 }
  0xc4   :  { %p6186_p11 = scmp.ne.s32.totalorder %s171_s26, %s6185_s14  ;;  %p6190_p12 = scmp.lt.s32.totalorder %s171_s26, %s171_s26 }
  0xc5   :  { %p6191_p13 = scmp.lt.s32.totalorder %s6189_s2, %s6185_s14 }
  0xc7   :  { %p6192_p0 = por %p6191_p13, %p6190_p12 }
  0xc9   :  { %p6193_p1 = pnand %p6192_p0, %p6186_p11 }
  0xcb   :  { %6196 = shalt.err (!%p6193_p1)
}
  0xcc   :  { %173 = dma.hbm_to_vmem [thread:$0]  %s6350_s24, 16, %s171_s26, [#allocation21]  }
  0xcd   :  { %6219 = dma.done.wait [#allocation9], 192  }
  0xce   :  { %6220 = vsyncadd [#allocation9], 4294967104 }
  0xcf   :  { %6221 = dma.done.wait [#allocation12], 80  }
  0xd0   :  { %6222 = vsyncadd [#allocation12], 4294967216 }
  0xd1   :  { %6223 = dma.done.wait [#allocation15], 80  }
  0xd2   :  { %6224 = vsyncadd [#allocation15], 4294967216 }
  0xd3   :  { %6225 = dma.done.wait [#allocation18], 144  }
  0xd4   :  { %6226 = vsyncadd [#allocation18], 4294967152 }
  0xd5   :  { %6227 = dma.done.wait [#allocation21], 32  }
  0xd6   :  { %6228 = vsyncadd [#allocation21], 4294967264  ;;  %v301_v0 = vlaneseq  ;;  %v6273_v1 = vmov 1983009808   ;;  %vm335_vm0 = vcmask 1043456   ;;  %vm330_vm1 = vcmask 31744  }
  0xd7   :  { %v299_v2 = vunpack.c.l.s4 %v6273_v1  ;;  %v248_v5 = vld [vmem:[#allocation8 + $0x4] sm:$0xf]  ;;  %v237_v6 = vld [vmem:[%s6295_s5] sm:$0x3]  ;;  %v238_v7 = vld [vmem:[%s6295_s5 + $0x2] sm:$0x3] }
  0xd8   :  { %v6490_v4 = vshrl.u32 %v301_v0, 7  ;;  %5496 = vmatprep.subr.msk.mxu0 %vm335_vm0, %v248_v5  ;;  %v239_v9 = vld [vmem:[%s6295_s5 + $0x4] sm:$0x3]  ;;  %v240_v10 = vld [vmem:[%s6295_s5 + $0x6] sm:$0x3]  ;;  %v415_v12 = vcombine.low %v237_v6, %v238_v7  ;;  %v6274_v45 = vmov 0.0  }
  0xd9   :  { %v300_v3 = vunpack.c.0.s8 %v299_v2  ;;  %v241_v11 = vld [vmem:[%s6295_s5 + $0x8] sm:$0x3]  ;;  %5497 = vmatpush3.msk.msra.mxu0 %vm335_vm0, %v248_v5  ;;  %v242_v13 = vld [vmem:[%s6295_s5 + $0xa] sm:$0x3]  ;;  %v243_v14 = vld [vmem:[%s6295_s5 + $0xc] sm:$0x3]  ;;  %v296_v16 = vcombine.low %v238_v7, %v239_v9  ;;  %v416_v18 = vcombine.low %v239_v9, %v240_v10 }
  0xda   :  { %v244_v15 = vld [vmem:[%s6295_s5 + $0xe] sm:$0x3]  ;;  %v297_v17 = vcombine.low %v240_v10, %v241_v11  ;;  %v313_v19 = vcombine.low %v242_v13, %v243_v14  ;;  %v247_v20 = vld [vmem:[#allocation8] sm:$0xf]  ;;  %v432_v29 = vcombine.low %v241_v11, %v242_v13  ;;  %v249_v34 = vld [vmem:[#allocation8 + $0x8] sm:$0xf] }
  0xdb   :  { %v6495_v8 = vsub.s32 %v300_v3, %v6490_v4  ;;  %v245_v21 = vld [vmem:[%s6295_s5 + $0x10] sm:$0x3]  ;;  %5501 = vmatprep.subr.msk.mxu0 %vm335_vm0, %v247_v20  ;;  %v433_v30 = vcombine.low %v243_v14, %v244_v15  ;;  %v246_v37 = vld [vmem:[%s6295_s5 + $0x12] sm:$0x3]  ;;  %v251_v43 = vld [vmem:[#allocation11] sm:$0xf] }
  0xdc   :  { %v314_v25 = vcombine.low %v244_v15, %v245_v21  ;;  %v533_v39 = vcombine.low %v245_v21, %v246_v37  ;;  %5511 = vmatprep.subr.msk.mxu1 %vm335_vm0, %v251_v43  ;;  %v253_v44 = vld [vmem:[#allocation14] sm:$0xf]  ;;  %v6530_v46 = vld [vmem:[#allocation17] sm:$0xff]  ;;  %vm6275_vm2 = vmmov 0   ;;  %v5303_v47 = vld [vmem:[%s6305_s13] ss:$0 sm:$0xff] }
  0xdd   :  { %v423_v22 = vrot.slane %v415_v12, %v6495_v8  ;;  %v304_v23 = vrot.slane %v296_v16, %v6495_v8  ;;  %v311_v24 = vrot.slane %v297_v17, %v6495_v8  ;;  %v321_v26 = vrot.slane %v313_v19, %v6495_v8  ;;  %5512 = vmatpush3.msk.msra.mxu1 %vm335_vm0, %v251_v43  ;;  %v5304_v54 = vld [vmem:[#allocation13] ss:$0 sm:$0xff]  ;;  %v5308_v59 = vld [vmem:[#allocation16] ss:$0 sm:$0xff]  ;;  %s6276_s5 = smov 104   ;;  %s6277_s13 = smov 112  }
  0xde   :  { %v430_v27 = vrot.slane %v416_v18, %v6495_v8  ;;  %v328_v31 = vrot.slane %v314_v25, %v6495_v8  ;;  %v440_v35 = vrot.slane %v432_v29, %v6495_v8  ;;  %v447_v36 = vrot.slane %v433_v30, %v6495_v8  ;;  %5516 = vmatprep.subr.msk.mxu1 %vm335_vm0, %v253_v44  ;;  %s6278_s8 = smov 16   ;;  %s6279_s24 = smov 120  }
  0xdf   :  { %v312_v28 = vcombine.low %v304_v23, %v311_v24  ;;  %v540_v41 = vrot.slane %v533_v39, %v6495_v8  ;;  %vm902_vm3 = vcmask 1041408   ;;  %vm906_vm4 = vcmp.lt.s32.totalorder %v6490_v4, 2  ;;  %s7261_s7 = sld [smem:[#allocation33_spill]]  ;;  %s7262_s10 = sld [smem:[#allocation34_spill]] }
  0xe0   :  { %v431_v32 = vcombine.low %v423_v22, %v430_v27  ;;  %v329_v33 = vcombine.low %v321_v26, %v328_v31  ;;  %v448_v38 = vcombine.low %v440_v35, %v447_v36  ;;  %v532_v40 = vcombine.low %v430_v27, %v440_v35  ;;  %s7263_s11 = sld [smem:[#allocation35_spill]]  ;;  %s7264_s17 = sld [smem:[#allocation36_spill]] }
  0xe1   :  { %5498 = vmatprep.mubr.msk.f32.mxu0 %vm330_vm1, %v312_v28  ;;  %v541_v42 = vcombine.low %v447_v36, %v540_v41  ;;  %vm1027_vm5 = vcmask 58368   ;;  %vm1030_vm6 = vcmask 60418   ;;  %vm907_vm7 = vcmask 64512   ;;  %s7265_s15 = sld [smem:[#allocation37_spill]]  ;;  %s7266_s16 = sld [smem:[#allocation39_spill]] }
  0xe2   :  { %5499 = vmatmul.mubr.msk.f32.vlgmr.msra.gmra.mrb[0].mxu0 %vm330_vm1, %v329_v33  ;;  %vm3787_vm8 = vcmask 123904   ;;  %s7267_s9 = sld [smem:[#allocation41_spill]]  ;;  %s6281_s18 = smov 8   ;;  %vm3932_vm9 = vcmask 130048   ;;  %vm4006_vm10 = vcmask 17408  }
  0xe3   :  { %5502 = vmatpush3.msk.msra.mxu0 %vm335_vm0, %v247_v20  ;;  %5503 = vmatprep.mubr.msk.f32.mxu0 %vm330_vm1, %v431_v32  ;;  %s7268_s25 = sld [smem:[#allocation40_spill]]  ;;  %s7269_s21 = sld [smem:[#allocation38_spill]] }
  0xe4   :  { %5506 = vmatprep.subr.msk.mxu0 %vm335_vm0, %v249_v34  ;;  %s7270_s22 = sld [smem:[#allocation42_spill]]  ;;  %s6282_s23 = smov 96  }
  0xe5   :  { %s6283_s26 = smov 32   ;;  %s6284_s3 = smov 48  }
  0xe6   :  { %s5051_s28 = sadd.f32 1.0, %s6440_s4  ;;  %s7271_s4 = sld [smem:[#allocation43_spill]] }
  0xe7   :  { %s6286_s1 = smov [#allocation23]  }
  0xe8   :  { %s5246_s29 = sshll.u32 %s6286_s1, 4  ;;  %s5247_s29 = int_to_ptr.vmem [resolvable:$true] %s5246_s29 }
  0xe9   :  { %s6197_s14 = scalar_lea.vmem %s5247_s29, 32  ;;  %p6202_p3 = scmp.lt.s32.totalorder %s5247_s29, %s5247_s29 }
  0xea   :  { %5504 = vmatmul.mubr.msk.f32.vlgmr.msra.gmra.mrb[0].mxu0 %vm330_vm1, %v448_v38  ;;  %p6198_p2 = scmp.ne.s32.totalorder %s5247_s29, %s6197_s14  ;;  %p6203_p4 = scmp.lt.s32.totalorder %s6197_s14, %s6197_s14 }
  0xeb   :  { %5507 = vmatpush3.msk.msra.mxu0 %vm335_vm0, %v249_v34  ;;  %5508 = vmatprep.mubr.msk.f32.mxu0 %vm330_vm1, %v532_v40 }
  0xec   :  { %5526 = vmatprep.subr.mxu0 %v6274_v45  ;;  %p6204_p5 = por %p6203_p4, %p6202_p3 }
  0xee   :  { %p6205_p6 = pnand %p6204_p5, %p6198_p2 }
  0xf2   :  { %5509 = vmatmul.mubr.msk.f32.vlgmr.msra.gmra.mrb[0].mxu0 %vm330_vm1, %v541_v42 }
  0xf3   :  { %5527 = vmatpush3.msra.mxu0 %v6530_v46  ;;  %5528 = vmatprep.mubr.msk.f32.mxu0 %vm6275_vm2, %v6274_v45 }
  0xf4   :  { %5536 = vmatprep.subr.mxu0 %v6274_v45 }
 0x1c5   :  { %v5510_v48 = vpop.f32.mrb[0].mxu0 }
 0x1c6   :  { %v633_v49 = vadd.f32 %v5510_v48, %v5303_v47  ;;  %v615_v50 = vpop.f32.mrb[1].mxu0 }
 0x1c7   :  { %v632_v51 = vadd.f32 %v5303_v47, %v615_v50  ;;  %v5313_v47 = vld [vmem:[#allocation20] ss:$0 sm:$0xff] }
 0x1c8   :  { %v635_v53 = vmax.f32 %v633_v49, 0.0 }
 0x1c9   :  { %v634_v52 = vmax.f32 %v632_v51, 0.0 }
 0x1cb   :  { %5513 = vmatprep.mubr.msk.f32.mxu1 %vm330_vm1, %v634_v52 }
 0x1cc   :  { %5514 = vmatmul.mubr.msk.f32.vlgmr.msra.gmra.mrb[0].mxu1 %vm330_vm1, %v635_v53 }
 0x1cd   :  { %5517 = vmatpush3.msk.msra.mxu1 %vm335_vm0, %v253_v44  ;;  %5518 = vmatprep.mubr.msk.f32.mxu1 %vm330_vm1, %v634_v52  ;;  %v5312_v44 = vld [vmem:[#allocation19] ss:$0 sm:$0xff] }
 0x1ce   :  { %5521 = vmatprep.subr.mxu1 %v6274_v45  ;;  %v6593_v48 = vsel %vm902_vm3, %v5312_v44, %v5313_v47 }
 0x1d0   :  { %5519 = vmatmul.mubr.msk.f32.vlgmr.msra.gmra.mrb[2].mxu1 %vm330_vm1, %v635_v53 }
 0x1d1   :  { %5522 = vmatpush3.msra.mxu1 %v6530_v46  ;;  %5523 = vmatprep.mubr.msk.f32.mxu1 %vm6275_vm2, %v6274_v45 }
 0x1d2   :  { %5531 = vmatprep.subr.mxu1 %v6274_v45 }
 0x1d4   :  { %5524 = vmatmul.mubr.f32.vlgmr.msra.gmra.mrb[4].mxu1 %v6274_v45 }
 0x1d5   :  { %5532 = vmatpush3.msra.mxu1 %v6530_v46  ;;  %5533 = vmatprep.mubr.msk.f32.mxu1 %vm6275_vm2, %v6274_v45 }
 0x1d6   :  { %5541 = vmatprep.subr.mxu1 %v6274_v45 }
 0x29f   :  { %v5515_v55 = vpop.f32.mrb[0].mxu1 }
 0x2a0   :  { %v723_v56 = vadd.f32 %v5515_v55, %v5304_v54  ;;  %v717_v57 = vpop.f32.mrb[1].mxu1 }
 0x2a1   :  { %v718_v58 = vadd.f32 %v5304_v54, %v717_v57 }
 0x2a2   :  { %v829_v60 = vcombine.high %v723_v56, %v723_v56  ;;  %v836_v61 = vrot.slane %v723_v56, %v6495_v8 }
 0x2a3   :  { %v812_v62 = vcombine.high %v718_v58, %v718_v58  ;;  %v819_v63 = vrot.slane %v718_v58, %v6495_v8  ;;  %v5520_v0 = vpop.f32.mrb[2].mxu1 }
 0x2a4   :  { %v843_v1 = vrot.slane %v829_v60, %v6495_v8  ;;  %v807_v2 = vadd.f32 %v5520_v0, %v5308_v59  ;;  %v801_v3 = vpop.f32.mrb[3].mxu1  ;;  %v844_v10 = vcombine.high %v836_v61, %v836_v61 }
 0x2a5   :  { %v826_v5 = vrot.slane %v812_v62, %v6495_v8  ;;  %v802_v6 = vadd.f32 %v5308_v59, %v801_v3  ;;  %v827_v11 = vcombine.high %v819_v63, %v819_v63 }
 0x2a6   :  { %v873_v7 = vcombine.high %v807_v2, %v807_v2  ;;  %v880_v9 = vrot.slane %v807_v2, %v6495_v8  ;;  %v845_v15 = vcombine.high %v843_v1, %v843_v1 }
 0x2a7   :  { %v856_v12 = vcombine.high %v802_v6, %v802_v6  ;;  %v863_v13 = vrot.slane %v802_v6, %v6495_v8  ;;  %v977_v14 = vpop.f32.mrb[4].mxu1  ;;  %v828_v20 = vcombine.high %v826_v5, %v826_v5 }
 0x2a8   :  { %v887_v16 = vrot.slane %v873_v7, %v6495_v8  ;;  %v5319_v17 = vcombine.high %v880_v9, %v880_v9  ;;  %v1354_v18 = vcombine.low %v880_v9, %v880_v9  ;;  %982 = vrot.lane.b32.xlu0 %v977_v14, %s6276_s5  ;;  %v5525_v19 = vpop.f32.mrb[5].mxu1 }
 0x2a9   :  { %v870_v21 = vrot.slane %v856_v12, %v6495_v8  ;;  %v5329_v22 = vcombine.high %v863_v13, %v863_v13  ;;  %v1842_v23 = vcombine.low %v863_v13, %v863_v13 }
 0x2aa   :  { %v5314_v24 = vcombine.high %v887_v16, %v887_v16  ;;  %v1110_v25 = vcombine.low %v887_v16, %v887_v16  ;;  %v1239_v26 = vrot.slane %v5319_v17, %v6495_v8  ;;  %v1361_v27 = vrot.slane %v1354_v18, %v6495_v8 }
 0x2ab   :  { %v5324_v28 = vcombine.high %v870_v21, %v870_v21  ;;  %v1598_v29 = vcombine.low %v870_v21, %v870_v21  ;;  %v1727_v30 = vrot.slane %v5329_v22, %v6495_v8  ;;  %v1849_v31 = vrot.slane %v1842_v23, %v6495_v8 }
 0x2ac   :  { %v994_v32 = vrot.slane %v5314_v24, %v6495_v8  ;;  %v1117_v33 = vrot.slane %v1110_v25, %v6495_v8  ;;  %v6568_v34 = vsel %vm902_vm3, %v826_v5, %v1239_v26  ;;  %v6571_v35 = vsel %vm902_vm3, %v828_v20, %v1361_v27 }
 0x2ad   :  { %v1483_v36 = vrot.slane %v5324_v28, %v6495_v8  ;;  %v1605_v37 = vrot.slane %v1598_v29, %v6495_v8  ;;  %v6576_v38 = vsel %vm902_vm3, %v843_v1, %v1727_v30  ;;  %v6579_v39 = vsel %vm902_vm3, %v845_v15, %v1849_v31 }
 0x2ae   :  { %v996_v40 = vsel %vm902_vm3, %v819_v63, %v994_v32  ;;  %v6583_v41 = vsel %vm902_vm3, %v827_v11, %v1117_v33 }
 0x2af   :  { %v6586_v42 = vsel %vm902_vm3, %v836_v61, %v1483_v36  ;;  %v6589_v43 = vsel %vm902_vm3, %v844_v10, %v1605_v37 }
 0x31a   :  { %v983_v49 = vpop.permute.xlu0 %982 }
 0x31b   :  { %v985_v50 = vsel %vm906_vm4, %v977_v14, %v983_v49 }
 0x31c   :  { %v986_v51 = vadd.f32 %v985_v50, %v6593_v48 }
 0x31e   :  { %1005 = vrot.lane.b32.xlu0 %v986_v51, %s6277_s13  ;;  %v997_v52 = vadd.f32 %v996_v40, %v986_v51 }
 0x320   :  { %v5315_v53 = vmul.f32 -1.442695, %v997_v52 }
 0x322   :  { %5817 = vpow2.f32 %v5315_v53 }
 0x32c   :  { %v5818_v54 = vpop.eup %5817 }
 0x32d   :  { %v1001_v55 = vadd.f32 1.0, %v5818_v54 }
 0x32f   :  { %5819 = vrcp.f32 %v1001_v55 }
 0x339   :  { %v5820_v56 = vpop.eup %5819 }
 0x33a   :  { %v1015_v62 = vsub.f32 1.0, %v5820_v56  ;;  %v1021_v0 = vmul.f32 0.0, %v5820_v56 }
 0x390   :  { %v1006_v57 = vpop.permute.xlu0 %1005 }
 0x391   :  { %v1008_v58 = vmul.f32 %v5820_v56, %v1006_v57 }
 0x393   :  { %1010 = vrot.lane.b32.xlu1 %v1008_v58, %s6278_s8 }
 0x405   :  { %v1011_v59 = vpop.permute.xlu1 %1010 }
 0x406   :  { %v1013_v60 = vadd.f32 %v1011_v59, %v996_v40 }
 0x408   :  { %5821 = vtanh.f32 %v1013_v60 }
 0x412   :  { %v5822_v61 = vpop.eup %5821 }
 0x413   :  { %1017 = vrot.lane.b32.xlu1 %v5822_v61, %s6279_s24 }
 0x485   :  { %v1018_v63 = vpop.permute.xlu1 %1017 }
 0x486   :  { %v1020_v1 = vmul.f32 %v1018_v63, %v1015_v62 }
 0x488   :  { %v1022_v2 = vadd.f32 %v1021_v0, %v1020_v1 }
 0x48a   :  { %1024 = vrot.lane.b32.xlu0 %v1022_v2, %s6279_s24 }
 0x4fc   :  { %v1025_v3 = vpop.permute.xlu0 %1024 }
 0x4fd   :  { %1028 = vst.msk [vmem:[#allocation2] sm:$0x3] %vm1027_vm5, %v1025_v3  ;;  %5529 = vmatmul.mubr.msk.f32.vlgmr.msra.gmra.mrb[2].mxu0 %vm907_vm7, %v1025_v3 }
 0x4fe   :  { %1031 = vst.msk [vmem:[#allocation3 + $0xc] sm:$0xc] %vm1030_vm6, %v1025_v3  ;;  %5537 = vmatpush3.msra.mxu0 %v6530_v46  ;;  %5538 = vmatprep.mubr.msk.f32.mxu0 %vm6275_vm2, %v6274_v45 }
 0x4ff   :  { %5546 = vmatprep.subr.mxu0 %v6274_v45 }
 0x5d0   :  { %v1100_v5 = vpop.f32.mrb[2].mxu0 }
 0x5d1   :  { %1105 = vrot.lane.b32.xlu1 %v1100_v5, %s6276_s5  ;;  %v5530_v6 = vpop.f32.mrb[3].mxu0 }
 0x643   :  { %v1106_v7 = vpop.permute.xlu1 %1105 }
 0x644   :  { %v1108_v9 = vsel %vm906_vm4, %v1100_v5, %v1106_v7 }
 0x645   :  { %v1109_v10 = vadd.f32 %v1108_v9, %v6593_v48 }
 0x647   :  { %1128 = vrot.lane.b32.xlu0 %v1109_v10, %s6277_s13  ;;  %v1120_v11 = vadd.f32 %v6583_v41, %v1109_v10 }
 0x649   :  { %v5317_v12 = vmul.f32 -1.442695, %v1120_v11 }
 0x64b   :  { %5823 = vpow2.f32 %v5317_v12 }
 0x655   :  { %v5824_v13 = vpop.eup %5823 }
 0x656   :  { %v1124_v14 = vadd.f32 1.0, %v5824_v13 }
 0x658   :  { %5825 = vrcp.f32 %v1124_v14 }
 0x662   :  { %v5826_v15 = vpop.eup %5825 }
 0x663   :  { %v1138_v21 = vsub.f32 1.0, %v5826_v15  ;;  %v1144_v23 = vmul.f32 %v5826_v15, %v1022_v2 }
 0x6b9   :  { %v1129_v16 = vpop.permute.xlu0 %1128 }
 0x6ba   :  { %v1131_v17 = vmul.f32 %v5826_v15, %v1129_v16 }
 0x6bc   :  { %1133 = vrot.lane.b32.xlu1 %v1131_v17, %s6278_s8 }
 0x72e   :  { %v1134_v18 = vpop.permute.xlu1 %1133 }
 0x72f   :  { %v1136_v19 = vadd.f32 %v1134_v18, %v6583_v41 }
 0x731   :  { %5827 = vtanh.f32 %v1136_v19 }
 0x73b   :  { %v5828_v20 = vpop.eup %5827 }
 0x73c   :  { %1140 = vrot.lane.b32.xlu0 %v5828_v20, %s6279_s24 }
 0x7ae   :  { %v1141_v22 = vpop.permute.xlu0 %1140 }
 0x7af   :  { %v1143_v24 = vmul.f32 %v1141_v22, %v1138_v21 }
 0x7b1   :  { %v1145_v25 = vadd.f32 %v1144_v23, %v1143_v24 }
 0x7b3   :  { %1147 = vrot.lane.b32.xlu1 %v1145_v25, %s6279_s24 }
 0x825   :  { %v1148_v26 = vpop.permute.xlu1 %1147 }
 0x826   :  { %1151 = vst.msk [vmem:[#allocation2 + $0x2] sm:$0x3] %vm1027_vm5, %v1148_v26  ;;  %5534 = vmatmul.mubr.msk.f32.vlgmr.msra.gmra.mrb[6].mxu1 %vm907_vm7, %v1148_v26 }
 0x827   :  { %1153 = vst.msk [vmem:[#allocation3 + $0xa] sm:$0xc] %vm1030_vm6, %v1148_v26  ;;  %5542 = vmatpush3.msra.mxu1 %v6530_v46  ;;  %5543 = vmatprep.mubr.msk.f32.mxu1 %vm6275_vm2, %v6274_v45 }
 0x828   :  { %5551 = vmatprep.subr.mxu1 %v6274_v45 }
 0x8f9   :  { %v1222_v27 = vpop.f32.mrb[6].mxu1 }
 0x8fa   :  { %1227 = vrot.lane.b32.xlu0 %v1222_v27, %s6276_s5  ;;  %v5535_v28 = vpop.f32.mrb[7].mxu1 }
 0x96c   :  { %v1228_v29 = vpop.permute.xlu0 %1227 }
 0x96d   :  { %v1230_v30 = vsel %vm906_vm4, %v1222_v27, %v1228_v29 }
 0x96e   :  { %v1231_v31 = vadd.f32 %v1230_v30, %v6593_v48 }
 0x970   :  { %1250 = vrot.lane.b32.xlu1 %v1231_v31, %s6277_s13  ;;  %v1242_v32 = vadd.f32 %v6568_v34, %v1231_v31 }
 0x972   :  { %v5320_v33 = vmul.f32 -1.442695, %v1242_v32 }
 0x974   :  { %5829 = vpow2.f32 %v5320_v33 }
 0x97e   :  { %v5830_v36 = vpop.eup %5829 }
 0x97f   :  { %v1246_v37 = vadd.f32 1.0, %v5830_v36 }
 0x981   :  { %5831 = vrcp.f32 %v1246_v37 }
 0x98b   :  { %v5832_v40 = vpop.eup %5831 }
 0x98c   :  { %v1260_v51 = vsub.f32 1.0, %v5832_v40  ;;  %v1266_v53 = vmul.f32 %v5832_v40, %v1145_v25 }
 0x9e2   :  { %v1251_v41 = vpop.permute.xlu1 %1250 }
 0x9e3   :  { %v1253_v44 = vmul.f32 %v5832_v40, %v1251_v41 }
 0x9e5   :  { %1255 = vrot.lane.b32.xlu0 %v1253_v44, %s6278_s8 }
 0xa57   :  { %v1256_v47 = vpop.permute.xlu0 %1255 }
 0xa58   :  { %v1258_v49 = vadd.f32 %v1256_v47, %v6568_v34 }
 0xa5a   :  { %5833 = vtanh.f32 %v1258_v49 }
 0xa64   :  { %v5834_v50 = vpop.eup %5833 }
 0xa65   :  { %1262 = vrot.lane.b32.xlu1 %v5834_v50, %s6279_s24 }
 0xad7   :  { %v1263_v52 = vpop.permute.xlu1 %1262 }
 0xad8   :  { %v1265_v54 = vmul.f32 %v1263_v52, %v1260_v51 }
 0xada   :  { %v1267_v55 = vadd.f32 %v1266_v53, %v1265_v54 }
 0xadc   :  { %1269 = vrot.lane.b32.xlu0 %v1267_v55, %s6279_s24 }
 0xb4e   :  { %v1270_v56 = vpop.permute.xlu0 %1269 }
 0xb4f   :  { %1273 = vst.msk [vmem:[#allocation2 + $0x4] sm:$0x3] %vm1027_vm5, %v1270_v56  ;;  %5539 = vmatmul.mubr.msk.f32.vlgmr.msra.gmra.mrb[4].mxu0 %vm907_vm7, %v1270_v56 }
 0xb50   :  { %1275 = vst.msk [vmem:[#allocation3 + $0x8] sm:$0xc] %vm1030_vm6, %v1270_v56  ;;  %5547 = vmatpush3.msra.mxu0 %v6530_v46  ;;  %5548 = vmatprep.mubr.msk.f32.mxu0 %vm6275_vm2, %v6274_v45 }
 0xb51   :  { %5556 = vmatprep.subr.mxu0 %v6274_v45 }
 0xc22   :  { %v1344_v34 = vpop.f32.mrb[4].mxu0 }
 0xc23   :  { %1349 = vrot.lane.b32.xlu1 %v1344_v34, %s6276_s5  ;;  %v5540_v57 = vpop.f32.mrb[5].mxu0 }
 0xc95   :  { %v1350_v58 = vpop.permute.xlu1 %1349 }
 0xc96   :  { %v1352_v59 = vsel %vm906_vm4, %v1344_v34, %v1350_v58 }
 0xc97   :  { %v1353_v60 = vadd.f32 %v1352_v59, %v6593_v48 }
 0xc99   :  { %1372 = vrot.lane.b32.xlu0 %v1353_v60, %s6277_s13  ;;  %v1364_v61 = vadd.f32 %v6571_v35, %v1353_v60 }
 0xc9b   :  { %v5322_v62 = vmul.f32 -1.442695, %v1364_v61 }
 0xc9d   :  { %5835 = vpow2.f32 %v5322_v62 }
 0xca7   :  { %v5836_v63 = vpop.eup %5835 }
 0xca8   :  { %v1368_v0 = vadd.f32 1.0, %v5836_v63 }
 0xcaa   :  { %5837 = vrcp.f32 %v1368_v0 }
 0xcb4   :  { %v5838_v1 = vpop.eup %5837 }
 0xcb5   :  { %v1382_v9 = vsub.f32 1.0, %v5838_v1  ;;  %v1388_v11 = vmul.f32 %v5838_v1, %v1267_v55 }
 0xd0b   :  { %v1373_v2 = vpop.permute.xlu0 %1372 }
 0xd0c   :  { %v1375_v3 = vmul.f32 %v5838_v1, %v1373_v2 }
 0xd0e   :  { %1377 = vrot.lane.b32.xlu1 %v1375_v3, %s6278_s8 }
 0xd80   :  { %v1378_v5 = vpop.permute.xlu1 %1377 }
 0xd81   :  { %v1380_v6 = vadd.f32 %v1378_v5, %v6571_v35 }
 0xd83   :  { %5839 = vtanh.f32 %v1380_v6 }
 0xd8d   :  { %v5840_v7 = vpop.eup %5839 }
 0xd8e   :  { %1384 = vrot.lane.b32.xlu0 %v5840_v7, %s6279_s24 }
 0xe00   :  { %v1385_v10 = vpop.permute.xlu0 %1384 }
 0xe01   :  { %v1387_v12 = vmul.f32 %v1385_v10, %v1382_v9 }
 0xe03   :  { %v1389_v13 = vadd.f32 %v1388_v11, %v1387_v12 }
 0xe05   :  { %1391 = vrot.lane.b32.xlu1 %v1389_v13, %s6279_s24 }
 0xe77   :  { %v1392_v14 = vpop.permute.xlu1 %1391 }
 0xe78   :  { %1395 = vst.msk [vmem:[#allocation2 + $0x6] sm:$0x3] %vm1027_vm5, %v1392_v14  ;;  %5544 = vmatmul.mubr.msk.f32.vlgmr.msra.gmra.mrb[8].mxu1 %vm907_vm7, %v1392_v14 }
 0xe79   :  { %1397 = vst.msk [vmem:[#allocation3 + $0x6] sm:$0xc] %vm1030_vm6, %v1392_v14  ;;  %5552 = vmatpush3.msra.mxu1 %v6530_v46  ;;  %5553 = vmatprep.mubr.msk.f32.mxu1 %vm6275_vm2, %v6274_v45 }
 0xf4b   :  { %v1466_v35 = vpop.f32.mrb[8].mxu1 }
 0xf4c   :  { %1471 = vrot.lane.b32.xlu0 %v1466_v35, %s6276_s5  ;;  %v5545_v15 = vpop.f32.mrb[9].mxu1 }
 0xfbe   :  { %v1472_v16 = vpop.permute.xlu0 %1471 }
 0xfbf   :  { %v1474_v17 = vsel %vm906_vm4, %v1466_v35, %v1472_v16 }
 0xfc0   :  { %v1475_v18 = vadd.f32 %v1474_v17, %v6593_v48 }
 0xfc2   :  { %1494 = vrot.lane.b32.xlu1 %v1475_v18, %s6277_s13  ;;  %v1486_v19 = vadd.f32 %v6586_v42, %v1475_v18 }
 0xfc4   :  { %v5325_v20 = vmul.f32 -1.442695, %v1486_v19 }
 0xfc6   :  { %5841 = vpow2.f32 %v5325_v20 }
 0xfd0   :  { %v5842_v21 = vpop.eup %5841 }
 0xfd1   :  { %v1490_v22 = vadd.f32 1.0, %v5842_v21 }
 0xfd3   :  { %5843 = vrcp.f32 %v1490_v22 }
 0xfdd   :  { %v5844_v23 = vpop.eup %5843 }
 0xfde   :  { %v1504_v29 = vsub.f32 1.0, %v5844_v23  ;;  %v1510_v31 = vmul.f32 %v5844_v23, %v1389_v13 }
0x1034   :  { %v1495_v24 = vpop.permute.xlu1 %1494 }
0x1035   :  { %v1497_v25 = vmul.f32 %v5844_v23, %v1495_v24 }
0x1037   :  { %1499 = vrot.lane.b32.xlu0 %v1497_v25, %s6278_s8 }
0x10a9   :  { %v1500_v26 = vpop.permute.xlu0 %1499 }
0x10aa   :  { %v1502_v27 = vadd.f32 %v1500_v26, %v6586_v42 }
0x10ac   :  { %5845 = vtanh.f32 %v1502_v27 }
0x10b6   :  { %v5846_v28 = vpop.eup %5845 }
0x10b7   :  { %1506 = vrot.lane.b32.xlu1 %v5846_v28, %s6279_s24 }
0x1129   :  { %v1507_v30 = vpop.permute.xlu1 %1506 }
0x112a   :  { %v1509_v32 = vmul.f32 %v1507_v30, %v1504_v29 }
0x112c   :  { %v1511_v33 = vadd.f32 %v1510_v31, %v1509_v32  ;;  %v259_v32 = vld [vmem:[%s6345_s19 + $0x8] sm:$0xff] }
0x112d   :  { %5561 = vmatprep.subr.mxu1 %v259_v32 }
0x112e   :  { %1513 = vrot.lane.b32.xlu0 %v1511_v33, %s6279_s24 }
0x11a0   :  { %v1514_v36 = vpop.permute.xlu0 %1513 }
0x11a1   :  { %1517 = vst.msk [vmem:[#allocation2 + $0x8] sm:$0x3] %vm1027_vm5, %v1514_v36  ;;  %5549 = vmatmul.mubr.msk.f32.vlgmr.msra.gmra.mrb[6].mxu0 %vm907_vm7, %v1514_v36 }
0x11a2   :  { %1519 = vst.msk [vmem:[#allocation3 + $0x4] sm:$0xc] %vm1030_vm6, %v1514_v36  ;;  %5557 = vmatpush3.msra.mxu0 %v6530_v46  ;;  %5558 = vmatprep.mubr.msk.f32.mxu0 %vm6275_vm2, %v6274_v45 }
0x1274   :  { %v1588_v42 = vpop.f32.mrb[6].mxu0 }
0x1275   :  { %1593 = vrot.lane.b32.xlu1 %v1588_v42, %s6276_s5  ;;  %v5550_v37 = vpop.f32.mrb[7].mxu0 }
0x12e7   :  { %v1594_v40 = vpop.permute.xlu1 %1593 }
0x12e8   :  { %v1596_v41 = vsel %vm906_vm4, %v1588_v42, %v1594_v40 }
0x12e9   :  { %v1597_v44 = vadd.f32 %v1596_v41, %v6593_v48 }
0x12eb   :  { %1616 = vrot.lane.b32.xlu0 %v1597_v44, %s6277_s13  ;;  %v1608_v47 = vadd.f32 %v6589_v43, %v1597_v44  ;;  %v261_v44 = vld [vmem:[%s6355_s30] sm:$0xff] }
0x12ed   :  { %v5327_v49 = vmul.f32 -1.442695, %v1608_v47 }
0x12ef   :  { %5847 = vpow2.f32 %v5327_v49  ;;  %v1897_v49 = vld [vmem:[#allocation3 + $0x8] sm:$0x3] }
0x12f9   :  { %v5848_v46 = vpop.eup %5847 }
0x12fa   :  { %v1612_v50 = vadd.f32 1.0, %v5848_v46 }
0x12fc   :  { %5849 = vrcp.f32 %v1612_v50  ;;  %v1888_v50 = vld [vmem:[#allocation2 + $0x6] sm:$0x3] }
0x1306   :  { %v5850_v51 = vpop.eup %5849 }
0x1307   :  { %v1626_v34 = vsub.f32 1.0, %v5850_v51  ;;  %v1632_v58 = vmul.f32 %v5850_v51, %v1511_v33  ;;  %v262_v33 = vld [vmem:[%s6355_s30 + $0x8] sm:$0xff]  ;;  %s7259_s30 = sld [smem:[#allocation31_spill]] }
0x1308   :  { %5571 = vmatprep.subr.mxu0 %v262_v33 }
0x135d   :  { %v1617_v52 = vpop.permute.xlu0 %1616 }
0x135e   :  { %v1619_v53 = vmul.f32 %v5850_v51, %v1617_v52  ;;  %v1898_v51 = vld [vmem:[#allocation3 + $0xa] sm:$0x3]  ;;  %v1899_v52 = vld [vmem:[#allocation3 + $0xc] sm:$0x3] }
0x1360   :  { %1621 = vrot.lane.b32.xlu1 %v1619_v53, %s6278_s8  ;;  %v1896_v53 = vld [vmem:[#allocation3 + $0x6] sm:$0x3] }
0x13d2   :  { %v1622_v54 = vpop.permute.xlu1 %1621 }
0x13d3   :  { %v1624_v55 = vadd.f32 %v1622_v54, %v6589_v43  ;;  %v1926_v54 = vcombine.low %v1897_v49, %v1898_v51 }
0x13d5   :  { %5851 = vtanh.f32 %v1624_v55  ;;  %v1886_v55 = vld [vmem:[#allocation2 + $0x2] sm:$0x3] }
0x13df   :  { %v5852_v56 = vpop.eup %5851 }
0x13e0   :  { %1628 = vrot.lane.b32.xlu0 %v5852_v56, %s6279_s24  ;;  %v1887_v56 = vld [vmem:[#allocation2 + $0x4] sm:$0x3] }
0x1452   :  { %v1629_v57 = vpop.permute.xlu0 %1628 }
0x1453   :  { %v1631_v59 = vmul.f32 %v1629_v57, %v1626_v34  ;;  %v1900_v57 = vld [vmem:[#allocation3 + $0xe] sm:$0x3] }
0x1455   :  { %v1633_v60 = vadd.f32 %v1632_v58, %v1631_v59  ;;  %v2031_v58 = vcombine.low %v1887_v56, %v1888_v50 }
0x1457   :  { %1635 = vrot.lane.b32.xlu1 %v1633_v60, %s6279_s24 }
0x14c9   :  { %v1636_v61 = vpop.permute.xlu1 %1635 }
0x14ca   :  { %1639 = vst.msk [vmem:[#allocation2 + $0xa] sm:$0x3] %vm1027_vm5, %v1636_v61  ;;  %5554 = vmatmul.mubr.msk.f32.vlgmr.msra.gmra.mrb[10].mxu1 %vm907_vm7, %v1636_v61 }
0x14cb   :  { %1641 = vst.msk [vmem:[#allocation3 + $0x2] sm:$0xc] %vm1030_vm6, %v1636_v61  ;;  %5562 = vmatpush3.msra.mxu1 %v259_v32  ;;  %v1927_v61 = vcombine.low %v1899_v52, %v1900_v57 }
0x14d2   :  { %v1895_v46 = vld [vmem:[#allocation3 + $0x4] sm:$0x3] }
0x14d3   :  { %v1910_v34 = vcombine.low %v1895_v46, %v1896_v53 }
0x159d   :  { %v1710_v62 = vpop.f32.mrb[10].mxu1 }
0x159e   :  { %1715 = vrot.lane.b32.xlu0 %v1710_v62, %s6276_s5  ;;  %v5555_v43 = vpop.f32.mrb[11].mxu1 }
0x1610   :  { %v1716_v63 = vpop.permute.xlu0 %1715 }
0x1611   :  { %v1718_v0 = vsel %vm906_vm4, %v1710_v62, %v1716_v63  ;;  %v1885_v62 = vld [vmem:[#allocation2] sm:$0x3] }
0x1612   :  { %v1719_v1 = vadd.f32 %v1718_v0, %v6593_v48  ;;  %v2030_v63 = vcombine.low %v1885_v62, %v1886_v55  ;;  %v1934_v0 = vrot.slane %v1926_v54, %v6495_v8 }
0x1614   :  { %1738 = vrot.lane.b32.xlu1 %v1719_v1, %s6277_s13  ;;  %v1730_v2 = vadd.f32 %v6576_v38, %v1719_v1 }
0x1616   :  { %v5330_v3 = vmul.f32 -1.442695, %v1730_v2  ;;  %v1924_v2 = vrot.slane %v1910_v34, %v6495_v8 }
0x1618   :  { %5853 = vpow2.f32 %v5330_v3  ;;  %v2045_v3 = vrot.slane %v2031_v58, %v6495_v8 }
0x1622   :  { %v5854_v5 = vpop.eup %5853 }
0x1623   :  { %v1734_v6 = vadd.f32 1.0, %v5854_v5 }
0x1625   :  { %5855 = vrcp.f32 %v1734_v6  ;;  %v1941_v6 = vrot.slane %v1927_v61, %v6495_v8 }
0x162f   :  { %v5856_v7 = vpop.eup %5855 }
0x1630   :  { %v1748_v14 = vsub.f32 1.0, %v5856_v7  ;;  %v1754_v15 = vmul.f32 %v5856_v7, %v1633_v60 }
0x1686   :  { %v1739_v9 = vpop.permute.xlu1 %1738 }
0x1687   :  { %v1741_v10 = vmul.f32 %v5856_v7, %v1739_v9  ;;  %v2038_v9 = vrot.slane %v2030_v63, %v6495_v8 }
0x1689   :  { %1743 = vrot.lane.b32.xlu0 %v1741_v10, %s6278_s8  ;;  %v1890_v10 = vld [vmem:[#allocation2 + $0xa] sm:$0x3] }
0x16fb   :  { %v1744_v11 = vpop.permute.xlu0 %1743 }
0x16fc   :  { %v1746_v12 = vadd.f32 %v1744_v11, %v6576_v38 }
0x16fe   :  { %5857 = vtanh.f32 %v1746_v12  ;;  %v1942_v12 = vcombine.low %v1934_v0, %v1941_v6 }
0x1708   :  { %v5858_v13 = vpop.eup %5857 }
0x1709   :  { %1750 = vrot.lane.b32.xlu1 %v5858_v13, %s6279_s24 }
0x177b   :  { %v1751_v35 = vpop.permute.xlu1 %1750 }
0x177c   :  { %v1753_v16 = vmul.f32 %v1751_v35, %v1748_v14  ;;  %v2046_v14 = vcombine.low %v2038_v9, %v2045_v3  ;;  %v1889_v35 = vld [vmem:[#allocation2 + $0x8] sm:$0x3] }
0x177e   :  { %v1755_v17 = vadd.f32 %v1754_v15, %v1753_v16  ;;  %v2047_v15 = vcombine.low %v1889_v35, %v1890_v10 }
0x1780   :  { %1757 = vrot.lane.b32.xlu0 %v1755_v17, %s6279_s24 }
0x17f2   :  { %v1758_v18 = vpop.permute.xlu0 %1757 }
0x17f3   :  { %1761 = vst.msk [vmem:[#allocation2 + $0xc] sm:$0x3] %vm1027_vm5, %v1758_v18  ;;  %5559 = vmatmul.mubr.msk.f32.vlgmr.msra.gmra.mrb[8].mxu0 %vm907_vm7, %v1758_v18 }
0x17f4   :  { %1763 = vst.msk [vmem:[#allocation3] sm:$0xc] %vm1030_vm6, %v1758_v18  ;;  %5572 = vmatpush3.msra.mxu0 %v262_v33 }
0x17f5   :  { %5576 = vmatprep.subr.mxu0 %v261_v44 }
0x17fa   :  { %v1891_v11 = vld [vmem:[#allocation2 + $0xc] sm:$0x3] }
0x17fb   :  { %v1894_v60 = vld [vmem:[#allocation3 + $0x2] sm:$0x3] }
0x18c6   :  { %v1832_v19 = vpop.f32.mrb[8].mxu0 }
0x18c7   :  { %1837 = vrot.lane.b32.xlu1 %v1832_v19, %s6276_s5  ;;  %v5560_v38 = vpop.f32.mrb[9].mxu0 }
0x18c8   :  { %v5337_v38 = vld [vmem:[#allocation22] ss:$0 sm:$0xff] }
0x1939   :  { %v1838_v20 = vpop.permute.xlu1 %1837 }
0x193a   :  { %v1840_v21 = vsel %vm906_vm4, %v1832_v19, %v1838_v20  ;;  %v6734_v19 = vld [vmem:[%s6365_s12] sm:$0xff]  ;;  %s7260_s12 = sld [smem:[#allocation32_spill]] }
0x193b   :  { %v1841_v22 = vadd.f32 %v1840_v21, %v6593_v48 }
0x193d   :  { %1860 = vrot.lane.b32.xlu0 %v1841_v22, %s6277_s13  ;;  %v1852_v23 = vadd.f32 %v6579_v39, %v1841_v22 }
0x193f   :  { %v5332_v24 = vmul.f32 -1.442695, %v1852_v23 }
0x1941   :  { %5859 = vpow2.f32 %v5332_v24 }
0x194b   :  { %v5860_v25 = vpop.eup %5859 }
0x194c   :  { %v1856_v26 = vadd.f32 1.0, %v5860_v25 }
0x194e   :  { %5861 = vrcp.f32 %v1856_v26 }
0x1958   :  { %v5862_v27 = vpop.eup %5861 }
0x1959   :  { %v1870_v36 = vsub.f32 1.0, %v5862_v27  ;;  %v1876_v37 = vmul.f32 %v5862_v27, %v1755_v17  ;;  %v2055_v17 = vrot.slane %v2047_v15, %v6495_v8 }
0x19af   :  { %v1861_v28 = vpop.permute.xlu0 %1860 }
0x19b0   :  { %v1863_v29 = vmul.f32 %v5862_v27, %v1861_v28 }
0x19b2   :  { %1865 = vrot.lane.b32.xlu1 %v1863_v29, %s6278_s8 }
0x1a24   :  { %v1866_v30 = vpop.permute.xlu1 %1865 }
0x1a25   :  { %v1868_v31 = vadd.f32 %v1866_v30, %v6579_v39  ;;  %v258_v39 = vld [vmem:[%s6345_s19] sm:$0xff]  ;;  %s7258_s19 = sld [smem:[#allocation30_spill]] }
0x1a26   :  { %5566 = vmatprep.subr.mxu1 %v258_v39 }
0x1a27   :  { %5863 = vtanh.f32 %v1868_v31 }
0x1a2b   :  { %v5342_v20 = vld [vmem:[%s7258_s19] ss:$0 sm:$0xff] }
0x1a31   :  { %v5864_v48 = vpop.eup %5863 }
0x1a32   :  { %1872 = vrot.lane.b32.xlu0 %v5864_v48, %s6279_s24 }
0x1aa4   :  { %v1873_v42 = vpop.permute.xlu0 %1872 }
0x1aa5   :  { %v1875_v40 = vmul.f32 %v1873_v42, %v1870_v36 }
0x1aa7   :  { %v1877_v41 = vadd.f32 %v1876_v37, %v1875_v40 }
0x1aa9   :  { %1879 = vrot.lane.b32.xlu1 %v1877_v41, %s6279_s24 }
0x1b1b   :  { %v1880_v47 = vpop.permute.xlu1 %1879 }
0x1b1c   :  { %1883 = vst.msk [vmem:[#allocation2 + $0xe] sm:$0x3] %vm1027_vm5, %v1880_v47 }
0x1b1d   :  { %1884 = vst.msk [vmem:[#allocation3 - $0x2] sm:$0xc] %vm1030_vm6, %v1880_v47 }
0x1b23   :  { %v1892_v5 = vld [vmem:[#allocation2 + $0xe] sm:$0x3] }
0x1b24   :  { %v1893_v59 = vld [vmem:[#allocation3] sm:$0x3]  ;;  %v2048_v13 = vcombine.low %v1891_v11, %v1892_v5 }
0x1b25   :  { %v1909_v43 = vcombine.low %v1893_v59, %v1894_v60 }
0x1b26   :  { %v2062_v16 = vrot.slane %v2048_v13, %v6495_v8  ;;  %v5344_v13 = vld [vmem:[%s7260_s12] ss:$0 sm:$0xff] }
0x1b27   :  { %v1917_v1 = vrot.slane %v1909_v43, %v6495_v8 }
0x1b28   :  { %v2063_v18 = vcombine.low %v2055_v17, %v2062_v16 }
0x1b29   :  { %v1925_v7 = vcombine.low %v1917_v1, %v1924_v2 }
0x1b2b   :  { %5563 = vmatprep.mubr.msk.f32.mxu1 %vm907_vm7, %v1925_v7  ;;  %5573 = vmatprep.mubr.msk.f32.mxu0 %vm907_vm7, %v1925_v7 }
0x1b2c   :  { %5564 = vmatmul.mubr.msk.f32.vlgmr.msra.gmra.mrb[12].mxu1 %vm907_vm7, %v1942_v12  ;;  %5574 = vmatmul.mubr.msk.f32.vlgmr.msra.gmra.mrb[10].mxu0 %vm907_vm7, %v1942_v12  ;;  %v5343_v12 = vld [vmem:[%s7259_s30] ss:$0 sm:$0xff] }
0x1b2d   :  { %5567 = vmatpush3.msra.mxu1 %v258_v39  ;;  %5568 = vmatprep.mubr.msk.f32.mxu1 %vm907_vm7, %v2046_v14 }
0x1b2e   :  { %5578 = vmatprep.mubr.msk.f32.mxu0 %vm907_vm7, %v2046_v14  ;;  %5577 = vmatpush3.msra.mxu0 %v261_v44  ;;  %v6792_v14 = vsel %vm902_vm3, %v5343_v12, %v5344_v13 }
0x1b2f   :  { %5581 = vmatprep.subr.mxu1 %v6274_v45  ;;  %5586 = vmatprep.subr.mxu0 %v6274_v45 }
0x1b34   :  { %5569 = vmatmul.mubr.msk.f32.vlgmr.msra.gmra.mrb[12].mxu1 %vm907_vm7, %v2063_v18  ;;  %5579 = vmatmul.mubr.msk.f32.vlgmr.msra.gmra.mrb[10].mxu0 %vm907_vm7, %v2063_v18 }
0x1b35   :  { %5582 = vmatpush3.msra.mxu1 %v6734_v19  ;;  %5583 = vmatprep.mubr.msk.f32.mxu1 %vm6275_vm2, %v6274_v45 }
0x1b36   :  { %5587 = vmatpush3.msra.mxu0 %v6734_v19  ;;  %5588 = vmatprep.mubr.msk.f32.mxu0 %vm6275_vm2, %v6274_v45 }
0x1b37   :  { %5591 = vmatprep.subr.mxu1 %v6274_v45  ;;  %5596 = vmatprep.subr.mxu0 %v6274_v45 }
0x1b38   :  { %5584 = vmatmul.mubr.f32.vlgmr.msra.gmra.mrb[14].mxu1 %v6274_v45 }
0x1b39   :  { %5592 = vmatpush3.msra.mxu1 %v6734_v19  ;;  %5593 = vmatprep.mubr.msk.f32.mxu1 %vm6275_vm2, %v6274_v45 }
0x1b3a   :  { %5601 = vmatprep.subr.mxu1 %v6274_v45 }
0x1c07   :  { %v5570_v21 = vpop.f32.mrb[12].mxu1  ;;  %v5580_v22 = vpop.f32.mrb[10].mxu0 }
0x1c08   :  { %v2150_v23 = vadd.f32 %v5570_v21, %v5337_v38  ;;  %v2308_v24 = vadd.f32 %v5580_v22, %v5342_v20  ;;  %v2134_v25 = vpop.f32.mrb[13].mxu1  ;;  %v2292_v26 = vpop.f32.mrb[11].mxu0 }
0x1c09   :  { %v2149_v27 = vadd.f32 %v5337_v38, %v2134_v25  ;;  %v2307_v28 = vadd.f32 %v5342_v20, %v2292_v26 }
0x1c0a   :  { %v2328_v29 = vcombine.high %v2150_v23, %v2150_v23  ;;  %v2335_v30 = vrot.slane %v2150_v23, %v6495_v8  ;;  %v2372_v31 = vcombine.high %v2308_v24, %v2308_v24  ;;  %v2379_v48 = vrot.slane %v2308_v24, %v6495_v8 }
0x1c0b   :  { %v2311_v32 = vcombine.high %v2149_v27, %v2149_v27  ;;  %v2318_v33 = vrot.slane %v2149_v27, %v6495_v8  ;;  %v2355_v36 = vcombine.high %v2307_v28, %v2307_v28  ;;  %v2362_v42 = vrot.slane %v2307_v28, %v6495_v8  ;;  %v2468_v37 = vpop.f32.mrb[14].mxu1 }
0x1c0c   :  { %v2342_v40 = vrot.slane %v2328_v29, %v6495_v8  ;;  %v2343_v41 = vcombine.high %v2335_v30, %v2335_v30  ;;  %v2386_v39 = vrot.slane %v2372_v31, %v6495_v8  ;;  %v5350_v44 = vcombine.high %v2379_v48, %v2379_v48  ;;  %2473 = vrot.lane.b32.xlu0 %v2468_v37, %s6276_s5  ;;  %v5585_v47 = vpop.f32.mrb[15].mxu1 }
0x1c0d   :  { %v2843_v49 = vcombine.low %v2379_v48, %v2379_v48  ;;  %v2325_v46 = vrot.slane %v2311_v32, %v6495_v8  ;;  %v2326_v50 = vcombine.high %v2318_v33, %v2318_v33  ;;  %v2369_v51 = vrot.slane %v2355_v36, %v6495_v8 }
0x1c0e   :  { %v2344_v52 = vcombine.high %v2342_v40, %v2342_v40  ;;  %v5345_v53 = vcombine.high %v2386_v39, %v2386_v39  ;;  %v2599_v54 = vcombine.low %v2386_v39, %v2386_v39  ;;  %v2728_v55 = vrot.slane %v5350_v44, %v6495_v8 }
0x1c0f   :  { %v2850_v56 = vrot.slane %v2843_v49, %v6495_v8  ;;  %v2327_v34 = vcombine.high %v2325_v46, %v2325_v46  ;;  %v5355_v57 = vcombine.high %v2369_v51, %v2369_v51  ;;  %v3087_v58 = vcombine.low %v2369_v51, %v2369_v51 }
0x1c10   :  { %v2485_v59 = vrot.slane %v5345_v53, %v6495_v8  ;;  %v2606_v60 = vrot.slane %v2599_v54, %v6495_v8  ;;  %v5360_v61 = vcombine.high %v2362_v42, %v2362_v42  ;;  %v3331_v62 = vcombine.low %v2362_v42, %v2362_v42 }
0x1c11   :  { %v2972_v43 = vrot.slane %v5355_v57, %v6495_v8  ;;  %v3094_v63 = vrot.slane %v3087_v58, %v6495_v8  ;;  %v6768_v0 = vsel %vm902_vm3, %v2325_v46, %v2728_v55  ;;  %v6771_v1 = vsel %vm902_vm3, %v2327_v34, %v2850_v56 }
0x1c12   :  { %v3216_v2 = vrot.slane %v5360_v61, %v6495_v8  ;;  %v3338_v3 = vrot.slane %v3331_v62, %v6495_v8  ;;  %v2487_v5 = vsel %vm902_vm3, %v2318_v33, %v2485_v59  ;;  %v2608_v6 = vsel %vm902_vm3, %v2326_v50, %v2606_v60 }
0x1c13   :  { %v6778_v7 = vsel %vm902_vm3, %v2335_v30, %v2972_v43  ;;  %v6781_v9 = vsel %vm902_vm3, %v2343_v41, %v3094_v63 }
0x1c14   :  { %v6784_v10 = vsel %vm902_vm3, %v2342_v40, %v3216_v2  ;;  %v6787_v11 = vsel %vm902_vm3, %v2344_v52, %v3338_v3 }
0x1c7e   :  { %v2474_v35 = vpop.permute.xlu0 %2473 }
0x1c7f   :  { %v2476_v15 = vsel %vm906_vm4, %v2468_v37, %v2474_v35 }
0x1c80   :  { %v2477_v16 = vadd.f32 %v2476_v15, %v6792_v14 }
0x1c82   :  { %2496 = vrot.lane.b32.xlu1 %v2477_v16, %s6277_s13  ;;  %v2488_v17 = vadd.f32 %v2487_v5, %v2477_v16 }
0x1c84   :  { %v5346_v18 = vmul.f32 -1.442695, %v2488_v17 }
0x1c86   :  { %5865 = vpow2.f32 %v5346_v18 }
0x1c90   :  { %v5866_v38 = vpop.eup %5865 }
0x1c91   :  { %v2492_v20 = vadd.f32 1.0, %v5866_v38 }
0x1c93   :  { %5867 = vrcp.f32 %v2492_v20 }
0x1c9d   :  { %v5868_v21 = vpop.eup %5867 }
0x1c9e   :  { %v2506_v27 = vsub.f32 1.0, %v5868_v21  ;;  %v2512_v29 = vmul.f32 0.0, %v5868_v21 }
0x1cf4   :  { %v2497_v22 = vpop.permute.xlu1 %2496 }
0x1cf5   :  { %v2499_v23 = vmul.f32 %v5868_v21, %v2497_v22 }
0x1cf7   :  { %2501 = vrot.lane.b32.xlu0 %v2499_v23, %s6278_s8 }
0x1d69   :  { %v2502_v24 = vpop.permute.xlu0 %2501 }
0x1d6a   :  { %v2504_v25 = vadd.f32 %v2502_v24, %v2487_v5 }
0x1d6c   :  { %5869 = vtanh.f32 %v2504_v25 }
0x1d76   :  { %v5870_v26 = vpop.eup %5869 }
0x1d77   :  { %2508 = vrot.lane.b32.xlu1 %v5870_v26, %s6279_s24 }
0x1de9   :  { %v2509_v28 = vpop.permute.xlu1 %2508 }
0x1dea   :  { %v2511_v30 = vmul.f32 %v2509_v28, %v2506_v27 }
0x1dec   :  { %v2513_v31 = vadd.f32 %v2512_v29, %v2511_v30 }
0x1dee   :  { %2515 = vrot.lane.b32.xlu0 %v2513_v31, %s6279_s24 }
0x1e60   :  { %v2516_v48 = vpop.permute.xlu0 %2515 }
0x1e61   :  { %2518 = vst.msk [vmem:[#allocation4] sm:$0x3] %vm1027_vm5, %v2516_v48  ;;  %5589 = vmatmul.mubr.msk.f32.vlgmr.msra.gmra.mrb[12].mxu0 %vm907_vm7, %v2516_v48 }
0x1e62   :  { %2520 = vst.msk [vmem:[#allocation5 + $0xc] sm:$0xc] %vm1030_vm6, %v2516_v48  ;;  %5597 = vmatpush3.msra.mxu0 %v6734_v19  ;;  %5598 = vmatprep.mubr.msk.f32.mxu0 %vm6275_vm2, %v6274_v45 }
0x1e63   :  { %5606 = vmatprep.subr.mxu0 %v6274_v45 }
0x1f34   :  { %v2589_v32 = vpop.f32.mrb[12].mxu0 }
0x1f35   :  { %2594 = vrot.lane.b32.xlu1 %v2589_v32, %s6276_s5  ;;  %v5590_v33 = vpop.f32.mrb[13].mxu0 }
0x1fa7   :  { %v2595_v36 = vpop.permute.xlu1 %2594 }
0x1fa8   :  { %v2597_v42 = vsel %vm906_vm4, %v2589_v32, %v2595_v36 }
0x1fa9   :  { %v2598_v37 = vadd.f32 %v2597_v42, %v6792_v14 }
0x1fab   :  { %2617 = vrot.lane.b32.xlu0 %v2598_v37, %s6277_s13  ;;  %v2609_v40 = vadd.f32 %v2608_v6, %v2598_v37 }
0x1fad   :  { %v5348_v41 = vmul.f32 -1.442695, %v2609_v40 }
0x1faf   :  { %5871 = vpow2.f32 %v5348_v41 }
0x1fb9   :  { %v5872_v39 = vpop.eup %5871 }
0x1fba   :  { %v2613_v44 = vadd.f32 1.0, %v5872_v39 }
0x1fbc   :  { %5873 = vrcp.f32 %v2613_v44 }
0x1fc6   :  { %v5874_v47 = vpop.eup %5873 }
0x1fc7   :  { %v2627_v53 = vsub.f32 1.0, %v5874_v47  ;;  %v2633_v55 = vmul.f32 %v5874_v47, %v2513_v31 }
0x201d   :  { %v2618_v49 = vpop.permute.xlu0 %2617 }
0x201e   :  { %v2620_v46 = vmul.f32 %v5874_v47, %v2618_v49 }
0x2020   :  { %2622 = vrot.lane.b32.xlu1 %v2620_v46, %s6278_s8 }
0x2092   :  { %v2623_v50 = vpop.permute.xlu1 %2622 }
0x2093   :  { %v2625_v51 = vadd.f32 %v2623_v50, %v2608_v6 }
0x2095   :  { %5875 = vtanh.f32 %v2625_v51 }
0x209f   :  { %v5876_v52 = vpop.eup %5875 }
0x20a0   :  { %2629 = vrot.lane.b32.xlu0 %v5876_v52, %s6279_s24 }
0x2112   :  { %v2630_v54 = vpop.permute.xlu0 %2629 }
0x2113   :  { %v2632_v56 = vmul.f32 %v2630_v54, %v2627_v53 }
0x2115   :  { %v2634_v34 = vadd.f32 %v2633_v55, %v2632_v56 }
0x2117   :  { %2636 = vrot.lane.b32.xlu1 %v2634_v34, %s6279_s24 }
0x2189   :  { %v2637_v57 = vpop.permute.xlu1 %2636 }
0x218a   :  { %2640 = vst.msk [vmem:[#allocation4 + $0x2] sm:$0x3] %vm1027_vm5, %v2637_v57  ;;  %5594 = vmatmul.mubr.msk.f32.vlgmr.msra.gmra.mrb[16].mxu1 %vm907_vm7, %v2637_v57 }
0x218b   :  { %2642 = vst.msk [vmem:[#allocation5 + $0xa] sm:$0xc] %vm1030_vm6, %v2637_v57  ;;  %5602 = vmatpush3.msra.mxu1 %v6734_v19  ;;  %5603 = vmatprep.mubr.msk.f32.mxu1 %vm6275_vm2, %v6274_v45 }
0x218c   :  { %5611 = vmatprep.subr.mxu1 %v6274_v45 }
0x225d   :  { %v2711_v58 = vpop.f32.mrb[16].mxu1 }
0x225e   :  { %2716 = vrot.lane.b32.xlu0 %v2711_v58, %s6276_s5  ;;  %v5595_v59 = vpop.f32.mrb[17].mxu1 }
0x22d0   :  { %v2717_v60 = vpop.permute.xlu0 %2716 }
0x22d1   :  { %v2719_v61 = vsel %vm906_vm4, %v2711_v58, %v2717_v60 }
0x22d2   :  { %v2720_v62 = vadd.f32 %v2719_v61, %v6792_v14 }
0x22d4   :  { %2739 = vrot.lane.b32.xlu1 %v2720_v62, %s6277_s13  ;;  %v2731_v43 = vadd.f32 %v6768_v0, %v2720_v62 }
0x22d6   :  { %v5351_v63 = vmul.f32 -1.442695, %v2731_v43 }
0x22d8   :  { %5877 = vpow2.f32 %v5351_v63 }
0x22e2   :  { %v5878_v2 = vpop.eup %5877 }
0x22e3   :  { %v2735_v3 = vadd.f32 1.0, %v5878_v2 }
0x22e5   :  { %5879 = vrcp.f32 %v2735_v3 }
0x22ef   :  { %v5880_v5 = vpop.eup %5879 }
0x22f0   :  { %v2749_v16 = vsub.f32 1.0, %v5880_v5  ;;  %v2755_v18 = vmul.f32 %v5880_v5, %v2634_v34 }
0x2346   :  { %v2740_v6 = vpop.permute.xlu1 %2739 }
0x2347   :  { %v2742_v12 = vmul.f32 %v5880_v5, %v2740_v6 }
0x2349   :  { %2744 = vrot.lane.b32.xlu0 %v2742_v12, %s6278_s8 }
0x23bb   :  { %v2745_v13 = vpop.permute.xlu0 %2744 }
0x23bc   :  { %v2747_v35 = vadd.f32 %v2745_v13, %v6768_v0 }
0x23be   :  { %5881 = vtanh.f32 %v2747_v35 }
0x23c8   :  { %v5882_v15 = vpop.eup %5881 }
0x23c9   :  { %2751 = vrot.lane.b32.xlu1 %v5882_v15, %s6279_s24 }
0x243b   :  { %v2752_v17 = vpop.permute.xlu1 %2751 }
0x243c   :  { %v2754_v38 = vmul.f32 %v2752_v17, %v2749_v16 }
0x243e   :  { %v2756_v20 = vadd.f32 %v2755_v18, %v2754_v38 }
0x2440   :  { %2758 = vrot.lane.b32.xlu0 %v2756_v20, %s6279_s24 }
0x24b2   :  { %v2759_v21 = vpop.permute.xlu0 %2758 }
0x24b3   :  { %2762 = vst.msk [vmem:[#allocation4 + $0x4] sm:$0x3] %vm1027_vm5, %v2759_v21  ;;  %5599 = vmatmul.mubr.msk.f32.vlgmr.msra.gmra.mrb[14].mxu0 %vm907_vm7, %v2759_v21 }
0x24b4   :  { %2764 = vst.msk [vmem:[#allocation5 + $0x8] sm:$0xc] %vm1030_vm6, %v2759_v21  ;;  %5607 = vmatpush3.msra.mxu0 %v6734_v19  ;;  %5608 = vmatprep.mubr.msk.f32.mxu0 %vm6275_vm2, %v6274_v45 }
0x24b5   :  { %5616 = vmatprep.subr.mxu0 %v6274_v45 }
0x2586   :  { %v2833_v0 = vpop.f32.mrb[14].mxu0 }
0x2587   :  { %2838 = vrot.lane.b32.xlu1 %v2833_v0, %s6276_s5  ;;  %v5600_v22 = vpop.f32.mrb[15].mxu0 }
0x25f9   :  { %v2839_v23 = vpop.permute.xlu1 %2838 }
0x25fa   :  { %v2841_v24 = vsel %vm906_vm4, %v2833_v0, %v2839_v23 }
0x25fb   :  { %v2842_v25 = vadd.f32 %v2841_v24, %v6792_v14 }
0x25fd   :  { %2861 = vrot.lane.b32.xlu0 %v2842_v25, %s6277_s13  ;;  %v2853_v26 = vadd.f32 %v6771_v1, %v2842_v25 }
0x25ff   :  { %v5353_v27 = vmul.f32 -1.442695, %v2853_v26 }
0x2601   :  { %5883 = vpow2.f32 %v5353_v27 }
0x260b   :  { %v5884_v28 = vpop.eup %5883 }
0x260c   :  { %v2857_v29 = vadd.f32 1.0, %v5884_v28 }
0x260e   :  { %5885 = vrcp.f32 %v2857_v29 }
0x2618   :  { %v5886_v30 = vpop.eup %5885 }
0x2619   :  { %v2871_v42 = vsub.f32 1.0, %v5886_v30  ;;  %v2877_v40 = vmul.f32 %v5886_v30, %v2756_v20 }
0x266f   :  { %v2862_v31 = vpop.permute.xlu0 %2861 }
0x2670   :  { %v2864_v48 = vmul.f32 %v5886_v30, %v2862_v31 }
0x2672   :  { %2866 = vrot.lane.b32.xlu1 %v2864_v48, %s6278_s8 }
0x26e4   :  { %v2867_v32 = vpop.permute.xlu1 %2866 }
0x26e5   :  { %v2869_v33 = vadd.f32 %v2867_v32, %v6771_v1 }
0x26e7   :  { %5887 = vtanh.f32 %v2869_v33 }
0x26f1   :  { %v5888_v36 = vpop.eup %5887 }
0x26f2   :  { %2873 = vrot.lane.b32.xlu0 %v5888_v36, %s6279_s24 }
0x2764   :  { %v2874_v37 = vpop.permute.xlu0 %2873 }
0x2765   :  { %v2876_v41 = vmul.f32 %v2874_v37, %v2871_v42 }
0x2767   :  { %v2878_v39 = vadd.f32 %v2877_v40, %v2876_v41 }
0x2769   :  { %2880 = vrot.lane.b32.xlu1 %v2878_v39, %s6279_s24 }
0x27db   :  { %v2881_v44 = vpop.permute.xlu1 %2880 }
0x27dc   :  { %2884 = vst.msk [vmem:[#allocation4 + $0x6] sm:$0x3] %vm1027_vm5, %v2881_v44  ;;  %5604 = vmatmul.mubr.msk.f32.vlgmr.msra.gmra.mrb[18].mxu1 %vm907_vm7, %v2881_v44 }
0x27dd   :  { %2886 = vst.msk [vmem:[#allocation5 + $0x6] sm:$0xc] %vm1030_vm6, %v2881_v44  ;;  %5612 = vmatpush3.msra.mxu1 %v6734_v19  ;;  %5613 = vmatprep.mubr.msk.f32.mxu1 %vm6275_vm2, %v6274_v45 }
0x27de   :  { %5621 = vmatprep.subr.mxu1 %v6274_v45 }
0x28af   :  { %v2955_v1 = vpop.f32.mrb[18].mxu1 }
0x28b0   :  { %2960 = vrot.lane.b32.xlu0 %v2955_v1, %s6276_s5  ;;  %v5605_v47 = vpop.f32.mrb[19].mxu1 }
0x2922   :  { %v2961_v49 = vpop.permute.xlu0 %2960 }
0x2923   :  { %v2963_v46 = vsel %vm906_vm4, %v2955_v1, %v2961_v49 }
0x2924   :  { %v2964_v50 = vadd.f32 %v2963_v46, %v6792_v14 }
0x2926   :  { %2983 = vrot.lane.b32.xlu1 %v2964_v50, %s6277_s13  ;;  %v2975_v51 = vadd.f32 %v6778_v7, %v2964_v50 }
0x2928   :  { %v5356_v52 = vmul.f32 -1.442695, %v2975_v51 }
0x292a   :  { %5889 = vpow2.f32 %v5356_v52 }
0x2934   :  { %v5890_v53 = vpop.eup %5889 }
0x2935   :  { %v2979_v54 = vadd.f32 1.0, %v5890_v53 }
0x2937   :  { %5891 = vrcp.f32 %v2979_v54 }
0x2941   :  { %v5892_v55 = vpop.eup %5891 }
0x2942   :  { %v2993_v60 = vsub.f32 1.0, %v5892_v55  ;;  %v2999_v62 = vmul.f32 %v5892_v55, %v2878_v39 }
0x2998   :  { %v2984_v56 = vpop.permute.xlu1 %2983 }
0x2999   :  { %v2986_v34 = vmul.f32 %v5892_v55, %v2984_v56 }
0x299b   :  { %2988 = vrot.lane.b32.xlu0 %v2986_v34, %s6278_s8 }
0x2a0d   :  { %v2989_v57 = vpop.permute.xlu0 %2988 }
0x2a0e   :  { %v2991_v58 = vadd.f32 %v2989_v57, %v6778_v7 }
0x2a10   :  { %5893 = vtanh.f32 %v2991_v58 }
0x2a1a   :  { %v5894_v59 = vpop.eup %5893 }
0x2a1b   :  { %2995 = vrot.lane.b32.xlu1 %v5894_v59, %s6279_s24 }
0x2a8d   :  { %v2996_v61 = vpop.permute.xlu1 %2995 }
0x2a8e   :  { %v2998_v43 = vmul.f32 %v2996_v61, %v2993_v60 }
0x2a90   :  { %v3000_v63 = vadd.f32 %v2999_v62, %v2998_v43  ;;  %v267_v43 = vld [vmem:[%s7261_s7] sm:$0xff] }
0x2a92   :  { %3002 = vrot.lane.b32.xlu0 %v3000_v63, %s6279_s24 }
0x2b04   :  { %v3003_v2 = vpop.permute.xlu0 %3002 }
0x2b05   :  { %3006 = vst.msk [vmem:[#allocation4 + $0x8] sm:$0x3] %vm1027_vm5, %v3003_v2  ;;  %5609 = vmatmul.mubr.msk.f32.vlgmr.msra.gmra.mrb[16].mxu0 %vm907_vm7, %v3003_v2 }
0x2b06   :  { %3008 = vst.msk [vmem:[#allocation5 + $0x4] sm:$0xc] %vm1030_vm6, %v3003_v2  ;;  %5617 = vmatpush3.msra.mxu0 %v6734_v19  ;;  %5618 = vmatprep.mubr.msk.f32.mxu0 %vm6275_vm2, %v6274_v45 }
0x2bd8   :  { %v3077_v7 = vpop.f32.mrb[16].mxu0 }
0x2bd9   :  { %3082 = vrot.lane.b32.xlu1 %v3077_v7, %s6276_s5  ;;  %v5610_v3 = vpop.f32.mrb[17].mxu0 }
0x2c4b   :  { %v3083_v5 = vpop.permute.xlu1 %3082 }
0x2c4c   :  { %v3085_v6 = vsel %vm906_vm4, %v3077_v7, %v3083_v5 }
0x2c4d   :  { %v3086_v12 = vadd.f32 %v3085_v6, %v6792_v14 }
0x2c4f   :  { %3105 = vrot.lane.b32.xlu0 %v3086_v12, %s6277_s13  ;;  %v3097_v13 = vadd.f32 %v6781_v9, %v3086_v12 }
0x2c51   :  { %v5358_v35 = vmul.f32 -1.442695, %v3097_v13  ;;  %v268_v13 = vld [vmem:[%s7262_s10] sm:$0xff] }
0x2c53   :  { %5895 = vpow2.f32 %v5358_v35 }
0x2c5d   :  { %v5896_v19 = vpop.eup %5895 }
0x2c5e   :  { %v3101_v15 = vadd.f32 1.0, %v5896_v19  ;;  %v6918_v19 = vld [vmem:[#allocation5 + $0x8] sm:$0x3] }
0x2c60   :  { %5897 = vrcp.f32 %v3101_v15 }
0x2c6a   :  { %v5898_v16 = vpop.eup %5897 }
0x2c6b   :  { %v3115_v0 = vsub.f32 1.0, %v5898_v16  ;;  %v3121_v23 = vmul.f32 %v5898_v16, %v3000_v63  ;;  %v269_v63 = vld [vmem:[%s7262_s10 + $0x8] sm:$0xff] }
0x2c6c   :  { %5626 = vmatprep.subr.mxu0 %v269_v63 }
0x2cc1   :  { %v3106_v17 = vpop.permute.xlu0 %3105 }
0x2cc2   :  { %v3108_v18 = vmul.f32 %v5898_v16, %v3106_v17  ;;  %v6922_v16 = vld [vmem:[#allocation4 + $0x6] sm:$0x3]  ;;  %v6926_v17 = vld [vmem:[#allocation5 + $0xa] sm:$0x3] }
0x2cc4   :  { %3110 = vrot.lane.b32.xlu1 %v3108_v18, %s6278_s8  ;;  %v6928_v18 = vld [vmem:[#allocation5 + $0xc] sm:$0x3] }
0x2d36   :  { %v3111_v38 = vpop.permute.xlu1 %3110 }
0x2d37   :  { %v3113_v20 = vadd.f32 %v3111_v38, %v6781_v9  ;;  %v6930_v38 = vld [vmem:[#allocation5 + $0x6] sm:$0x3] }
0x2d39   :  { %5899 = vtanh.f32 %v3113_v20  ;;  %v3496_v20 = vcombine.low %v6918_v19, %v6926_v17 }
0x2d43   :  { %v5900_v21 = vpop.eup %5899 }
0x2d44   :  { %3117 = vrot.lane.b32.xlu0 %v5900_v21, %s6279_s24  ;;  %v6934_v21 = vld [vmem:[#allocation4 + $0x2] sm:$0x3] }
0x2db6   :  { %v3118_v22 = vpop.permute.xlu0 %3117 }
0x2db7   :  { %v3120_v24 = vmul.f32 %v3118_v22, %v3115_v0  ;;  %v6936_v0 = vld [vmem:[#allocation4 + $0x4] sm:$0x3] }
0x2db9   :  { %v3122_v25 = vadd.f32 %v3121_v23, %v3120_v24  ;;  %v6940_v23 = vld [vmem:[#allocation5 + $0xe] sm:$0x3]  ;;  %v3601_v24 = vcombine.low %v6936_v0, %v6922_v16 }
0x2dbb   :  { %3124 = vrot.lane.b32.xlu1 %v3122_v25, %s6279_s24 }
0x2e2d   :  { %v3125_v26 = vpop.permute.xlu1 %3124 }
0x2e2e   :  { %3128 = vst.msk [vmem:[#allocation4 + $0xa] sm:$0x3] %vm1027_vm5, %v3125_v26  ;;  %5614 = vmatmul.mubr.msk.f32.vlgmr.msra.gmra.mrb[20].mxu1 %vm907_vm7, %v3125_v26 }
0x2e2f   :  { %3130 = vst.msk [vmem:[#allocation5 + $0x2] sm:$0xc] %vm1030_vm6, %v3125_v26  ;;  %5623 = vmatprep.mubr.msk.f32.mxu1 %vm6275_vm2, %v6274_v45  ;;  %5622 = vmatpush3.msra.mxu1 %v267_v43 }
0x2e36   :  { %v6920_v15 = vld [vmem:[#allocation5 + $0x4] sm:$0x3] }
0x2e37   :  { %v3480_v22 = vcombine.low %v6920_v15, %v6930_v38 }
0x2f01   :  { %v3199_v9 = vpop.f32.mrb[20].mxu1 }
0x2f02   :  { %3204 = vrot.lane.b32.xlu0 %v3199_v9, %s6276_s5  ;;  %v5615_v27 = vpop.f32.mrb[21].mxu1 }
0x2f03   :  { %v6950_v27 = vld [vmem:[#allocation4] sm:$0x3] }
0x2f74   :  { %v3205_v28 = vpop.permute.xlu0 %3204 }
0x2f75   :  { %v3207_v29 = vsel %vm906_vm4, %v3199_v9, %v3205_v28  ;;  %v3497_v9 = vcombine.low %v6928_v18, %v6940_v23 }
0x2f76   :  { %v3208_v30 = vadd.f32 %v3207_v29, %v6792_v14  ;;  %v3600_v29 = vcombine.low %v6950_v27, %v6934_v21 }
0x2f78   :  { %3227 = vrot.lane.b32.xlu1 %v3208_v30, %s6277_s13  ;;  %v3219_v31 = vadd.f32 %v6784_v10, %v3208_v30  ;;  %v3504_v30 = vrot.slane %v3496_v20, %v6495_v8 }
0x2f7a   :  { %v5361_v48 = vmul.f32 -1.442695, %v3219_v31 }
0x2f7c   :  { %5901 = vpow2.f32 %v5361_v48  ;;  %v3494_v48 = vrot.slane %v3480_v22, %v6495_v8 }
0x2f86   :  { %v5902_v32 = vpop.eup %5901 }
0x2f87   :  { %v3223_v33 = vadd.f32 1.0, %v5902_v32  ;;  %v3615_v32 = vrot.slane %v3601_v24, %v6495_v8 }
0x2f89   :  { %5903 = vrcp.f32 %v3223_v33 }
0x2f93   :  { %v5904_v36 = vpop.eup %5903 }
0x2f94   :  { %v3237_v44 = vsub.f32 1.0, %v5904_v36  ;;  %v3243_v47 = vmul.f32 %v5904_v36, %v3122_v25 }
0x2fea   :  { %v3228_v42 = vpop.permute.xlu1 %3227 }
0x2feb   :  { %v3230_v37 = vmul.f32 %v5904_v36, %v3228_v42  ;;  %v3511_v36 = vrot.slane %v3497_v9, %v6495_v8 }
0x2fed   :  { %3232 = vrot.lane.b32.xlu0 %v3230_v37, %s6278_s8  ;;  %v3608_v37 = vrot.slane %v3600_v29, %v6495_v8 }
0x305f   :  { %v3233_v40 = vpop.permute.xlu0 %3232 }
0x3060   :  { %v3235_v41 = vadd.f32 %v3233_v40, %v6784_v10  ;;  %v6964_v40 = vld [vmem:[#allocation4 + $0xa] sm:$0x3] }
0x3062   :  { %5905 = vtanh.f32 %v3235_v41 }
0x306c   :  { %v5906_v39 = vpop.eup %5905 }
0x306d   :  { %3239 = vrot.lane.b32.xlu1 %v5906_v39, %s6279_s24  ;;  %v3512_v39 = vcombine.low %v3504_v30, %v3511_v36 }
0x30df   :  { %v3240_v1 = vpop.permute.xlu1 %3239 }
0x30e0   :  { %v3242_v49 = vmul.f32 %v3240_v1, %v3237_v44  ;;  %v3616_v1 = vcombine.low %v3608_v37, %v3615_v32 }
0x30e2   :  { %v3244_v46 = vadd.f32 %v3243_v47, %v3242_v49  ;;  %v6971_v47 = vld [vmem:[#allocation4 + $0x8] sm:$0x3] }
0x30e3   :  { %v3617_v49 = vcombine.low %v6971_v47, %v6964_v40 }
0x30e4   :  { %3246 = vrot.lane.b32.xlu0 %v3244_v46, %s6279_s24 }
0x3156   :  { %v3247_v50 = vpop.permute.xlu0 %3246 }
0x3157   :  { %3250 = vst.msk [vmem:[#allocation4 + $0xc] sm:$0x3] %vm1027_vm5, %v3247_v50  ;;  %5619 = vmatmul.mubr.msk.f32.vlgmr.msra.gmra.mrb[18].mxu0 %vm907_vm7, %v3247_v50 }
0x3158   :  { %3252 = vst.msk [vmem:[#allocation5] sm:$0xc] %vm1030_vm6, %v3247_v50  ;;  %5627 = vmatpush3.msra.mxu0 %v269_v63  ;;  %v3625_v50 = vrot.slane %v3617_v49, %v6495_v8 }
0x3159   :  { %5631 = vmatprep.subr.mxu0 %v268_v13 }
0x315e   :  { %v6966_v41 = vld [vmem:[#allocation4 + $0xc] sm:$0x3] }
0x315f   :  { %v6946_v26 = vld [vmem:[#allocation5 + $0x2] sm:$0x3] }
0x322a   :  { %v3321_v51 = vpop.f32.mrb[18].mxu0 }
0x322b   :  { %3326 = vrot.lane.b32.xlu1 %v3321_v51, %s6276_s5  ;;  %v5620_v10 = vpop.f32.mrb[19].mxu0 }
0x329d   :  { %v3327_v52 = vpop.permute.xlu1 %3326 }
0x329e   :  { %v3329_v53 = vsel %vm906_vm4, %v3321_v51, %v3327_v52 }
0x329f   :  { %v3330_v54 = vadd.f32 %v3329_v53, %v6792_v14  ;;  %v5364_v53 = vld [vmem:[%s7263_s11] ss:$0 sm:$0xff] }
0x32a1   :  { %3349 = vrot.lane.b32.xlu0 %v3330_v54, %s6277_s13  ;;  %v3341_v55 = vadd.f32 %v6787_v11, %v3330_v54 }
0x32a3   :  { %v5363_v56 = vmul.f32 -1.442695, %v3341_v55 }
0x32a5   :  { %5907 = vpow2.f32 %v5363_v56 }
0x32af   :  { %v5908_v34 = vpop.eup %5907 }
0x32b0   :  { %v3345_v57 = vadd.f32 1.0, %v5908_v34 }
0x32b2   :  { %5909 = vrcp.f32 %v3345_v57 }
0x32bc   :  { %v5910_v58 = vpop.eup %5909 }
0x32bd   :  { %v3359_v2 = vsub.f32 1.0, %v5910_v58  ;;  %v3365_v3 = vmul.f32 %v5910_v58, %v3244_v46 }
0x3313   :  { %v3350_v59 = vpop.permute.xlu0 %3349 }
0x3314   :  { %v3352_v60 = vmul.f32 %v5910_v58, %v3350_v59 }
0x3316   :  { %3354 = vrot.lane.b32.xlu1 %v3352_v60, %s6278_s8 }
0x3388   :  { %v3355_v61 = vpop.permute.xlu1 %3354 }
0x3389   :  { %v3357_v62 = vadd.f32 %v3355_v61, %v6787_v11 }
0x338b   :  { %5911 = vtanh.f32 %v3357_v62 }
0x3395   :  { %v5912_v14 = vpop.eup %5911 }
0x3396   :  { %3361 = vrot.lane.b32.xlu0 %v5912_v14, %s6279_s24 }
0x3408   :  { %v3362_v7 = vpop.permute.xlu0 %3361 }
0x3409   :  { %v3364_v5 = vmul.f32 %v3362_v7, %v3359_v2 }
0x340b   :  { %v3366_v6 = vadd.f32 %v3365_v3, %v3364_v5 }
0x340d   :  { %3368 = vrot.lane.b32.xlu1 %v3366_v6, %s6279_s24  ;;  %v3396_v12 = vrot.slane %v3366_v6, 2 }
0x340f   :  { %3397 = vrot.lane.b32.xlu0 %v3396_v12, %s6279_s24 }
0x347f   :  { %v3369_v11 = vpop.permute.xlu1 %3368 }
0x3480   :  { %3372 = vst.msk [vmem:[#allocation4 + $0xe] sm:$0x3] %vm1027_vm5, %v3369_v11 }
0x3481   :  { %3373 = vst.msk [vmem:[#allocation5 - $0x2] sm:$0xc] %vm1030_vm6, %v3369_v11  ;;  %v3398_v35 = vpop.permute.xlu0 %3397 }
0x3482   :  { %5624 = vmatmul.mubr.msk.f32.vlgmr.msra.gmra.mrb[22].mxu1 %vm907_vm7, %v3398_v35  ;;  %v5370_v35 = vld [vmem:[%s7264_s17] ss:$0 sm:$0xff] }
0x3483   :  { %5640 = vmatprep.mubr.msk.f32.mxu1 %vm6275_vm2, %v6274_v45 }
0x3487   :  { %v6960_v33 = vld [vmem:[#allocation4 + $0xe] sm:$0x3] }
0x3488   :  { %v6944_v25 = vld [vmem:[#allocation5] sm:$0x3]  ;;  %v3618_v44 = vcombine.low %v6966_v41, %v6960_v33 }
0x3489   :  { %v3479_v28 = vcombine.low %v6944_v25, %v6946_v26 }
0x348a   :  { %v3632_v46 = vrot.slane %v3618_v44, %v6495_v8 }
0x348b   :  { %v3487_v31 = vrot.slane %v3479_v28, %v6495_v8 }
0x348c   :  { %v3633_v51 = vcombine.low %v3625_v50, %v3632_v46 }
0x348d   :  { %v3495_v42 = vcombine.low %v3487_v31, %v3494_v48 }
0x348f   :  { %5628 = vmatprep.mubr.msk.f32.mxu0 %vm907_vm7, %v3495_v42 }
0x3490   :  { %5629 = vmatmul.mubr.msk.f32.vlgmr.msra.gmra.mrb[20].mxu0 %vm907_vm7, %v3512_v39 }
0x3491   :  { %5632 = vmatpush3.msra.mxu0 %v268_v13  ;;  %5633 = vmatprep.mubr.msk.f32.mxu0 %vm907_vm7, %v3616_v1 }
0x3498   :  { %5634 = vmatmul.mubr.msk.f32.vlgmr.msra.gmra.mrb[20].mxu0 %vm907_vm7, %v3633_v51 }
0x3499   :  { %5647 = vmatprep.mubr.msk.f32.mxu0 %vm6275_vm2, %v6274_v45 }
0x3555   :  { %v3467_v10 = vpop.f32.mrb[22].mxu1 }
0x3556   :  { %v5625_v52 = vpop.f32.mrb[23].mxu1  ;;  %v3468_v55 = vadd.f32 %v5364_v53, %v3467_v10 }
0x356b   :  { %v5635_v54 = vpop.f32.mrb[20].mxu0 }
0x356c   :  { %v3732_v56 = vcombine.high %v5635_v54, %v5635_v54  ;;  %v3739_v34 = vrot.slane %v5635_v54, %v6495_v8  ;;  %v3704_v57 = vpop.f32.mrb[21].mxu0 }
0x356d   :  { %v3715_v58 = vcombine.high %v3704_v57, %v3704_v57  ;;  %v3722_v59 = vrot.slane %v3704_v57, %v6495_v8  ;;  %v6280_v57 = vmov 0.0|0.0  }
0x356e   :  { %v3746_v60 = vrot.slane %v3732_v56, %v6495_v8  ;;  %v3747_v61 = vcombine.high %v3739_v34, %v3739_v34  ;;  %v3761_v62 = vadd.f32 %v3739_v34, %v3468_v55  ;;  %v273_v56 = vld [vmem:[%s7265_s15 + $0x8] sm:$0xff]  ;;  %v277_v34 = vld [vmem:[%s7266_s16 + $0x10] sm:$0xff]  ;;  %5713 = vmatprep.subr.bf16.mxu1 %v6280_v57  ;;  %5720 = vmatprep.subr.bf16.mxu0 %v6280_v57 }
0x356f   :  { %v3729_v14 = vrot.slane %v3715_v58, %v6495_v8  ;;  %v3730_v43 = vcombine.high %v3722_v59, %v3722_v59  ;;  %v3757_v63 = vadd.f32 %v3722_v59, %v3468_v55  ;;  %v280_v59 = vld [vmem:[%s7266_s16 + $0x28] sm:$0xff] }
0x3570   :  { %v3748_v2 = vcombine.high %v3746_v60, %v3746_v60  ;;  %v3762_v7 = vadd.f32 %v3747_v61, %v3468_v55  ;;  %v3763_v3 = vadd.f32 %v3746_v60, %v3468_v55  ;;  %5913 = vtanh.f32 %v3761_v62 }
0x3571   :  { %v3731_v5 = vcombine.high %v3729_v14, %v3729_v14  ;;  %v3758_v6 = vadd.f32 %v3730_v43, %v3468_v55  ;;  %v3759_v12 = vadd.f32 %v3729_v14, %v3468_v55  ;;  %5915 = vtanh.f32 %v3757_v63 }
0x3572   :  { %v3764_v13 = vadd.f32 %v3748_v2, %v3468_v55  ;;  %5917 = vtanh.f32 %v3762_v7  ;;  %v5721_v60 = vpack.c.bf16 %v280_v59, %v277_v34 }
0x3573   :  { %v3760_v11 = vadd.f32 %v3731_v5, %v3468_v55  ;;  %5919 = vtanh.f32 %v3758_v6  ;;  %v272_v55 = vld [vmem:[%s7265_s15] sm:$0xff] }
0x3574   :  { %5921 = vtanh.f32 %v3759_v12  ;;  %v5714_v58 = vpack.c.bf16 %v273_v56, %v272_v55  ;;  %5722 = vmatpush3.bf16.msra.mxu0 %v5721_v60 }
0x3575   :  { %5923 = vtanh.f32 %v3760_v11  ;;  %5726 = vmatprep.subr.bf16.mxu0 %v6280_v57 }
0x3576   :  { %5925 = vtanh.f32 %v3763_v3  ;;  %5715 = vmatpush3.bf16.msra.mxu1 %v5714_v58 }
0x3577   :  { %5927 = vtanh.f32 %v3764_v13 }
0x357a   :  { %v5914_v20 = vpop.eup %5913 }
0x357b   :  { %v5916_v22 = vpop.eup %5915  ;;  %v3783_v24 = vmul.f32 %v5914_v20, %v5370_v35 }
0x357c   :  { %v5918_v9 = vpop.eup %5917  ;;  %v3779_v28 = vmul.f32 %v5916_v22, %v5370_v35 }
0x357d   :  { %v3800_v29 = vsel %vm3787_vm8, %v3783_v24, 0.0  ;;  %v3784_v31 = vmul.f32 %v5918_v9, %v5370_v35  ;;  %v5920_v48 = vpop.eup %5919 }
0x357e   :  { %3801 = vadd.xlane.f32.xlu0 %v3800_v29  ;;  %v3788_v30 = vsel %vm3787_vm8, %v3779_v28, 0.0  ;;  %v5922_v32 = vpop.eup %5921  ;;  %v3780_v36 = vmul.f32 %v5920_v48, %v5370_v35 }
0x357f   :  { %3789 = vadd.xlane.f32.xlu1 %v3788_v30  ;;  %v5924_v42 = vpop.eup %5923  ;;  %v3803_v44 = vsel %vm3787_vm8, %v3784_v31, 0.0  ;;  %v3781_v1 = vmul.f32 %v5922_v32, %v5370_v35 }
0x3580   :  { %v5926_v37 = vpop.eup %5925  ;;  %v3791_v39 = vsel %vm3787_vm8, %v3780_v36, 0.0  ;;  %v3782_v49 = vmul.f32 %v5924_v42, %v5370_v35 }
0x3581   :  { %v5928_v46 = vpop.eup %5927  ;;  %v3794_v50 = vsel %vm3787_vm8, %v3781_v1, 0.0  ;;  %v3785_v10 = vmul.f32 %v5926_v37, %v5370_v35 }
0x3582   :  { %3792 = vadd.xlane.f32.xlu0 %v3791_v39  ;;  %v3797_v51 = vsel %vm3787_vm8, %v3782_v49, 0.0  ;;  %v3786_v52 = vmul.f32 %v5928_v46, %v5370_v35 }
0x3583   :  { %3804 = vadd.xlane.f32.xlu1 %v3803_v44  ;;  %v3806_v53 = vsel %vm3787_vm8, %v3785_v10, 0.0 }
0x3584   :  { %v3809_v54 = vsel %vm3787_vm8, %v3786_v52, 0.0 }
0x3586   :  { %3795 = vadd.xlane.f32.xlu0 %v3794_v50 }
0x3587   :  { %3798 = vadd.xlane.f32.xlu1 %v3797_v51 }
0x358a   :  { %3807 = vadd.xlane.f32.xlu0 %v3806_v53 }
0x358b   :  { %3810 = vadd.xlane.f32.xlu1 %v3809_v54 }
0x360b   :  { %v3802_v61 = vpop.xlane.xlu0 %3801 }
0x360c   :  { %v3790_v62 = vpop.xlane.xlu1 %3789  ;;  %v3816_v5 = vsel %vm902_vm3, %v3802_v61, -inf }
0x360d   :  { %v3812_v6 = vsel %vm902_vm3, %v3790_v62, -inf }
0x360e   :  { %v3817_v9 = vmax.f32 %v3812_v6, %v3816_v5 }
0x360f   :  { %v3793_v14 = vpop.xlane.xlu0 %3792 }
0x3610   :  { %v3805_v43 = vpop.xlane.xlu1 %3804  ;;  %v3813_v7 = vsel %vm902_vm3, %v3793_v14, -inf }
0x3611   :  { %v3818_v3 = vsel %vm902_vm3, %v3805_v43, -inf }
0x3612   :  { %v3819_v12 = vmax.f32 %v3813_v7, %v3818_v3 }
0x3613   :  { %v3796_v63 = vpop.xlane.xlu0 %3795 }
0x3614   :  { %v3799_v2 = vpop.xlane.xlu1 %3798  ;;  %v3814_v35 = vsel %vm902_vm3, %v3796_v63, -inf  ;;  %v3824_v30 = vmax.f32 %v3817_v9, %v3819_v12 }
0x3615   :  { %v3815_v20 = vsel %vm902_vm3, %v3799_v2, -inf }
0x3617   :  { %v3808_v13 = vpop.xlane.xlu0 %3807 }
0x3618   :  { %v3811_v11 = vpop.xlane.xlu1 %3810  ;;  %v3820_v22 = vsel %vm902_vm3, %v3808_v13, -inf }
0x3619   :  { %v3822_v24 = vsel %vm902_vm3, %v3811_v11, -inf  ;;  %v3821_v28 = vmax.f32 %v3814_v35, %v3820_v22 }
0x361a   :  { %v3823_v29 = vmax.f32 %v3815_v20, %v3822_v24 }
0x361c   :  { %v3825_v31 = vmax.f32 %v3821_v28, %v3823_v29 }
0x361e   :  { %v3826_v48 = vmax.f32 %v3824_v30, %v3825_v31 }
0x3620   :  { %v3827_v32 = vsub.f32 %v3790_v62, %v3826_v48  ;;  %v3828_v36 = vsub.f32 %v3793_v14, %v3826_v48  ;;  %v3829_v42 = vsub.f32 %v3796_v63, %v3826_v48  ;;  %v3830_v37 = vsub.f32 %v3799_v2, %v3826_v48 }
0x3621   :  { %v3831_v39 = vsub.f32 %v3802_v61, %v3826_v48  ;;  %v3832_v46 = vsub.f32 %v3805_v43, %v3826_v48  ;;  %v3833_v51 = vsub.f32 %v3808_v13, %v3826_v48  ;;  %v3834_v52 = vsub.f32 %v3811_v11, %v3826_v48 }
0x3622   :  { %v3835_v44 = vmul.f32 1.442695, %v3827_v32  ;;  %v3837_v1 = vmul.f32 1.442695, %v3828_v36  ;;  %v3839_v49 = vmul.f32 1.442695, %v3829_v42 }
0x3623   :  { %v3841_v50 = vmul.f32 1.442695, %v3830_v37  ;;  %v3843_v10 = vmul.f32 1.442695, %v3831_v39  ;;  %v3845_v53 = vmul.f32 1.442695, %v3832_v46 }
0x3624   :  { %5929 = vpow2.f32 %v3835_v44  ;;  %v3847_v54 = vmul.f32 1.442695, %v3833_v51  ;;  %v3849_v55 = vmul.f32 1.442695, %v3834_v52 }
0x3625   :  { %5931 = vpow2.f32 %v3837_v1 }
0x3626   :  { %5933 = vpow2.f32 %v3839_v49 }
0x3627   :  { %5935 = vpow2.f32 %v3841_v50 }
0x3628   :  { %5937 = vpow2.f32 %v3843_v10 }
0x3629   :  { %5939 = vpow2.f32 %v3845_v53  ;;  %v276_v53 = vld [vmem:[%s7266_s16 + $0x8] sm:$0xff] }
0x362a   :  { %5941 = vpow2.f32 %v3847_v54 }
0x362b   :  { %5943 = vpow2.f32 %v3849_v55 }
0x362e   :  { %v5930_v56 = vpop.eup %5929 }
0x362f   :  { %v5932_v34 = vpop.eup %5931  ;;  %v3851_v58 = vsel %vm902_vm3, %v5930_v56, 0.0 }
0x3630   :  { %v5934_v59 = vpop.eup %5933  ;;  %v3852_v60 = vsel %vm902_vm3, %v5932_v34, 0.0 }
0x3631   :  { %v5936_v61 = vpop.eup %5935  ;;  %v3853_v62 = vadd.f32 %v3852_v60, %v3851_v58  ;;  %v3854_v14 = vsel %vm902_vm3, %v5934_v59, 0.0 }
0x3632   :  { %v5938_v43 = vpop.eup %5937  ;;  %v3856_v2 = vsel %vm902_vm3, %v5936_v61, 0.0 }
0x3633   :  { %v3855_v63 = vadd.f32 %v3854_v14, %v3853_v62  ;;  %v5940_v7 = vpop.eup %5939  ;;  %v3858_v5 = vsel %vm902_vm3, %v5938_v43, 0.0 }
0x3634   :  { %v5942_v6 = vpop.eup %5941  ;;  %v3860_v13 = vsel %vm902_vm3, %v5940_v7, 0.0 }
0x3635   :  { %v3857_v3 = vadd.f32 %v3856_v2, %v3855_v63  ;;  %v5944_v11 = vpop.eup %5943  ;;  %v3862_v20 = vsel %vm902_vm3, %v5942_v6, 0.0 }
0x3636   :  { %v3864_v24 = vsel %vm902_vm3, %v5944_v11, 0.0 }
0x3637   :  { %v3859_v12 = vadd.f32 %v3858_v5, %v3857_v3 }
0x3639   :  { %v3861_v35 = vadd.f32 %v3860_v13, %v3859_v12 }
0x363b   :  { %v3863_v22 = vadd.f32 %v3862_v20, %v3861_v35 }
0x363d   :  { %v3865_v9 = vadd.f32 %v3864_v24, %v3863_v22 }
0x363f   :  { %5945 = vrcp.f32 %v3865_v9 }
0x3649   :  { %v5946_v28 = vpop.eup %5945 }
0x364a   :  { %v3867_v29 = vmul.f32 %v5946_v28, %v5930_v56  ;;  %v3868_v30 = vmul.f32 %v5946_v28, %v5932_v34  ;;  %v3869_v31 = vmul.f32 %v5946_v28, %v5934_v59  ;;  %v3870_v48 = vmul.f32 %v5946_v28, %v5936_v61 }
0x364b   :  { %v3871_v32 = vmul.f32 %v5946_v28, %v5938_v43  ;;  %v3872_v39 = vmul.f32 %v5946_v28, %v5940_v7  ;;  %v3873_v46 = vmul.f32 %v5946_v28, %v5942_v6  ;;  %v3874_v54 = vmul.f32 %v5946_v28, %v5944_v11  ;;  %v275_v28 = vld [vmem:[%s7266_s16] sm:$0xff] }
0x364c   :  { %v3898_v36 = vmul.f32 %v3867_v29, %v6944_v25  ;;  %v3899_v42 = vmul.f32 %v3868_v30, %v6946_v26  ;;  %v3900_v37 = vmul.f32 %v3869_v31, %v6920_v15  ;;  %v3901_v44 = vmul.f32 %v3870_v48, %v6930_v38  ;;  %v279_v26 = vld [vmem:[%s7266_s16 + $0x20] sm:$0xff] }
0x364d   :  { %v3902_v50 = vmul.f32 %v3871_v32, %v6918_v19  ;;  %v3876_v52 = vmul.f32 %v3868_v30, %v6934_v21  ;;  %v3903_v15 = vmul.f32 %v3872_v39, %v6926_v17  ;;  %v3904_v55 = vmul.f32 %v3873_v46, %v6928_v18  ;;  %v282_v30 = vld [vmem:[%s7267_s9] sm:$0xff] }
0x364e   :  { %v3906_v1 = vsel %vm1027_vm5, %v3898_v36, 0.0  ;;  %v3907_v49 = vsel %vm1027_vm5, %v3899_v42, 0.0  ;;  %v3909_v10 = vsel %vm1027_vm5, %v3900_v37, 0.0  ;;  %v3911_v38 = vsel %vm1027_vm5, %v3901_v44, 0.0  ;;  %v281_v42 = vld [vmem:[%s7268_s25] sm:$0x7] }
0x364f   :  { %v3908_v51 = vadd.f32 %v3907_v49, %v3906_v1  ;;  %v3913_v34 = vsel %vm1027_vm5, %v3902_v50, 0.0  ;;  %v3877_v19 = vmul.f32 %v3869_v31, %v6936_v0  ;;  %v3884_v58 = vsel %vm1027_vm5, %v3876_v52, 0.0  ;;  %v283_v31 = vld [vmem:[%s7267_s9 + $0x8] sm:$0xff] }
0x3650   :  { %v3875_v59 = vmul.f32 %v3867_v29, %v6950_v27  ;;  %v5716_v21 = vpack.c.bf16 %v279_v26, %v276_v53  ;;  %v3905_v61 = vmul.f32 %v3874_v54, %v6940_v23  ;;  %v3915_v62 = vsel %vm1027_vm5, %v3903_v15, 0.0 }
0x3651   :  { %v3910_v25 = vadd.f32 %v3909_v10, %v3908_v51  ;;  %v3878_v17 = vmul.f32 %v3870_v48, %v6922_v16  ;;  %v3917_v63 = vsel %vm1027_vm5, %v3904_v55, 0.0  ;;  %v3879_v0 = vmul.f32 %v3871_v32, %v6971_v47 }
0x3652   :  { %v3883_v14 = vsel %vm1027_vm5, %v3875_v59, 0.0  ;;  %5717 = vmatprep.subr.bf16.mxu1 %v5716_v21  ;;  %v3886_v2 = vsel %vm1027_vm5, %v3877_v19, 0.0  ;;  %v3919_v3 = vsel %vm1027_vm5, %v3905_v61, 0.0  ;;  %v3880_v23 = vmul.f32 %v3872_v39, %v6964_v40  ;;  %v5371_v39 = vld [vmem:[%s7269_s21] ss:$0 sm:$0xff] }
0x3653   :  { %v3912_v56 = vadd.f32 %v3911_v38, %v3910_v25  ;;  %v3885_v43 = vadd.f32 %v3884_v58, %v3883_v14  ;;  %v3888_v16 = vsel %vm1027_vm5, %v3878_v17, 0.0  ;;  %v3881_v12 = vmul.f32 %v3873_v46, %v6966_v41  ;;  %v278_v41 = vld [vmem:[%s7266_s16 + $0x18] sm:$0xff] }
0x3654   :  { %v3890_v13 = vsel %vm1027_vm5, %v3879_v0, 0.0  ;;  %v3882_v11 = vmul.f32 %v3874_v54, %v6960_v33  ;;  %v3892_v35 = vsel %vm1027_vm5, %v3880_v23, 0.0  ;;  %v5718_v29 = vpack.c.bf16 %v278_v41, %v275_v28  ;;  %v7088_v54 = vld [vmem:[%s7270_s22] ss:$0 sm:$0xff] }
0x3655   :  { %v3914_v60 = vadd.f32 %v3913_v34, %v3912_v56  ;;  %v3887_v7 = vadd.f32 %v3886_v2, %v3885_v43  ;;  %v3894_v20 = vsel %vm1027_vm5, %v3881_v12, 0.0  ;;  %v7060_v33 = vpack.c.bf16 %v283_v31, %v282_v30 }
0x3656   :  { %v3896_v24 = vsel %vm1027_vm5, %v3882_v11, 0.0  ;;  %v4019_v36 = vsub.s32 2, %v6490_v4  ;;  %v4015_v44 = vsub.s32 1, %v6490_v4  ;;  %v4011_v56 = vsub.s32 0, %v6490_v4 }
0x3657   :  { %v3916_v18 = vadd.f32 %v3915_v62, %v3914_v60  ;;  %v3889_v6 = vadd.f32 %v3888_v16, %v3887_v7 }
0x3658   :  { %v4020_v37 = vrot.slane %v281_v42, %v4019_v36  ;;  %v4016_v52 = vrot.slane %v281_v42, %v4015_v44  ;;  %v4012_v34 = vrot.slane %v281_v42, %v4011_v56 }
0x3659   :  { %v3918_v27 = vadd.f32 %v3917_v63, %v3916_v18  ;;  %v3891_v47 = vadd.f32 %v3890_v13, %v3889_v6 }
0x365b   :  { %v3920_v5 = vadd.f32 %v3919_v3, %v3918_v27  ;;  %v3893_v40 = vadd.f32 %v3892_v35, %v3891_v47 }
0x365d   :  { %3922 = vrot.lane.b32.xlu0 %v3920_v5, %s6281_s18  ;;  %v3895_v22 = vadd.f32 %v3894_v20, %v3893_v40 }
0x365f   :  { %v3897_v9 = vadd.f32 %v3896_v24, %v3895_v22 }
0x36cf   :  { %v3923_v48 = vpop.permute.xlu0 %3922 }
0x36d0   :  { %v3925_v32 = vsel %vm907_vm7, %v3897_v9, %v3923_v48 }
0x36d1   :  { %5641 = vmatmul.mubr.msk.f32.vlgmr.msra.gmra.mrb[24].mxu1 %vm3932_vm9, %v3925_v32  ;;  %5648 = vmatmul.mubr.msk.f32.vlgmr.msra.gmra.mrb[22].mxu0 %vm3932_vm9, %v3925_v32 }
0x36d2   :  { %5719 = vmatpush1.bf16.msra.mxu1 %v5718_v29  ;;  %4088 = vmatprep.mubr.f32.mxu1 %v6274_v45 }
0x36d3   :  { %5723 = vmatprep.subr.bf16.mxu1 %v6280_v57  ;;  %5728 = vmatpush3.bf16.msra.mxu0 %v7060_v33 }
0x36d4   :  { %5661 = vmatprep.mubr.msk.f32.mxu0 %vm6275_vm2, %v6274_v45  ;;  %5732 = vmatprep.subr.bf16.mxu0 %v6280_v57 }
0x36d5   :  { %5373 = vmatmul.mubr.msk.f32.vlgmr.msra.gmra.mrb[26].mxu1 %vm3932_vm9, %v3925_v32 }
0x36d6   :  { %5725 = vmatpush3.bf16.msra.mxu1 %v7060_v33  ;;  %5654 = vmatprep.mubr.msk.f32.mxu1 %vm6275_vm2, %v6274_v45 }
0x36d7   :  { %5729 = vmatprep.subr.bf16.mxu1 %v6280_v57 }
0x36d9   :  { %5655 = vmatmul.mubr.f32.vlgmr.msra.gmra.mrb[28].mxu1 %v6274_v45 }
0x36da   :  { %5731 = vmatpush3.bf16.msra.mxu1 %v7060_v33  ;;  %5668 = vmatprep.mubr.msk.f32.mxu1 %vm6275_vm2, %v6274_v45 }
0x36db   :  { %5735 = vmatprep.subr.bf16.mxu1 %v6280_v57 }
0x37a4   :  { %v4002_v1 = vpop.f32.mrb[24].mxu1  ;;  %v4161_v49 = vpop.f32.mrb[22].mxu0 }
0x37a5   :  { %v4003_v46 = vadd.f32 %v5371_v39, %v4002_v1  ;;  %v7082_v50 = vadd.f32 %v4161_v49, %v4020_v37  ;;  %v5642_v51 = vpop.f32.mrb[25].mxu1  ;;  %v5649_v10 = vpop.f32.mrb[23].mxu0 }
0x37a7   :  { %4007 = vst.msk [vmem:[#allocation23] sm:$0x3] %vm4006_vm10, %v4003_v46 }
0x37a8   :  { %v4090_v25 = vpop.f32.mrb[26].mxu1 }
0x37a9   :  { %v4092_v53 = vpop.f32.mrb[27].mxu1  ;;  %v7093_v19 = vadd.f32 %v4090_v25, %v4012_v34 }
0x37aa   :  { %v7085_v26 = vadd.f32 %v4092_v53, %v4016_v52 }
0x37ac   :  { %v4239_v15 = vpop.f32.mrb[28].mxu1 }
0x37ad   :  { %v4240_v38 = vadd.f32 %v7088_v54, %v4239_v15  ;;  %v5656_v55 = vpop.f32.mrb[29].mxu1 }
0x37af   :  { %4251 = vrot.lane.b32.xlu1 %v4240_v38, %s6282_s23  ;;  %v4243_v58 = vadd.f32 %v4240_v38, %v7093_v19 }
0x37b1   :  { %v5376_v59 = vmul.f32 -1.442695, %v4243_v58 }
0x37b3   :  { %5947 = vpow2.f32 %v5376_v59 }
0x37bd   :  { %v5948_v21 = vpop.eup %5947 }
0x37be   :  { %v4247_v60 = vadd.f32 1.0, %v5948_v21 }
0x37c0   :  { %5949 = vrcp.f32 %v4247_v60 }
0x37ca   :  { %v5950_v61 = vpop.eup %5949 }
0x37cb   :  { %v4261_v43 = vsub.f32 1.0, %v5950_v61  ;;  %v4267_v0 = vmul.f32 0.0, %v5950_v61 }
0x3821   :  { %v4252_v62 = vpop.permute.xlu1 %4251 }
0x3822   :  { %v4254_v17 = vmul.f32 %v5950_v61, %v4252_v62 }
0x3824   :  { %4256 = vrot.lane.b32.xlu1 %v4254_v17, %s6283_s26 }
0x3896   :  { %v4257_v14 = vpop.permute.xlu1 %4256 }
0x3897   :  { %v4259_v18 = vadd.f32 %v4257_v14, %v7093_v19 }
0x3899   :  { %5951 = vtanh.f32 %v4259_v18 }
0x38a3   :  { %v5952_v4 = vpop.eup %5951 }
0x38a4   :  { %4263 = vrot.lane.b32.xlu0 %v5952_v4, %s6277_s13 }
0x3916   :  { %v4264_v63 = vpop.permute.xlu0 %4263 }
0x3917   :  { %v4266_v2 = vmul.f32 %v4264_v63, %v4261_v43 }
0x3919   :  { %v4268_v27 = vadd.f32 %v4267_v0, %v4266_v2 }
0x391b   :  { %4270 = vrot.lane.b32.xlu1 %v4268_v27, %s6277_s13 }
0x398d   :  { %v4271_v7 = vpop.permute.xlu1 %4270 }
0x398e   :  { %4273 = vst.msk [vmem:[#allocation6] sm:$0x3] %vm3787_vm8, %v4271_v7  ;;  %5662 = vmatmul.mubr.msk.f32.vlgmr.msra.gmra.mrb[24].mxu0 %vm3932_vm9, %v4271_v7 }
0x398f   :  { %5734 = vmatpush3.bf16.msra.mxu0 %v7060_v33  ;;  %5675 = vmatprep.mubr.msk.f32.mxu0 %vm6275_vm2, %v6274_v45 }
0x3990   :  { %5738 = vmatprep.subr.bf16.mxu0 %v6280_v57 }
0x3a61   :  { %v4342_v3 = vpop.f32.mrb[24].mxu0 }
0x3a62   :  { %v4343_v23 = vadd.f32 %v7088_v54, %v4342_v3  ;;  %v5663_v16 = vpop.f32.mrb[25].mxu0 }
0x3a64   :  { %4357 = vrot.lane.b32.xlu1 %v4343_v23, %s6278_s8  ;;  %4347 = vrot.lane.b32.xlu0 %v4343_v23, %s6284_s3 }
0x3ad6   :  { %v4348_v5 = vpop.permute.xlu0 %4347  ;;  %v4358_v35 = vpop.permute.xlu1 %4357 }
0x3ad7   :  { %v4350_v6 = vadd.f32 %v4348_v5, %v7093_v19 }
0x3ad9   :  { %v5378_v12 = vmul.f32 -1.442695, %v4350_v6 }
0x3adb   :  { %5953 = vpow2.f32 %v5378_v12 }
0x3ae5   :  { %v5954_v13 = vpop.eup %5953 }
0x3ae6   :  { %v4354_v47 = vadd.f32 1.0, %v5954_v13 }
0x3ae8   :  { %5955 = vrcp.f32 %v4354_v47 }
0x3af2   :  { %v5956_v11 = vpop.eup %5955 }
0x3af3   :  { %v4360_v40 = vmul.f32 %v5956_v11, %v4358_v35  ;;  %v4367_v28 = vsub.f32 1.0, %v5956_v11 }
0x3af5   :  { %4362 = vrot.lane.b32.xlu0 %v4360_v40, %s6283_s26 }
0x3af9   :  { %4373 = vrot.lane.b32.xlu0 %v4268_v27, %s6284_s3 }
0x3b67   :  { %v4363_v20 = vpop.permute.xlu0 %4362 }
0x3b68   :  { %v4365_v22 = vadd.f32 %v4363_v20, %v7093_v19 }
0x3b6a   :  { %5957 = vtanh.f32 %v4365_v22 }
0x3b6b   :  { %v4374_v9 = vpop.permute.xlu0 %4373 }
0x3b6c   :  { %v4376_v29 = vmul.f32 %v5956_v11, %v4374_v9 }
0x3b74   :  { %v5958_v24 = vpop.eup %5957 }
0x3b75   :  { %4369 = vrot.lane.b32.xlu1 %v5958_v24, %s6277_s13 }
0x3be7   :  { %v4370_v41 = vpop.permute.xlu1 %4369 }
0x3be8   :  { %v4372_v30 = vmul.f32 %v4370_v41, %v4367_v28 }
0x3bea   :  { %v4377_v31 = vadd.f32 %v4376_v29, %v4372_v30 }
0x3bec   :  { %4379 = vrot.lane.b32.xlu1 %v4377_v31, %s6267_s0 }
0x3c5e   :  { %v4380_v48 = vpop.permute.xlu1 %4379 }
0x3c5f   :  { %4383 = vst.msk [vmem:[#allocation6 + $0x2] sm:$0x3] %vm3787_vm8, %v4380_v48  ;;  %5669 = vmatmul.mubr.msk.f32.vlgmr.msra.gmra.mrb[30].mxu1 %vm3932_vm9, %v4380_v48 }
0x3c60   :  { %5737 = vmatpush3.bf16.msra.mxu1 %v7060_v33  ;;  %5682 = vmatprep.mubr.msk.f32.mxu1 %vm6275_vm2, %v6274_v45 }
0x3c61   :  { %5741 = vmatprep.subr.bf16.mxu1 %v6280_v57 }
0x3d32   :  { %v4452_v32 = vpop.f32.mrb[30].mxu1 }
0x3d33   :  { %v4453_v36 = vadd.f32 %v7088_v54, %v4452_v32  ;;  %v5670_v42 = vpop.f32.mrb[31].mxu1 }
0x3d35   :  { %4467 = vrot.lane.b32.xlu1 %v4453_v36, %s6267_s0  ;;  %4457 = vrot.lane.b32.xlu0 %v4453_v36, %s6282_s23 }
0x3da7   :  { %v4458_v37 = vpop.permute.xlu0 %4457  ;;  %v4468_v51 = vpop.permute.xlu1 %4467 }
0x3da8   :  { %v4460_v39 = vadd.f32 %v4458_v37, %v7093_v19 }
0x3daa   :  { %v5380_v44 = vmul.f32 -1.442695, %v4460_v39 }
0x3dac   :  { %5959 = vpow2.f32 %v5380_v44 }
0x3db6   :  { %v5960_v1 = vpop.eup %5959 }
0x3db7   :  { %v4464_v49 = vadd.f32 1.0, %v5960_v1 }
0x3db9   :  { %5961 = vrcp.f32 %v4464_v49 }
0x3dc3   :  { %v5962_v46 = vpop.eup %5961 }
0x3dc4   :  { %v4470_v10 = vmul.f32 %v5962_v46, %v4468_v51  ;;  %v4477_v38 = vsub.f32 1.0, %v5962_v46 }
0x3dc6   :  { %4472 = vrot.lane.b32.xlu0 %v4470_v10, %s6283_s26 }
0x3dca   :  { %4483 = vrot.lane.b32.xlu0 %v4377_v31, %s6284_s3 }
0x3e38   :  { %v4473_v52 = vpop.permute.xlu0 %4472 }
0x3e39   :  { %v4475_v25 = vadd.f32 %v4473_v52, %v7085_v26 }
0x3e3b   :  { %5963 = vtanh.f32 %v4475_v25 }
0x3e3c   :  { %v4484_v15 = vpop.permute.xlu0 %4483 }
0x3e3d   :  { %v4486_v56 = vmul.f32 %v5962_v46, %v4484_v15 }
0x3e45   :  { %v5964_v53 = vpop.eup %5963 }
0x3e46   :  { %4479 = vrot.lane.b32.xlu1 %v5964_v53, %s6277_s13 }
0x3eb8   :  { %v4480_v55 = vpop.permute.xlu1 %4479 }
0x3eb9   :  { %v4482_v34 = vmul.f32 %v4480_v55, %v4477_v38 }
0x3ebb   :  { %v4487_v19 = vadd.f32 %v4486_v56, %v4482_v34 }
0x3ebd   :  { %4489 = vrot.lane.b32.xlu1 %v4487_v19, %s6278_s8 }
0x3f2f   :  { %v4490_v58 = vpop.permute.xlu1 %4489 }
0x3f30   :  { %4493 = vst.msk [vmem:[#allocation6 + $0x4] sm:$0x3] %vm3787_vm8, %v4490_v58  ;;  %5676 = vmatmul.mubr.msk.f32.vlgmr.msra.gmra.mrb[26].mxu0 %vm3932_vm9, %v4490_v58 }
0x3f31   :  { %5740 = vmatpush3.bf16.msra.mxu0 %v7060_v33  ;;  %5689 = vmatprep.mubr.msk.f32.mxu0 %vm6275_vm2, %v6274_v45 }
0x3f32   :  { %5744 = vmatprep.subr.bf16.mxu0 %v6280_v57 }
0x4003   :  { %v4562_v59 = vpop.f32.mrb[26].mxu0 }
0x4004   :  { %v4563_v21 = vadd.f32 %v7088_v54, %v4562_v59  ;;  %v5677_v60 = vpop.f32.mrb[27].mxu0  ;;  %v5043_v59 = vld [vmem:[#allocation6 + $0x2] sm:$0x3] }
0x4005   :  { %v7173_v60 = vstv %s5051_s28 }
0x4006   :  { %4577 = vrot.lane.b32.xlu1 %v4563_v21, %s6277_s13  ;;  %4567 = vrot.lane.b32.xlu0 %v4563_v21, %s6278_s8  ;;  %v5044_v21 = vld [vmem:[#allocation6 + $0x4] sm:$0x3] }
0x4078   :  { %v4568_v61 = vpop.permute.xlu0 %4567  ;;  %v4578_v43 = vpop.permute.xlu1 %4577 }
0x4079   :  { %v4570_v62 = vadd.f32 %v4568_v61, %v7085_v26 }
0x407b   :  { %v5382_v17 = vmul.f32 -1.442695, %v4570_v62  ;;  %v5042_v62 = vld [vmem:[#allocation6] sm:$0x3] }
0x407d   :  { %5965 = vpow2.f32 %v5382_v17  ;;  %v5054_v17 = vmul.f32 %v7173_v60, %v5043_v59 }
0x4087   :  { %v5966_v14 = vpop.eup %5965 }
0x4088   :  { %v4574_v18 = vadd.f32 1.0, %v5966_v14  ;;  %v5055_v14 = vmul.f32 %v7173_v60, %v5044_v21 }
0x408a   :  { %5967 = vrcp.f32 %v4574_v18 }
0x4094   :  { %v5968_v4 = vpop.eup %5967 }
0x4095   :  { %v4580_v63 = vmul.f32 %v5968_v4, %v4578_v43  ;;  %v4587_v7 = vsub.f32 1.0, %v5968_v4 }
0x4097   :  { %4582 = vrot.lane.b32.xlu0 %v4580_v63, %s6283_s26 }
0x409b   :  { %4593 = vrot.lane.b32.xlu0 %v4487_v19, %s6284_s3 }
0x4109   :  { %v4583_v57 = vpop.permute.xlu0 %4582 }
0x410a   :  { %v4585_v0 = vadd.f32 %v4583_v57, %v7085_v26 }
0x410c   :  { %5969 = vtanh.f32 %v4585_v0 }
0x410d   :  { %v4594_v27 = vpop.permute.xlu0 %4593 }
0x410e   :  { %v4596_v23 = vmul.f32 %v5968_v4, %v4594_v27  ;;  %v5053_v4 = vmul.f32 %v7173_v60, %v5042_v62 }
0x4110   :  { %v5075_v63 = vcombine.low %v5053_v4, %v5054_v17 }
0x4116   :  { %v5970_v2 = vpop.eup %5969 }
0x4117   :  { %4589 = vrot.lane.b32.xlu1 %v5970_v2, %s6277_s13 }
0x4189   :  { %v4590_v3 = vpop.permute.xlu1 %4589 }
0x418a   :  { %v4592_v16 = vmul.f32 %v4590_v3, %v4587_v7  ;;  %v5083_v3 = vrot.slane %v5075_v63, %v6495_v8 }
0x418c   :  { %v4597_v5 = vadd.f32 %v4596_v23, %v4592_v16 }
0x418e   :  { %4599 = vrot.lane.b32.xlu1 %v4597_v5, %s6282_s23 }
0x4200   :  { %v4600_v6 = vpop.permute.xlu1 %4599 }
0x4201   :  { %4603 = vst.msk [vmem:[#allocation6 + $0x6] sm:$0x3] %vm3787_vm8, %v4600_v6  ;;  %5683 = vmatmul.mubr.msk.f32.vlgmr.msra.gmra.mrb[32].mxu1 %vm3932_vm9, %v4600_v6 }
0x4202   :  { %5743 = vmatpush3.bf16.msra.mxu1 %v7060_v33  ;;  %5696 = vmatprep.mubr.msk.f32.mxu1 %vm6275_vm2, %v6274_v45 }
0x4208   :  { %v5045_v58 = vld [vmem:[#allocation6 + $0x6] sm:$0x3] }
0x4209   :  { %v5056_v61 = vmul.f32 %v7173_v60, %v5045_v58 }
0x420b   :  { %v5076_v43 = vcombine.low %v5055_v14, %v5056_v61 }
0x420d   :  { %v5090_v2 = vrot.slane %v5076_v43, %v6495_v8 }
0x420f   :  { %v5091_v16 = vcombine.low %v5083_v3, %v5090_v2 }
0x42d4   :  { %v4672_v12 = vpop.f32.mrb[32].mxu1 }
0x42d5   :  { %v4673_v13 = vadd.f32 %v7088_v54, %v4672_v12  ;;  %v5684_v47 = vpop.f32.mrb[33].mxu1 }
0x42d7   :  { %4687 = vrot.lane.b32.xlu1 %v4673_v13, %s6283_s26  ;;  %4677 = vrot.lane.b32.xlu0 %v4673_v13, %s6267_s0  ;;  %s6285_s0 = smov 80  }
0x4349   :  { %v4678_v11 = vpop.permute.xlu0 %4677  ;;  %v4688_v9 = vpop.permute.xlu1 %4687 }
0x434a   :  { %v4680_v35 = vadd.f32 %v4678_v11, %v7085_v26 }
0x434c   :  { %v5384_v40 = vmul.f32 -1.442695, %v4680_v35 }
0x434e   :  { %5971 = vpow2.f32 %v5384_v40 }
0x4358   :  { %v5972_v20 = vpop.eup %5971 }
0x4359   :  { %v4684_v22 = vadd.f32 1.0, %v5972_v20 }
0x435b   :  { %5973 = vrcp.f32 %v4684_v22 }
0x4365   :  { %v5974_v24 = vpop.eup %5973 }
0x4366   :  { %v4690_v28 = vmul.f32 %v5974_v24, %v4688_v9  ;;  %v4697_v48 = vsub.f32 1.0, %v5974_v24 }
0x4368   :  { %4692 = vrot.lane.b32.xlu0 %v4690_v28, %s6283_s26 }
0x436c   :  { %4703 = vrot.lane.b32.xlu0 %v4597_v5, %s6284_s3 }
0x43da   :  { %v4693_v41 = vpop.permute.xlu0 %4692 }
0x43db   :  { %v4695_v29 = vadd.f32 %v4693_v41, %v7085_v26 }
0x43dd   :  { %5975 = vtanh.f32 %v4695_v29 }
0x43de   :  { %v4704_v31 = vpop.permute.xlu0 %4703 }
0x43df   :  { %v4706_v36 = vmul.f32 %v5974_v24, %v4704_v31 }
0x43e7   :  { %v5976_v30 = vpop.eup %5975 }
0x43e8   :  { %4699 = vrot.lane.b32.xlu1 %v5976_v30, %s6277_s13 }
0x445a   :  { %v4700_v32 = vpop.permute.xlu1 %4699 }
0x445b   :  { %v4702_v42 = vmul.f32 %v4700_v32, %v4697_v48 }
0x445d   :  { %v4707_v37 = vadd.f32 %v4706_v36, %v4702_v42 }
0x445f   :  { %4709 = vrot.lane.b32.xlu1 %v4707_v37, %s6284_s3 }
0x44d1   :  { %v4710_v39 = vpop.permute.xlu1 %4709 }
0x44d2   :  { %4713 = vst.msk [vmem:[#allocation6 + $0x8] sm:$0x3] %vm3787_vm8, %v4710_v39  ;;  %5690 = vmatmul.mubr.msk.f32.vlgmr.msra.gmra.mrb[28].mxu0 %vm3932_vm9, %v4710_v39 }
0x44d3   :  { %5746 = vmatpush3.bf16.msra.mxu0 %v7060_v33  ;;  %5703 = vmatprep.mubr.msk.f32.mxu0 %vm6275_vm2, %v6274_v45 }
0x44d9   :  { %v5046_v21 = vld [vmem:[#allocation6 + $0x8] sm:$0x3] }
0x44da   :  { %v5057_v17 = vmul.f32 %v7173_v60, %v5046_v21 }
0x45a5   :  { %v4782_v44 = vpop.f32.mrb[28].mxu0 }
0x45a6   :  { %v4783_v1 = vadd.f32 %v7088_v54, %v4782_v44  ;;  %v5691_v49 = vpop.f32.mrb[29].mxu0 }
0x45a8   :  { %4804 = vrot.lane.b32.xlu1 %v4783_v1, %s6285_s0  ;;  %4787 = vrot.lane.b32.xlu0 %v4783_v1, %s6277_s13 }
0x461a   :  { %v4788_v46 = vpop.permute.xlu0 %4787  ;;  %v4805_v45 = vpop.permute.xlu1 %4804 }
0x461b   :  { %v4790_v51 = vadd.f32 %v4788_v46, %v7085_v26  ;;  %v4791_v26 = vadd.f32 %v4788_v46, %v7082_v50 }
0x461d   :  { %v5386_v10 = vmul.f32 -1.442695, %v4790_v51  ;;  %v5387_v56 = vmul.f32 -1.442695, %v4791_v26 }
0x461f   :  { %5977 = vpow2.f32 %v5386_v10 }
0x4629   :  { %v5978_v52 = vpop.eup %5977 }
0x462a   :  { %v4798_v25 = vadd.f32 1.0, %v5978_v52 }
0x462c   :  { %5979 = vrcp.f32 %v4798_v25 }
0x4636   :  { %v5980_v33 = vpop.eup %5979 }
0x4637   :  { %v4807_v53 = vmul.f32 %v5980_v33, %v4805_v45 }
0x4639   :  { %4809 = vrot.lane.b32.xlu0 %v4807_v53, %s6283_s26  ;;  %v285_v53 = vld [vmem:[%s7271_s4] sm:$0xff] }
0x46ab   :  { %v4810_v15 = vpop.permute.xlu0 %4809 }
0x46ac   :  { %v4812_v38 = vadd.f32 %v4810_v15, %v7082_v50  ;;  %v286_v15 = vld [vmem:[%s7271_s4 + $0x8] sm:$0xff] }
0x46ae   :  { %5981 = vtanh.f32 %v4812_v38  ;;  %v5747_v38 = vpack.c.bf16 %v286_v15, %v285_v53 }
0x46af   :  { %5983 = vpow2.f32 %v5387_v56 }
0x46b0   :  { %5748 = vmatprep.subr.bf16.mxu1 %v5747_v38 }
0x46b8   :  { %v5982_v55 = vpop.eup %5981 }
0x46b9   :  { %4816 = vrot.lane.b32.xlu1 %v5982_v55, %s6277_s13  ;;  %v5984_v34 = vpop.eup %5983 }
0x46ba   :  { %v4799_v19 = vadd.f32 1.0, %v5984_v34 }
0x46bc   :  { %5985 = vrcp.f32 %v4799_v19 }
0x46c6   :  { %v5986_v18 = vpop.eup %5985 }
0x46c7   :  { %v4814_v57 = vsub.f32 1.0, %v5986_v18  ;;  %v4820_v27 = vmul.f32 %v5986_v18, %v4710_v39 }
0x472b   :  { %v4817_v0 = vpop.permute.xlu1 %4816 }
0x472c   :  { %v4819_v7 = vmul.f32 %v4817_v0, %v4814_v57 }
0x472e   :  { %v4821_v23 = vadd.f32 %v4820_v27, %v4819_v7 }
0x4730   :  { %4823 = vst.msk [vmem:[#allocation6 + $0xa] sm:$0x3] %vm3787_vm8, %v4821_v23  ;;  %5697 = vmatmul.mubr.msk.f32.vlgmr.msra.gmra.mrb[34].mxu1 %vm3932_vm9, %v4821_v23 }
0x4731   :  { %5710 = vmatprep.mubr.msk.f32.mxu1 %vm3932_vm9, %v5091_v16  ;;  %5750 = vmatpush3.bf16.msra.mxu1 %v5747_v38 }
0x4803   :  { %v4893_v5 = vpop.f32.mrb[34].mxu1 }
0x4804   :  { %v4894_v6 = vadd.f32 %v7088_v54, %v4893_v5  ;;  %v5698_v12 = vpop.f32.mrb[35].mxu1 }
0x4806   :  { %4898 = vrot.lane.b32.xlu0 %v4894_v6, %s6283_s26 }
0x4878   :  { %v4899_v13 = vpop.permute.xlu0 %4898 }
0x4879   :  { %v4901_v47 = vadd.f32 %v4899_v13, %v7082_v50 }
0x487b   :  { %v5389_v11 = vmul.f32 -1.442695, %v4901_v47 }
0x487d   :  { %5987 = vpow2.f32 %v5389_v11 }
0x4887   :  { %v5988_v35 = vpop.eup %5987 }
0x4888   :  { %v4905_v40 = vadd.f32 1.0, %v5988_v35 }
0x488a   :  { %5989 = vrcp.f32 %v4905_v40 }
0x4894   :  { %v5990_v20 = vpop.eup %5989 }
0x4895   :  { %v4908_v22 = vmul.f32 %v5990_v20, %v4894_v6  ;;  %v4915_v29 = vsub.f32 1.0, %v5990_v20 }
0x4897   :  { %4910 = vrot.lane.b32.xlu1 %v4908_v22, %s6283_s26 }
0x489b   :  { %4921 = vrot.lane.b32.xlu1 %v4821_v23, %s6284_s3 }
0x4909   :  { %v4911_v24 = vpop.permute.xlu1 %4910 }
0x490a   :  { %v4913_v9 = vadd.f32 %v4911_v24, %v7082_v50 }
0x490c   :  { %5991 = vtanh.f32 %v4913_v9 }
0x490d   :  { %v4922_v41 = vpop.permute.xlu1 %4921 }
0x490e   :  { %v4924_v31 = vmul.f32 %v5990_v20, %v4922_v41 }
0x4916   :  { %v5992_v28 = vpop.eup %5991 }
0x4917   :  { %4917 = vrot.lane.b32.xlu0 %v5992_v28, %s6277_s13 }
0x4989   :  { %v4918_v30 = vpop.permute.xlu0 %4917 }
0x498a   :  { %v4920_v48 = vmul.f32 %v4918_v30, %v4915_v29 }
0x498c   :  { %v4925_v32 = vadd.f32 %v4924_v31, %v4920_v48 }
0x498e   :  { %4927 = vrot.lane.b32.xlu0 %v4925_v32, %s6285_s0 }
0x4a00   :  { %v4928_v36 = vpop.permute.xlu0 %4927 }
0x4a01   :  { %4931 = vst.msk [vmem:[#allocation6 + $0xc] sm:$0x3] %vm3787_vm8, %v4928_v36  ;;  %5704 = vmatmul.mubr.msk.f32.vlgmr.msra.gmra.mrb[30].mxu0 %vm3932_vm9, %v4928_v36 }
0x4a08   :  { %v5048_v62 = vld [vmem:[#allocation6 + $0xc] sm:$0x3] }
0x4a09   :  { %v5059_v18 = vmul.f32 %v7173_v60, %v5048_v62 }
0x4ad4   :  { %v5000_v42 = vpop.f32.mrb[30].mxu0 }
0x4ad5   :  { %v5001_v37 = vadd.f32 %v7088_v54, %v5000_v42  ;;  %v5705_v39 = vpop.f32.mrb[31].mxu0 }
0x4ad7   :  { %5015 = vrot.lane.b32.xlu0 %v5001_v37, %s6284_s3  ;;  %5005 = vrot.lane.b32.xlu1 %v5001_v37, %s6285_s0 }
0x4b49   :  { %v5006_v44 = vpop.permute.xlu1 %5005  ;;  %v5016_v52 = vpop.permute.xlu0 %5015 }
0x4b4a   :  { %v5008_v1 = vadd.f32 %v5006_v44, %v7082_v50 }
0x4b4c   :  { %v5391_v49 = vmul.f32 -1.442695, %v5008_v1 }
0x4b4e   :  { %5993 = vpow2.f32 %v5391_v49 }
0x4b58   :  { %v5994_v46 = vpop.eup %5993 }
0x4b59   :  { %v5012_v51 = vadd.f32 1.0, %v5994_v46 }
0x4b5b   :  { %5995 = vrcp.f32 %v5012_v51 }
0x4b65   :  { %v5996_v10 = vpop.eup %5995 }
0x4b66   :  { %v5018_v25 = vmul.f32 %v5996_v10, %v5016_v52  ;;  %v5025_v26 = vsub.f32 1.0, %v5996_v10 }
0x4b68   :  { %5020 = vrot.lane.b32.xlu1 %v5018_v25, %s6283_s26 }
0x4b6c   :  { %5031 = vrot.lane.b32.xlu1 %v4925_v32, %s6284_s3 }
0x4bda   :  { %v5021_v54 = vpop.permute.xlu1 %5020 }
0x4bdb   :  { %v5023_v33 = vadd.f32 %v5021_v54, %v7082_v50  ;;  %v5047_v50 = vld [vmem:[#allocation6 + $0xa] sm:$0x3] }
0x4bdc   :  { %v5058_v61 = vmul.f32 %v7173_v60, %v5047_v50 }
0x4bdd   :  { %5997 = vtanh.f32 %v5023_v33 }
0x4bde   :  { %v5032_v55 = vpop.permute.xlu1 %5031  ;;  %v5092_v43 = vcombine.low %v5057_v17, %v5058_v61 }
0x4bdf   :  { %v5034_v34 = vmul.f32 %v5996_v10, %v5032_v55 }
0x4be0   :  { %v5100_v57 = vrot.slane %v5092_v43, %v6495_v8 }
0x4be7   :  { %v5998_v45 = vpop.eup %5997 }
0x4be8   :  { %5027 = vrot.lane.b32.xlu0 %v5998_v45, %s6277_s13 }
0x4c5a   :  { %v5028_v56 = vpop.permute.xlu0 %5027 }
0x4c5b   :  { %v5030_v19 = vmul.f32 %v5028_v56, %v5025_v26 }
0x4c5d   :  { %v5035_v58 = vadd.f32 %v5034_v34, %v5030_v19 }
0x4c5f   :  { %5037 = vrot.lane.b32.xlu0 %v5035_v58, %s6283_s26 }
0x4cd1   :  { %v5038_v59 = vpop.permute.xlu0 %5037 }
0x4cd2   :  { %5041 = vst.msk [vmem:[#allocation6 + $0xe] sm:$0x3] %vm3787_vm8, %v5038_v59 }
0x4cd9   :  { %v5049_v14 = vld [vmem:[#allocation6 + $0xe] sm:$0x3] }
0x4cda   :  { %v5060_v4 = vmul.f32 %v7173_v60, %v5049_v14 }
0x4cdc   :  { %v5093_v63 = vcombine.low %v5059_v18, %v5060_v4 }
0x4cde   :  { %v5107_v0 = vrot.slane %v5093_v63, %v6495_v8 }
0x4ce0   :  { %v5108_v2 = vcombine.low %v5100_v57, %v5107_v0 }
0x4ce2   :  { %5711 = vmatmul.mubr.msk.f32.vlgmr.msra.gmra.mrb[36].mxu1 %vm3932_vm9, %v5108_v2 }
0x4ce3   :  { %6208 = shalt.err (!%p6205_p6)
}
0x4ce4   :  { %s6209_s2 = scalar_lea.hbm %s6445_s6, 32 }
0x4ce5   :  { %p6210_p7 = scmp.ne.s32.totalorder %s6445_s6, %s6209_s2  ;;  %p6213_p8 = scmp.lt.u32.totalorder %s6209_s2, %s6445_s6 }
0x4ce7   :  { %p6215_p9 = pnand %p6213_p8, %p6210_p7 }
0x4ce9   :  { %6218 = shalt.err (!%p6215_p9)
}
0x4cea   :  { %5249 = dma.vmem_to_hbm [thread:$0]  %s5247_s29, 32, %s6445_s6, [#allocation10]   ;;  %v5392_v60 = vld [vmem:[%s6435_s27] ss:$0 sm:$0xff] }
0x4db5   :  { %v5712_v27 = vpop.f32.mrb[36].mxu1 }
0x4db6   :  { %v5185_v7 = vadd.f32 %v5712_v27, %v5392_v60  ;;  %v5179_v3 = vpop.f32.mrb[37].mxu1 }
0x4db7   :  { %v5180_v23 = vadd.f32 %v5392_v60, %v5179_v3 }
0x4db8   :  { %v5207_v16 = vcombine.high %v5185_v7, %v5185_v7  ;;  %v5214_v5 = vrot.slane %v5185_v7, %v6495_v8 }
0x4db9   :  { %v5190_v6 = vcombine.high %v5180_v23, %v5180_v23  ;;  %v5197_v12 = vrot.slane %v5180_v23, %v6495_v8 }
0x4dba   :  { %v5221_v13 = vrot.slane %v5207_v16, %v6495_v8  ;;  %v5222_v47 = vcombine.high %v5214_v5, %v5214_v5  ;;  %5236 = vst.msk [vmem:[%s6450_s20 + $0x8] sm:$0x3] %vm4006_vm10, %v5214_v5 }
0x4dbb   :  { %v5204_v11 = vrot.slane %v5190_v6, %v6495_v8  ;;  %v5205_v35 = vcombine.high %v5197_v12, %v5197_v12  ;;  %5232 = vst.msk [vmem:[%s6450_s20] sm:$0x3] %vm4006_vm10, %v5197_v12 }
0x4dbc   :  { %v5223_v40 = vcombine.high %v5221_v13, %v5221_v13  ;;  %5237 = vst.msk [vmem:[%s6450_s20 + $0xa] sm:$0x3] %vm4006_vm10, %v5222_v47  ;;  %5238 = vst.msk [vmem:[%s6450_s20 + $0xc] sm:$0x3] %vm4006_vm10, %v5221_v13 }
0x4dbd   :  { %v5206_v20 = vcombine.high %v5204_v11, %v5204_v11  ;;  %5233 = vst.msk [vmem:[%s6450_s20 + $0x2] sm:$0x3] %vm4006_vm10, %v5205_v35  ;;  %5234 = vst.msk [vmem:[%s6450_s20 + $0x4] sm:$0x3] %vm4006_vm10, %v5204_v11 }
0x4dbe   :  { %5239 = vst.msk [vmem:[%s6450_s20 + $0xe] sm:$0x3] %vm4006_vm10, %v5223_v40 }
0x4dbf   :  { %5235 = vst.msk [vmem:[%s6450_s20 + $0x6] sm:$0x3] %vm4006_vm10, %v5206_v20 }
0x4dc0   :  { %6229 = dma.done.wait [#allocation10], 32  }
0x4dc1   :  { %6230 = vsyncadd [#allocation10], 4294967264 }
0x4dc2   :  { %5257 = vsyncpa [#allocation9], 1 }
0x4dc3   :  { %5258 = vsyncpa [#allocation12], 1 }
0x4dc4   :  { %5259 = vsyncpa [#allocation15], 1 }
0x4dc5   :  { %5260 = vsyncpa [#allocation18], 1 }
0x4dc6   :  { %5261 = vsyncpa [#allocation21], 1 }
0x4dc7   :  { %5262 = vsyncpa [#allocation10], 1 }

</bundles_post_ra>
